<compile_context>
chip_gen: v6e
topology: v6e:2x2x1
jax: 0.10.0
libtpu: 0.0.40
codegen_flags: <defaults>
</compile_context>

<pallas_src>
import jax
import jax.numpy as jnp
from jax.experimental import pallas as pl
from jax.experimental.pallas import tpu as pltpu

LANES = 128


# --------------------------------------------------------------------------- small helpers
def _round_up(x, m):
    return (x + m - 1) // m * m


def _choose_row_tile(m, max_tile=512):
    """Row-tile: big tiles for big M (pipelined grid), else the whole (8-rounded) extent."""
    return max_tile if m >= max_tile else _round_up(m, 8)


# --------------------------------------------------------------------------- Pallas kernels
def _conv_relu_pool_kernel(a0_ref, a1_ref, a2_ref, a3_ref, w_ref, b_ref, o_ref):
    """Fused conv (as im2col matmul) + bias + ReLU + 2x2 maxpool.

    a{p}_ref: (TM, Kp) phase-p im2col rows   w_ref: (Kp, 128)   b_ref: (1, 128)
    o_ref:    (TM, 128) pooled output (channels padded to 128 lanes).
    """
    w = w_ref[...]
    bias = b_ref[...]

    def branch(a_ref):
        z = jnp.dot(a_ref[...], w, preferred_element_type=jnp.float32) + bias
        return jnp.maximum(z, 0.0)

    y = branch(a0_ref)
    y = jnp.maximum(y, branch(a1_ref))
    y = jnp.maximum(y, branch(a2_ref))
    y = jnp.maximum(y, branch(a3_ref))
    o_ref[...] = y.astype(o_ref.dtype)


def conv_relu_pool_call(a_phases, w, b):
    """a_phases: list of 4 (M, Kp) f32; w: (Kp, 128); b: (1, 128) -> (Mp, 128)."""
    M, Kp = a_phases[0].shape
    TM = _choose_row_tile(M)
    Mp = _round_up(M, TM)
    if Mp != M:
        a_phases = [jnp.pad(a, ((0, Mp - M), (0, 0))) for a in a_phases]

    row_spec = pl.BlockSpec((TM, Kp), lambda i: (i, 0))
    w_spec = pl.BlockSpec(w.shape, lambda i: (0, 0))      # resident across the grid
    b_spec = pl.BlockSpec(b.shape, lambda i: (0, 0))
    return pl.pallas_call(
        _conv_relu_pool_kernel,
        out_shape=jax.ShapeDtypeStruct((Mp, LANES), jnp.float32),
        grid=(Mp // TM,),
        in_specs=[row_spec, row_spec, row_spec, row_spec, w_spec, b_spec],
        out_specs=pl.BlockSpec((TM, LANES), lambda i: (i, 0)),
        compiler_params=pltpu.CompilerParams(dimension_semantics=("parallel",)),
    )(*a_phases, w, b)


def _mlp_kernel(x_ref, w1_ref, b1_ref, w2_ref, b2_ref, w3_ref, b3_ref, o_ref):
    h = jnp.dot(x_ref[...], w1_ref[...], preferred_element_type=jnp.float32) + b1_ref[...]
    h = jnp.maximum(h, 0.0)
    h = jnp.dot(h, w2_ref[...], preferred_element_type=jnp.float32) + b2_ref[...]
    h = jnp.maximum(h, 0.0)
    out = jnp.dot(h, w3_ref[...], preferred_element_type=jnp.float32) + b3_ref[...]
    o_ref[...] = out.astype(o_ref.dtype)


def mlp_call(x, w1, b1, w2, b2, w3, b3):
    """x: (M, K) lane-dense features; weights padded to 128-wide; returns (Mp, 128)."""
    M, K = x.shape
    TM = _choose_row_tile(M, 256)
    Mp = _round_up(M, TM)
    if Mp != M:
        x = jnp.pad(x, ((0, Mp - M), (0, 0)))

    def full(a):
        return pl.BlockSpec(a.shape, lambda i: (0, 0))

    return pl.pallas_call(
        _mlp_kernel,
        out_shape=jax.ShapeDtypeStruct((Mp, LANES), jnp.float32),
        grid=(Mp // TM,),
        in_specs=[pl.BlockSpec((TM, K), lambda i: (i, 0)),
                  full(w1), full(b1), full(w2), full(b2), full(w3), full(b3)],
        out_specs=pl.BlockSpec((TM, LANES), lambda i: (i, 0)),
        compiler_params=pltpu.CompilerParams(dimension_semantics=("parallel",)),
    )(x, w1, b1, w2, b2, w3, b3)


# --------------------------------------------------------------------------- XLA-side prep
def phase_im2col(x, k):
    """x: (N,H,W,C) NHWC.  Valid kxk conv followed by 2x2/2 maxpool.

    Returns (four phase im2col matrices each (N*Po*Qo, Kp) with Kp = round_up(k*k*C, 128)),
    plus pooled spatial dims (Po, Qo).  Row order is (b, pooled_i, pooled_j); column order is
    (kh, kw, cin), zero-padded to Kp.
    """
    N, H, W, C = x.shape
    Ho, Wo = H - k + 1, W - k + 1
    Po, Qo = Ho // 2, Wo // 2
    K = k * k * C
    Kp = _round_up(K, LANES)
    mats = []
    for di in range(2):
        for dj in range(2):
            cols = []
            for kh in range(k):
                for kw in range(k):
                    hs = di + kh
                    ws = dj + kw
                    sl = x[:, hs:hs + 2 * Po - 1:2, ws:ws + 2 * Qo - 1:2, :]  # (N,Po,Qo,C)
                    cols.append(sl.reshape(N * Po * Qo, C))
            a = jnp.concatenate(cols, axis=-1)                               # (rows, K)
            if Kp > K:
                a = jnp.pad(a, ((0, 0), (0, Kp - K)))
            mats.append(a)
    return mats, Po, Qo


def prep_conv_w(w_oihw, bias):
    """Torch OIHW conv weight -> (Kp, 128) matmul weight + (1, 128) bias (zero padded)."""
    O, I, KH, KW = w_oihw.shape
    K = KH * KW * I
    Kp = _round_up(K, LANES)
    wm = jnp.transpose(w_oihw, (2, 3, 1, 0)).reshape(K, O)   # rows ordered (kh, kw, cin)
    wm = jnp.pad(wm, ((0, Kp - K), (0, LANES - O)))
    bp = jnp.pad(bias, (0, LANES - O)).reshape(1, LANES)
    return wm, bp


def prep_fc1_w(fc1_w, fc1_b, c=16, h=5, w=5):
    """Fold the torch NCHW flatten into fc1: build a (h*w*128, 128) weight so the conv2
    kernel output (rows=(b,h,w), lanes=padded channels) feeds fc1 via a pure reshape."""
    O = fc1_w.shape[0]
    wr = fc1_w.reshape(O, c, h, w)                 # [o, c, h, w], torch flatten order c*25+h*5+w
    wr = jnp.transpose(wr, (2, 3, 1, 0))           # [h, w, c, o]
    wr = jnp.pad(wr, ((0, 0), (0, 0), (0, LANES - c), (0, LANES - O)))
    wr = wr.reshape(h * w * LANES, LANES)          # row index = (h*w_dim + w)*128 + c
    bp = jnp.pad(fc1_b, (0, LANES - O)).reshape(1, LANES)
    return wr, bp


def prep_fc_w(fc_w, fc_b):
    O, I = fc_w.shape
    wm = jnp.pad(fc_w.T, ((0, LANES - I), (0, LANES - O)))
    bp = jnp.pad(fc_b, (0, LANES - O)).reshape(1, LANES)
    return wm, bp


# --------------------------------------------------------------------------- the Net forward
def init_params(key):
    ks = jax.random.split(key, 10)
    p = {}
    p["conv1_w"] = 0.1 * jax.random.normal(ks[0], (6, 3, 5, 5), jnp.float32)   # OIHW (torch)
    p["conv1_b"] = 0.1 * jax.random.normal(ks[1], (6,), jnp.float32)
    p["conv2_w"] = 0.1 * jax.random.normal(ks[2], (16, 6, 5, 5), jnp.float32)
    p["conv2_b"] = 0.1 * jax.random.normal(ks[3], (16,), jnp.float32)
    p["fc1_w"] = 0.1 * jax.random.normal(ks[4], (120, 400), jnp.float32)        # (out,in) (torch)
    p["fc1_b"] = 0.1 * jax.random.normal(ks[5], (120,), jnp.float32)
    p["fc2_w"] = 0.1 * jax.random.normal(ks[6], (84, 120), jnp.float32)
    p["fc2_b"] = 0.1 * jax.random.normal(ks[7], (84,), jnp.float32)
    p["fc3_w"] = 0.1 * jax.random.normal(ks[8], (10, 84), jnp.float32)
    p["fc3_b"] = 0.1 * jax.random.normal(ks[9], (10,), jnp.float32)
    return p


def net_forward(x_nchw, p):
    N = x_nchw.shape[0]
    x = jnp.transpose(x_nchw, (0, 2, 3, 1))                    # NCHW -> NHWC (3 channels)

    # stage 1: conv1 (3->6, k=5) + ReLU + pool, fused in one kernel.  -> (N,14,14, lanes=128)
    a1, po1, qo1 = phase_im2col(x, 5)
    w1m, b1p = prep_conv_w(p["conv1_w"], p["conv1_b"])
    y1 = conv_relu_pool_call(a1, w1m, b1p)                     # (rows_pad, 128)
    y1 = y1[: N * po1 * qo1].reshape(N, po1, qo1, LANES)[..., :6]

    # stage 2: conv2 (6->16, k=5) + ReLU + pool, fused in one kernel. -> rows=(b,5,5), 128 lanes
    a2, po2, qo2 = phase_im2col(y1, 5)
    w2m, b2p = prep_conv_w(p["conv2_w"], p["conv2_b"])
    y2 = conv_relu_pool_call(a2, w2m, b2p)                     # (rows_pad, 128)

    # torch.flatten(x, 1) on NCHW is folded into the fc1 weight permutation, so the conv2
    # kernel output feeds the MLP through a pure metadata reshape (no HBM transpose).
    feat = y2[: N * po2 * qo2].reshape(N, po2 * qo2 * LANES)   # (N, 3200)

    w_fc1, b_fc1 = prep_fc1_w(p["fc1_w"], p["fc1_b"], c=16, h=po2, w=qo2)
    w_fc2, b_fc2 = prep_fc_w(p["fc2_w"], p["fc2_b"])
    w_fc3, b_fc3 = prep_fc_w(p["fc3_w"], p["fc3_b"])
    out = mlp_call(feat, w_fc1, b_fc1, w_fc2, b_fc2, w_fc3, b_fc3)
    return out[:N, :10]


def net_reference(x_nchw, p):
    """Pure-jnp reference with identical math (sanity check)."""
    x = jnp.transpose(x_nchw, (0, 2, 3, 1))
    N = x.shape[0]

    def conv_relu_pool(x, w, b):
        cout, cin, k, _ = w.shape
        ho, wo = x.shape[1] - k + 1, x.shape[2] - k + 1
        cols = []
        for kh in range(k):
            for kw in range(k):
                cols.append(x[:, kh:kh + ho, kw:kw + wo, :])
        cols = jnp.concatenate(cols, axis=-1)
        wm = jnp.transpose(w, (2, 3, 1, 0)).reshape(k * k * cin, cout)
        y = jnp.maximum(jnp.einsum("nhwk,kc->nhwc", cols, wm) + b, 0.0)
        y = jnp.maximum(jnp.maximum(y[:, 0::2, 0::2], y[:, 0::2, 1::2]),
                        jnp.maximum(y[:, 1::2, 0::2], y[:, 1::2, 1::2]))
        return y

    y = conv_relu_pool(x, p["conv1_w"], p["conv1_b"])
    y = conv_relu_pool(y, p["conv2_w"], p["conv2_b"])
    feat = jnp.transpose(y, (0, 3, 1, 2)).reshape(N, -1)       # torch NCHW flatten
    h = jnp.maximum(feat @ p["fc1_w"].T + p["fc1_b"], 0.0)
    h = jnp.maximum(h @ p["fc2_w"].T + p["fc2_b"], 0.0)
    return h @ p["fc3_w"].T + p["fc3_b"]


if __name__ == "__main__":
    key = jax.random.PRNGKey(0)
    kx, kp = jax.random.split(key)
    # CIFAR-sized input is required by the 16*5*5 flatten in the module.
    x = jax.random.normal(kx, (2, 3, 32, 32), jnp.float32)
    params = init_params(kp)

    fwd = jax.jit(net_forward)
    out = jax.block_until_ready(fwd(x, params))
    ref = jax.block_until_ready(net_reference(x, params))

    assert out.shape == (2, 10), out.shape
    max_err = float(jnp.max(jnp.abs(out - ref)))
    assert max_err < 1e-3, f"Pallas output mismatch vs reference (max abs err {max_err})"
    print("KERNEL_OK")
</pallas_src>

<mosaic_0001>
module attributes {stable_mosaic.version = 11 : i64} {
  func.func @_conv_relu_pool_kernel(%arg0: i32, %arg1: memref<392x128xf32, #tpu.memory_space<vmem>>, %arg2: memref<392x128xf32, #tpu.memory_space<vmem>>, %arg3: memref<392x128xf32, #tpu.memory_space<vmem>>, %arg4: memref<392x128xf32, #tpu.memory_space<vmem>>, %arg5: memref<128x128xf32, #tpu.memory_space<vmem>>, %arg6: memref<1x128xf32, #tpu.memory_space<vmem>>, %arg7: memref<392x128xf32, #tpu.memory_space<vmem>>) attributes {dimension_semantics = [#tpu.dimension_semantics<parallel>], iteration_bounds = array<i64: 1>, scalar_prefetch = 0 : i64, scratch_operands = 0 : i64, tpu.core_type = #tpu.core_type<tc>, window_params = [{transform_indices = @transform_0, window_bounds = array<i64: 392, 128>}, {transform_indices = @transform_1, window_bounds = array<i64: 392, 128>}, {transform_indices = @transform_2, window_bounds = array<i64: 392, 128>}, {transform_indices = @transform_3, window_bounds = array<i64: 392, 128>}, {pipeline_mode = #tpu.pipeline_mode<synchronous>, transform_indices = @transform_4, window_bounds = array<i64: 128, 128>}, {pipeline_mode = #tpu.pipeline_mode<synchronous>, transform_indices = @transform_5, window_bounds = array<i64: 1, 128>}, {transform_indices = @transform_6, window_bounds = array<i64: 392, 128>}]} {
    %c0 = arith.constant 0 : index
    %c0_0 = arith.constant 0 : index
    %0 = vector.load %arg5[%c0, %c0_0] : memref<128x128xf32, #tpu.memory_space<vmem>>, vector<128x128xf32>
    %c0_1 = arith.constant 0 : index
    %c0_2 = arith.constant 0 : index
    %1 = vector.load %arg6[%c0_1, %c0_2] : memref<1x128xf32, #tpu.memory_space<vmem>>, vector<1x128xf32>
    %c0_3 = arith.constant 0 : index
    %c0_4 = arith.constant 0 : index
    %2 = vector.load %arg1[%c0_3, %c0_4] : memref<392x128xf32, #tpu.memory_space<vmem>>, vector<392x128xf32>
    %cst = arith.constant dense<0.000000e+00> : vector<392x128xf32>
    %3 = tpu.matmul %2, %0, %cst {dimension_numbers = #tpu.dot_dimension_numbers<[1], [0], [0], [1], [0, 0, 1, 1], [], []>} : vector<392x128xf32>, vector<128x128xf32>, vector<392x128xf32> -> vector<392x128xf32>
    %4 = vector.broadcast %1 : vector<1x128xf32> to vector<392x128xf32>
    %5 = arith.addf %3, %4 : vector<392x128xf32>
    %cst_5 = arith.constant 0.000000e+00 : f32
    %6 = vector.broadcast %cst_5 : f32 to vector<392x128xf32>
    %7 = arith.maximumf %5, %6 : vector<392x128xf32>
    %c0_6 = arith.constant 0 : index
    %c0_7 = arith.constant 0 : index
    %8 = vector.load %arg2[%c0_6, %c0_7] : memref<392x128xf32, #tpu.memory_space<vmem>>, vector<392x128xf32>
    %cst_8 = arith.constant dense<0.000000e+00> : vector<392x128xf32>
    %9 = tpu.matmul %8, %0, %cst_8 {dimension_numbers = #tpu.dot_dimension_numbers<[1], [0], [0], [1], [0, 0, 1, 1], [], []>} : vector<392x128xf32>, vector<128x128xf32>, vector<392x128xf32> -> vector<392x128xf32>
    %10 = vector.broadcast %1 : vector<1x128xf32> to vector<392x128xf32>
    %11 = arith.addf %9, %10 : vector<392x128xf32>
    %cst_9 = arith.constant 0.000000e+00 : f32
    %12 = vector.broadcast %cst_9 : f32 to vector<392x128xf32>
    %13 = arith.maximumf %11, %12 : vector<392x128xf32>
    %14 = arith.maximumf %7, %13 : vector<392x128xf32>
    %c0_10 = arith.constant 0 : index
    %c0_11 = arith.constant 0 : index
    %15 = vector.load %arg3[%c0_10, %c0_11] : memref<392x128xf32, #tpu.memory_space<vmem>>, vector<392x128xf32>
    %cst_12 = arith.constant dense<0.000000e+00> : vector<392x128xf32>
    %16 = tpu.matmul %15, %0, %cst_12 {dimension_numbers = #tpu.dot_dimension_numbers<[1], [0], [0], [1], [0, 0, 1, 1], [], []>} : vector<392x128xf32>, vector<128x128xf32>, vector<392x128xf32> -> vector<392x128xf32>
    %17 = vector.broadcast %1 : vector<1x128xf32> to vector<392x128xf32>
    %18 = arith.addf %16, %17 : vector<392x128xf32>
    %cst_13 = arith.constant 0.000000e+00 : f32
    %19 = vector.broadcast %cst_13 : f32 to vector<392x128xf32>
    %20 = arith.maximumf %18, %19 : vector<392x128xf32>
    %21 = arith.maximumf %14, %20 : vector<392x128xf32>
    %c0_14 = arith.constant 0 : index
    %c0_15 = arith.constant 0 : index
    %22 = vector.load %arg4[%c0_14, %c0_15] : memref<392x128xf32, #tpu.memory_space<vmem>>, vector<392x128xf32>
    %cst_16 = arith.constant dense<0.000000e+00> : vector<392x128xf32>
    %23 = tpu.matmul %22, %0, %cst_16 {dimension_numbers = #tpu.dot_dimension_numbers<[1], [0], [0], [1], [0, 0, 1, 1], [], []>} : vector<392x128xf32>, vector<128x128xf32>, vector<392x128xf32> -> vector<392x128xf32>
    %24 = vector.broadcast %1 : vector<1x128xf32> to vector<392x128xf32>
    %25 = arith.addf %23, %24 : vector<392x128xf32>
    %cst_17 = arith.constant 0.000000e+00 : f32
    %26 = vector.broadcast %cst_17 : f32 to vector<392x128xf32>
    %27 = arith.maximumf %25, %26 : vector<392x128xf32>
    %28 = arith.maximumf %21, %27 : vector<392x128xf32>
    %c0_18 = arith.constant 0 : index
    %c0_19 = arith.constant 0 : index
    %29 = vector.load %arg7[%c0_18, %c0_19] : memref<392x128xf32, #tpu.memory_space<vmem>>, vector<392x128xf32>
    tpu.vector_store %arg7[%c0_18, %c0_19], %28 {strides = array<i32>} : memref<392x128xf32, #tpu.memory_space<vmem>>, vector<392x128xf32>,
    return
  }
  func.func @transform_0(%arg0: i32) -> (i32, i32) {
    %c0_i32 = arith.constant 0 : i32
    %c0_i32_0 = arith.constant 0 : i32
    return %arg0, %c0_i32 : i32, i32
  }
  func.func @transform_1(%arg0: i32) -> (i32, i32) {
    %c0_i32 = arith.constant 0 : i32
    %c0_i32_0 = arith.constant 0 : i32
    return %arg0, %c0_i32 : i32, i32
  }
  func.func @transform_2(%arg0: i32) -> (i32, i32) {
    %c0_i32 = arith.constant 0 : i32
    %c0_i32_0 = arith.constant 0 : i32
    return %arg0, %c0_i32 : i32, i32
  }
  func.func @transform_3(%arg0: i32) -> (i32, i32) {
    %c0_i32 = arith.constant 0 : i32
    %c0_i32_0 = arith.constant 0 : i32
    return %arg0, %c0_i32 : i32, i32
  }
  func.func @transform_4(%arg0: i32) -> (i32, i32) {
    %c0_i32 = arith.constant 0 : i32
    %c0_i32_0 = arith.constant 0 : i32
    %c0_i32_1 = arith.constant 0 : i32
    return %c0_i32, %c0_i32_0 : i32, i32
  }
  func.func @transform_5(%arg0: i32) -> (i32, i32) {
    %c0_i32 = arith.constant 0 : i32
    %c0_i32_0 = arith.constant 0 : i32
    %c0_i32_1 = arith.constant 0 : i32
    return %c0_i32, %c0_i32_0 : i32, i32
  }
  func.func @transform_6(%arg0: i32) -> (i32, i32) {
    %c0_i32 = arith.constant 0 : i32
    %c0_i32_0 = arith.constant 0 : i32
    return %arg0, %c0_i32 : i32, i32
  }
}

module attributes {stable_mosaic.version = 11 : i64} {
  func.func @_conv_relu_pool_kernel(%arg0: i32, %arg1: memref<56x256xf32, #tpu.memory_space<vmem>>, %arg2: memref<56x256xf32, #tpu.memory_space<vmem>>, %arg3: memref<56x256xf32, #tpu.memory_space<vmem>>, %arg4: memref<56x256xf32, #tpu.memory_space<vmem>>, %arg5: memref<256x128xf32, #tpu.memory_space<vmem>>, %arg6: memref<1x128xf32, #tpu.memory_space<vmem>>, %arg7: memref<56x128xf32, #tpu.memory_space<vmem>>) attributes {dimension_semantics = [#tpu.dimension_semantics<parallel>], iteration_bounds = array<i64: 1>, scalar_prefetch = 0 : i64, scratch_operands = 0 : i64, tpu.core_type = #tpu.core_type<tc>, window_params = [{transform_indices = @transform_0, window_bounds = array<i64: 56, 256>}, {transform_indices = @transform_1, window_bounds = array<i64: 56, 256>}, {transform_indices = @transform_2, window_bounds = array<i64: 56, 256>}, {transform_indices = @transform_3, window_bounds = array<i64: 56, 256>}, {pipeline_mode = #tpu.pipeline_mode<synchronous>, transform_indices = @transform_4, window_bounds = array<i64: 256, 128>}, {pipeline_mode = #tpu.pipeline_mode<synchronous>, transform_indices = @transform_5, window_bounds = array<i64: 1, 128>}, {transform_indices = @transform_6, window_bounds = array<i64: 56, 128>}]} {
    %c0 = arith.constant 0 : index
    %c0_0 = arith.constant 0 : index
    %0 = vector.load %arg5[%c0, %c0_0] : memref<256x128xf32, #tpu.memory_space<vmem>>, vector<256x128xf32>
    %c0_1 = arith.constant 0 : index
    %c0_2 = arith.constant 0 : index
    %1 = vector.load %arg6[%c0_1, %c0_2] : memref<1x128xf32, #tpu.memory_space<vmem>>, vector<1x128xf32>
    %c0_3 = arith.constant 0 : index
    %c0_4 = arith.constant 0 : index
    %2 = vector.load %arg1[%c0_3, %c0_4] : memref<56x256xf32, #tpu.memory_space<vmem>>, vector<56x256xf32>
    %cst = arith.constant dense<0.000000e+00> : vector<56x128xf32>
    %3 = tpu.matmul %2, %0, %cst {dimension_numbers = #tpu.dot_dimension_numbers<[1], [0], [0], [1], [0, 0, 1, 1], [], []>} : vector<56x256xf32>, vector<256x128xf32>, vector<56x128xf32> -> vector<56x128xf32>
    %4 = vector.broadcast %1 : vector<1x128xf32> to vector<56x128xf32>
    %5 = arith.addf %3, %4 : vector<56x128xf32>
    %cst_5 = arith.constant 0.000000e+00 : f32
    %6 = vector.broadcast %cst_5 : f32 to vector<56x128xf32>
    %7 = arith.maximumf %5, %6 : vector<56x128xf32>
    %c0_6 = arith.constant 0 : index
    %c0_7 = arith.constant 0 : index
    %8 = vector.load %arg2[%c0_6, %c0_7] : memref<56x256xf32, #tpu.memory_space<vmem>>, vector<56x256xf32>
    %cst_8 = arith.constant dense<0.000000e+00> : vector<56x128xf32>
    %9 = tpu.matmul %8, %0, %cst_8 {dimension_numbers = #tpu.dot_dimension_numbers<[1], [0], [0], [1], [0, 0, 1, 1], [], []>} : vector<56x256xf32>, vector<256x128xf32>, vector<56x128xf32> -> vector<56x128xf32>
    %10 = vector.broadcast %1 : vector<1x128xf32> to vector<56x128xf32>
    %11 = arith.addf %9, %10 : vector<56x128xf32>
    %cst_9 = arith.constant 0.000000e+00 : f32
    %12 = vector.broadcast %cst_9 : f32 to vector<56x128xf32>
    %13 = arith.maximumf %11, %12 : vector<56x128xf32>
    %14 = arith.maximumf %7, %13 : vector<56x128xf32>
    %c0_10 = arith.constant 0 : index
    %c0_11 = arith.constant 0 : index
    %15 = vector.load %arg3[%c0_10, %c0_11] : memref<56x256xf32, #tpu.memory_space<vmem>>, vector<56x256xf32>
    %cst_12 = arith.constant dense<0.000000e+00> : vector<56x128xf32>
    %16 = tpu.matmul %15, %0, %cst_12 {dimension_numbers = #tpu.dot_dimension_numbers<[1], [0], [0], [1], [0, 0, 1, 1], [], []>} : vector<56x256xf32>, vector<256x128xf32>, vector<56x128xf32> -> vector<56x128xf32>
    %17 = vector.broadcast %1 : vector<1x128xf32> to vector<56x128xf32>
    %18 = arith.addf %16, %17 : vector<56x128xf32>
    %cst_13 = arith.constant 0.000000e+00 : f32
    %19 = vector.broadcast %cst_13 : f32 to vector<56x128xf32>
    %20 = arith.maximumf %18, %19 : vector<56x128xf32>
    %21 = arith.maximumf %14, %20 : vector<56x128xf32>
    %c0_14 = arith.constant 0 : index
    %c0_15 = arith.constant 0 : index
    %22 = vector.load %arg4[%c0_14, %c0_15] : memref<56x256xf32, #tpu.memory_space<vmem>>, vector<56x256xf32>
    %cst_16 = arith.constant dense<0.000000e+00> : vector<56x128xf32>
    %23 = tpu.matmul %22, %0, %cst_16 {dimension_numbers = #tpu.dot_dimension_numbers<[1], [0], [0], [1], [0, 0, 1, 1], [], []>} : vector<56x256xf32>, vector<256x128xf32>, vector<56x128xf32> -> vector<56x128xf32>
    %24 = vector.broadcast %1 : vector<1x128xf32> to vector<56x128xf32>
    %25 = arith.addf %23, %24 : vector<56x128xf32>
    %cst_17 = arith.constant 0.000000e+00 : f32
    %26 = vector.broadcast %cst_17 : f32 to vector<56x128xf32>
    %27 = arith.maximumf %25, %26 : vector<56x128xf32>
    %28 = arith.maximumf %21, %27 : vector<56x128xf32>
    %c0_18 = arith.constant 0 : index
    %c0_19 = arith.constant 0 : index
    %29 = vector.load %arg7[%c0_18, %c0_19] : memref<56x128xf32, #tpu.memory_space<vmem>>, vector<56x128xf32>
    tpu.vector_store %arg7[%c0_18, %c0_19], %28 {strides = array<i32>} : memref<56x128xf32, #tpu.memory_space<vmem>>, vector<56x128xf32>,
    return
  }
  func.func @transform_0(%arg0: i32) -> (i32, i32) {
    %c0_i32 = arith.constant 0 : i32
    %c0_i32_0 = arith.constant 0 : i32
    return %arg0, %c0_i32 : i32, i32
  }
  func.func @transform_1(%arg0: i32) -> (i32, i32) {
    %c0_i32 = arith.constant 0 : i32
    %c0_i32_0 = arith.constant 0 : i32
    return %arg0, %c0_i32 : i32, i32
  }
  func.func @transform_2(%arg0: i32) -> (i32, i32) {
    %c0_i32 = arith.constant 0 : i32
    %c0_i32_0 = arith.constant 0 : i32
    return %arg0, %c0_i32 : i32, i32
  }
  func.func @transform_3(%arg0: i32) -> (i32, i32) {
    %c0_i32 = arith.constant 0 : i32
    %c0_i32_0 = arith.constant 0 : i32
    return %arg0, %c0_i32 : i32, i32
  }
  func.func @transform_4(%arg0: i32) -> (i32, i32) {
    %c0_i32 = arith.constant 0 : i32
    %c0_i32_0 = arith.constant 0 : i32
    %c0_i32_1 = arith.constant 0 : i32
    return %c0_i32, %c0_i32_0 : i32, i32
  }
  func.func @transform_5(%arg0: i32) -> (i32, i32) {
    %c0_i32 = arith.constant 0 : i32
    %c0_i32_0 = arith.constant 0 : i32
    %c0_i32_1 = arith.constant 0 : i32
    return %c0_i32, %c0_i32_0 : i32, i32
  }
  func.func @transform_6(%arg0: i32) -> (i32, i32) {
    %c0_i32 = arith.constant 0 : i32
    %c0_i32_0 = arith.constant 0 : i32
    return %arg0, %c0_i32 : i32, i32
  }
}

module attributes {stable_mosaic.version = 11 : i64} {
  func.func @_mlp_kernel(%arg0: i32, %arg1: memref<8x3200xf32, #tpu.memory_space<vmem>>, %arg2: memref<3200x128xf32, #tpu.memory_space<vmem>>, %arg3: memref<1x128xf32, #tpu.memory_space<vmem>>, %arg4: memref<128x128xf32, #tpu.memory_space<vmem>>, %arg5: memref<1x128xf32, #tpu.memory_space<vmem>>, %arg6: memref<128x128xf32, #tpu.memory_space<vmem>>, %arg7: memref<1x128xf32, #tpu.memory_space<vmem>>, %arg8: memref<8x128xf32, #tpu.memory_space<vmem>>) attributes {dimension_semantics = [#tpu.dimension_semantics<parallel>], iteration_bounds = array<i64: 1>, scalar_prefetch = 0 : i64, scratch_operands = 0 : i64, tpu.core_type = #tpu.core_type<tc>, window_params = [{transform_indices = @transform_0, window_bounds = array<i64: 8, 3200>}, {pipeline_mode = #tpu.pipeline_mode<synchronous>, transform_indices = @transform_1, window_bounds = array<i64: 3200, 128>}, {pipeline_mode = #tpu.pipeline_mode<synchronous>, transform_indices = @transform_2, window_bounds = array<i64: 1, 128>}, {pipeline_mode = #tpu.pipeline_mode<synchronous>, transform_indices = @transform_3, window_bounds = array<i64: 128, 128>}, {pipeline_mode = #tpu.pipeline_mode<synchronous>, transform_indices = @transform_4, window_bounds = array<i64: 1, 128>}, {pipeline_mode = #tpu.pipeline_mode<synchronous>, transform_indices = @transform_5, window_bounds = array<i64: 128, 128>}, {pipeline_mode = #tpu.pipeline_mode<synchronous>, transform_indices = @transform_6, window_bounds = array<i64: 1, 128>}, {transform_indices = @transform_7, window_bounds = array<i64: 8, 128>}]} {
    %c0 = arith.constant 0 : index
    %c0_0 = arith.constant 0 : index
    %0 = vector.load %arg1[%c0, %c0_0] : memref<8x3200xf32, #tpu.memory_space<vmem>>, vector<8x3200xf32>
    %c0_1 = arith.constant 0 : index
    %c0_2 = arith.constant 0 : index
    %1 = vector.load %arg2[%c0_1, %c0_2] : memref<3200x128xf32, #tpu.memory_space<vmem>>, vector<3200x128xf32>
    %cst = arith.constant dense<0.000000e+00> : vector<8x128xf32>
    %2 = tpu.matmul %0, %1, %cst {dimension_numbers = #tpu.dot_dimension_numbers<[1], [0], [0], [1], [0, 0, 1, 1], [], []>} : vector<8x3200xf32>, vector<3200x128xf32>, vector<8x128xf32> -> vector<8x128xf32>
    %c0_3 = arith.constant 0 : index
    %c0_4 = arith.constant 0 : index
    %3 = vector.load %arg3[%c0_3, %c0_4] : memref<1x128xf32, #tpu.memory_space<vmem>>, vector<1x128xf32>
    %4 = vector.broadcast %3 : vector<1x128xf32> to vector<8x128xf32>
    %5 = arith.addf %2, %4 : vector<8x128xf32>
    %cst_5 = arith.constant 0.000000e+00 : f32
    %6 = vector.broadcast %cst_5 : f32 to vector<8x128xf32>
    %7 = arith.maximumf %5, %6 : vector<8x128xf32>
    %c0_6 = arith.constant 0 : index
    %c0_7 = arith.constant 0 : index
    %8 = vector.load %arg4[%c0_6, %c0_7] : memref<128x128xf32, #tpu.memory_space<vmem>>, vector<128x128xf32>
    %cst_8 = arith.constant dense<0.000000e+00> : vector<8x128xf32>
    %9 = tpu.matmul %7, %8, %cst_8 {dimension_numbers = #tpu.dot_dimension_numbers<[1], [0], [0], [1], [0, 0, 1, 1], [], []>} : vector<8x128xf32>, vector<128x128xf32>, vector<8x128xf32> -> vector<8x128xf32>
    %c0_9 = arith.constant 0 : index
    %c0_10 = arith.constant 0 : index
    %10 = vector.load %arg5[%c0_9, %c0_10] : memref<1x128xf32, #tpu.memory_space<vmem>>, vector<1x128xf32>
    %11 = vector.broadcast %10 : vector<1x128xf32> to vector<8x128xf32>
    %12 = arith.addf %9, %11 : vector<8x128xf32>
    %cst_11 = arith.constant 0.000000e+00 : f32
    %13 = vector.broadcast %cst_11 : f32 to vector<8x128xf32>
    %14 = arith.maximumf %12, %13 : vector<8x128xf32>
    %c0_12 = arith.constant 0 : index
    %c0_13 = arith.constant 0 : index
    %15 = vector.load %arg6[%c0_12, %c0_13] : memref<128x128xf32, #tpu.memory_space<vmem>>, vector<128x128xf32>
    %cst_14 = arith.constant dense<0.000000e+00> : vector<8x128xf32>
    %16 = tpu.matmul %14, %15, %cst_14 {dimension_numbers = #tpu.dot_dimension_numbers<[1], [0], [0], [1], [0, 0, 1, 1], [], []>} : vector<8x128xf32>, vector<128x128xf32>, vector<8x128xf32> -> vector<8x128xf32>
    %c0_15 = arith.constant 0 : index
    %c0_16 = arith.constant 0 : index
    %17 = vector.load %arg7[%c0_15, %c0_16] : memref<1x128xf32, #tpu.memory_space<vmem>>, vector<1x128xf32>
    %18 = vector.broadcast %17 : vector<1x128xf32> to vector<8x128xf32>
    %19 = arith.addf %16, %18 : vector<8x128xf32>
    %c0_17 = arith.constant 0 : index
    %c0_18 = arith.constant 0 : index
    %20 = vector.load %arg8[%c0_17, %c0_18] : memref<8x128xf32, #tpu.memory_space<vmem>>, vector<8x128xf32>
    tpu.vector_store %arg8[%c0_17, %c0_18], %19 {strides = array<i32>} : memref<8x128xf32, #tpu.memory_space<vmem>>, vector<8x128xf32>,
    return
  }
  func.func @transform_0(%arg0: i32) -> (i32, i32) {
    %c0_i32 = arith.constant 0 : i32
    %c0_i32_0 = arith.constant 0 : i32
    return %arg0, %c0_i32 : i32, i32
  }
  func.func @transform_1(%arg0: i32) -> (i32, i32) {
    %c0_i32 = arith.constant 0 : i32
    %c0_i32_0 = arith.constant 0 : i32
    %c0_i32_1 = arith.constant 0 : i32
    return %c0_i32, %c0_i32_0 : i32, i32
  }
  func.func @transform_2(%arg0: i32) -> (i32, i32) {
    %c0_i32 = arith.constant 0 : i32
    %c0_i32_0 = arith.constant 0 : i32
    %c0_i32_1 = arith.constant 0 : i32
    return %c0_i32, %c0_i32_0 : i32, i32
  }
  func.func @transform_3(%arg0: i32) -> (i32, i32) {
    %c0_i32 = arith.constant 0 : i32
    %c0_i32_0 = arith.constant 0 : i32
    %c0_i32_1 = arith.constant 0 : i32
    return %c0_i32, %c0_i32_0 : i32, i32
  }
  func.func @transform_4(%arg0: i32) -> (i32, i32) {
    %c0_i32 = arith.constant 0 : i32
    %c0_i32_0 = arith.constant 0 : i32
    %c0_i32_1 = arith.constant 0 : i32
    return %c0_i32, %c0_i32_0 : i32, i32
  }
  func.func @transform_5(%arg0: i32) -> (i32, i32) {
    %c0_i32 = arith.constant 0 : i32
    %c0_i32_0 = arith.constant 0 : i32
    %c0_i32_1 = arith.constant 0 : i32
    return %c0_i32, %c0_i32_0 : i32, i32
  }
  func.func @transform_6(%arg0: i32) -> (i32, i32) {
    %c0_i32 = arith.constant 0 : i32
    %c0_i32_0 = arith.constant 0 : i32
    %c0_i32_1 = arith.constant 0 : i32
    return %c0_i32, %c0_i32_0 : i32, i32
  }
  func.func @transform_7(%arg0: i32) -> (i32, i32) {
    %c0_i32 = arith.constant 0 : i32
    %c0_i32_0 = arith.constant 0 : i32
    return %arg0, %c0_i32 : i32, i32
  }
}

</mosaic_0001>

<bundles_post_ra>
// kernel: net_forward.3
= control target key start
LH: loop header
LB: loop body
LE: loop exit
PB: predicated region body
PF: predicated region fallthrough
CT: control target
= control target key end

     0   :  { %v2859_v0 = vmov 0.0   ;;  %vm2860_vm0 = vmmov 0   ;;  %s4589_s4 = inlined_call_operand.vmem [shape: f32[128,128], index: 4, kind: input, shape index: {}]   ;;  %s4590_s0 = inlined_call_operand.vmem [shape: f32[392,128], index: 0, kind: input, shape index: {}]   ;;  %s4591_s1 = inlined_call_operand.vmem [shape: f32[392,128], index: 1, kind: input, shape index: {}]   ;;  %s4592_s5 = inlined_call_operand.vmem [shape: f32[1,128], index: 5, kind: input, shape index: {}]   ;;  %s4593_s2 = inlined_call_operand.vmem [shape: f32[392,128], index: 2, kind: input, shape index: {}]   ;;  %s4594_s3 = inlined_call_operand.vmem [shape: f32[392,128], index: 3, kind: input, shape index: {}]   ;;  %s4595_s6 = inlined_call_operand.vmem [shape: f32[392,128], index: 6, kind: output, shape index: {}]  }
   0x1   :  { %2139 = vmatprep.subr.mxu0 %v2859_v0  ;;  %v2900_v1 = vld [vmem:[%s4589_s4 + $0x78] sm:$0xff]  ;;  %2318 = vmatprep.subr.mxu1 %v2859_v0  ;;  %v2906_v2 = vld [vmem:[%s4589_s4 + $0x70] sm:$0xff]  ;;  %v2915_v3 = vld [vmem:[%s4589_s4 + $0x68] sm:$0xff] }
   0x2   :  { %2140 = vmatpush3.msra.mxu0 %v2900_v1  ;;  %2319 = vmatpush3.msra.mxu1 %v2900_v1  ;;  %v2924_v4 = vld [vmem:[%s4589_s4 + $0x60] sm:$0xff]  ;;  %v2933_v5 = vld [vmem:[%s4589_s4 + $0x58] sm:$0xff]  ;;  %v2942_v6 = vld [vmem:[%s4589_s4 + $0x50] sm:$0xff] }
   0x3   :  { %2141 = vmatprep.subr.mxu0 %v2859_v0  ;;  %2320 = vmatprep.subr.mxu1 %v2859_v0  ;;  %v2951_v7 = vld [vmem:[%s4589_s4 + $0x48] sm:$0xff]  ;;  %v2960_v8 = vld [vmem:[%s4589_s4 + $0x40] sm:$0xff]  ;;  %v2969_v9 = vld [vmem:[%s4589_s4 + $0x38] sm:$0xff] }
   0x4   :  { %2142 = vmatpush3.msra.mxu0 %v2906_v2  ;;  %2321 = vmatpush3.msra.mxu1 %v2906_v2  ;;  %v2978_v10 = vld [vmem:[%s4589_s4 + $0x30] sm:$0xff]  ;;  %v2987_v11 = vld [vmem:[%s4589_s4 + $0x28] sm:$0xff]  ;;  %v2996_v12 = vld [vmem:[%s4589_s4 + $0x20] sm:$0xff] }
   0x5   :  { %2143 = vmatprep.subr.mxu0 %v2859_v0  ;;  %2322 = vmatprep.subr.mxu1 %v2859_v0  ;;  %v3005_v13 = vld [vmem:[%s4589_s4 + $0x18] sm:$0xff]  ;;  %v3014_v14 = vld [vmem:[%s4589_s4 + $0x10] sm:$0xff]  ;;  %v3023_v15 = vld [vmem:[%s4589_s4 + $0x8] sm:$0xff] }
   0x6   :  { %2144 = vmatpush3.msra.mxu0 %v2915_v3  ;;  %2323 = vmatpush3.msra.mxu1 %v2915_v3  ;;  %v3032_v16 = vld [vmem:[%s4589_s4] sm:$0xff]  ;;  %v41_v19 = vld [vmem:[%s4590_s0 + $0x8] sm:$0xff]  ;;  %v42_v21 = vld [vmem:[%s4590_s0 + $0x10] sm:$0xff] }
   0x7   :  { %2145 = vmatprep.subr.mxu0 %v2859_v0  ;;  %2324 = vmatprep.subr.mxu1 %v2859_v0  ;;  %v40_v17 = vld [vmem:[%s4590_s0] sm:$0xff]  ;;  %v455_v20 = vld [vmem:[%s4591_s1 + $0x8] sm:$0xff]  ;;  %v456_v22 = vld [vmem:[%s4591_s1 + $0x10] sm:$0xff] }
   0x8   :  { %2146 = vmatpush3.msra.mxu0 %v2924_v4  ;;  %2325 = vmatpush3.msra.mxu1 %v2924_v4  ;;  %v454_v18 = vld [vmem:[%s4591_s1] sm:$0xff]  ;;  %v43_v23 = vld [vmem:[%s4590_s0 + $0x18] sm:$0xff]  ;;  %v45_v27 = vld [vmem:[%s4590_s0 + $0x28] sm:$0xff] }
   0x9   :  { %2147 = vmatprep.subr.mxu0 %v2859_v0  ;;  %2326 = vmatprep.subr.mxu1 %v2859_v0  ;;  %v457_v24 = vld [vmem:[%s4591_s1 + $0x18] sm:$0xff]  ;;  %v44_v25 = vld [vmem:[%s4590_s0 + $0x20] sm:$0xff]  ;;  %v459_v28 = vld [vmem:[%s4591_s1 + $0x28] sm:$0xff] }
   0xa   :  { %2148 = vmatpush3.msra.mxu0 %v2933_v5  ;;  %2327 = vmatpush3.msra.mxu1 %v2933_v5  ;;  %v458_v26 = vld [vmem:[%s4591_s1 + $0x20] sm:$0xff]  ;;  %v46_v29 = vld [vmem:[%s4590_s0 + $0x30] sm:$0xff]  ;;  %v47_v31 = vld [vmem:[%s4590_s0 + $0x38] sm:$0xff] }
   0xb   :  { %2149 = vmatprep.subr.mxu0 %v2859_v0  ;;  %2328 = vmatprep.subr.mxu1 %v2859_v0  ;;  %v460_v30 = vld [vmem:[%s4591_s1 + $0x30] sm:$0xff]  ;;  %v461_v32 = vld [vmem:[%s4591_s1 + $0x38] sm:$0xff]  ;;  %v48_v33 = vld [vmem:[%s4590_s0 + $0x40] sm:$0xff] }
   0xc   :  { %2150 = vmatpush3.msra.mxu0 %v2942_v6  ;;  %2329 = vmatpush3.msra.mxu1 %v2942_v6  ;;  %v462_v34 = vld [vmem:[%s4591_s1 + $0x40] sm:$0xff]  ;;  %v49_v35 = vld [vmem:[%s4590_s0 + $0x48] sm:$0xff]  ;;  %v50_v37 = vld [vmem:[%s4590_s0 + $0x50] sm:$0xff] }
   0xd   :  { %2151 = vmatprep.subr.mxu0 %v2859_v0  ;;  %2330 = vmatprep.subr.mxu1 %v2859_v0  ;;  %v463_v36 = vld [vmem:[%s4591_s1 + $0x48] sm:$0xff]  ;;  %v464_v38 = vld [vmem:[%s4591_s1 + $0x50] sm:$0xff]  ;;  %v51_v39 = vld [vmem:[%s4590_s0 + $0x58] sm:$0xff] }
   0xe   :  { %2152 = vmatpush3.msra.mxu0 %v2951_v7  ;;  %2331 = vmatpush3.msra.mxu1 %v2951_v7  ;;  %v465_v40 = vld [vmem:[%s4591_s1 + $0x58] sm:$0xff]  ;;  %v52_v41 = vld [vmem:[%s4590_s0 + $0x60] sm:$0xff]  ;;  %v53_v43 = vld [vmem:[%s4590_s0 + $0x68] sm:$0xff] }
   0xf   :  { %2153 = vmatprep.subr.mxu0 %v2859_v0  ;;  %2332 = vmatprep.subr.mxu1 %v2859_v0  ;;  %v466_v42 = vld [vmem:[%s4591_s1 + $0x60] sm:$0xff]  ;;  %v467_v44 = vld [vmem:[%s4591_s1 + $0x68] sm:$0xff]  ;;  %v54_v45 = vld [vmem:[%s4590_s0 + $0x70] sm:$0xff] }
  0x10   :  { %2154 = vmatpush3.msra.mxu0 %v2960_v8  ;;  %2333 = vmatpush3.msra.mxu1 %v2960_v8  ;;  %v468_v46 = vld [vmem:[%s4591_s1 + $0x70] sm:$0xff]  ;;  %v55_v47 = vld [vmem:[%s4590_s0 + $0x78] sm:$0xff]  ;;  %v56_v49 = vld [vmem:[%s4590_s0 + $0x80] sm:$0xff] }
  0x11   :  { %2155 = vmatprep.subr.mxu0 %v2859_v0  ;;  %2334 = vmatprep.subr.mxu1 %v2859_v0  ;;  %v469_v48 = vld [vmem:[%s4591_s1 + $0x78] sm:$0xff]  ;;  %v470_v50 = vld [vmem:[%s4591_s1 + $0x80] sm:$0xff]  ;;  %v57_v51 = vld [vmem:[%s4590_s0 + $0x88] sm:$0xff] }
  0x12   :  { %2156 = vmatpush3.msra.mxu0 %v2969_v9  ;;  %2335 = vmatpush3.msra.mxu1 %v2969_v9  ;;  %v471_v52 = vld [vmem:[%s4591_s1 + $0x88] sm:$0xff]  ;;  %v58_v53 = vld [vmem:[%s4590_s0 + $0x90] sm:$0xff]  ;;  %v59_v55 = vld [vmem:[%s4590_s0 + $0x98] sm:$0xff] }
  0x13   :  { %2157 = vmatprep.subr.mxu0 %v2859_v0  ;;  %2336 = vmatprep.subr.mxu1 %v2859_v0  ;;  %v472_v54 = vld [vmem:[%s4591_s1 + $0x90] sm:$0xff]  ;;  %v473_v56 = vld [vmem:[%s4591_s1 + $0x98] sm:$0xff]  ;;  %v60_v57 = vld [vmem:[%s4590_s0 + $0xa0] sm:$0xff] }
  0x14   :  { %2158 = vmatpush3.msra.mxu0 %v2978_v10  ;;  %2337 = vmatpush3.msra.mxu1 %v2978_v10  ;;  %v474_v58 = vld [vmem:[%s4591_s1 + $0xa0] sm:$0xff]  ;;  %v61_v59 = vld [vmem:[%s4590_s0 + $0xa8] sm:$0xff]  ;;  %v62_v61 = vld [vmem:[%s4590_s0 + $0xb0] sm:$0xff] }
  0x15   :  { %2159 = vmatprep.subr.mxu0 %v2859_v0  ;;  %2338 = vmatprep.subr.mxu1 %v2859_v0  ;;  %v475_v60 = vld [vmem:[%s4591_s1 + $0xa8] sm:$0xff]  ;;  %v476_v62 = vld [vmem:[%s4591_s1 + $0xb0] sm:$0xff]  ;;  %v63_v63 = vld [vmem:[%s4590_s0 + $0xb8] sm:$0xff] }
  0x16   :  { %2160 = vmatpush3.msra.mxu0 %v2987_v11  ;;  %2339 = vmatpush3.msra.mxu1 %v2987_v11 }
  0x17   :  { %2161 = vmatprep.subr.mxu0 %v2859_v0  ;;  %2340 = vmatprep.subr.mxu1 %v2859_v0 }
  0x18   :  { %2162 = vmatpush3.msra.mxu0 %v2996_v12  ;;  %2341 = vmatpush3.msra.mxu1 %v2996_v12 }
  0x19   :  { %2163 = vmatprep.subr.mxu0 %v2859_v0  ;;  %2342 = vmatprep.subr.mxu1 %v2859_v0 }
  0x1a   :  { %2164 = vmatpush3.msra.mxu0 %v3005_v13  ;;  %2343 = vmatpush3.msra.mxu1 %v3005_v13 }
  0x1b   :  { %2165 = vmatprep.subr.mxu0 %v2859_v0  ;;  %2344 = vmatprep.subr.mxu1 %v2859_v0 }
  0x1c   :  { %2166 = vmatpush3.msra.mxu0 %v3014_v14  ;;  %2345 = vmatpush3.msra.mxu1 %v3014_v14 }
  0x1d   :  { %2167 = vmatprep.subr.mxu0 %v2859_v0  ;;  %2346 = vmatprep.subr.mxu1 %v2859_v0 }
  0x1e   :  { %2168 = vmatpush3.msra.mxu0 %v3023_v15  ;;  %2347 = vmatpush3.msra.mxu1 %v3023_v15 }
  0x1f   :  { %2169 = vmatprep.subr.mxu0 %v2859_v0  ;;  %2171 = vmatprep.mubr.msk.f32.mxu0 %vm2860_vm0, %v2859_v0 }
  0x20   :  { %2170 = vmatpush3.msra.mxu0 %v3032_v16  ;;  %2348 = vmatprep.subr.mxu1 %v2859_v0 }
  0x21   :  { %2172 = vmatmul.mubr.f32.vlgmr.msra.gmra.mxu0 %v40_v17  ;;  %2349 = vmatpush3.msra.mxu1 %v3032_v16  ;;  %v485_v17 = vld [vmem:[%s4591_s1 + $0xf8] sm:$0xff] }
  0x22   :  { %2350 = vmatprep.mubr.msk.f32.mxu1 %vm2860_vm0, %v2859_v0  ;;  %2497 = vmatprep.subr.mxu0 %v2859_v0 }
  0x23   :  { %2351 = vmatmul.mubr.f32.vlgmr.msra.gmra.mxu1 %v454_v18  ;;  %2498 = vmatpush3.msra.mxu0 %v2900_v1  ;;  %v72_v18 = vld [vmem:[%s4590_s0 + $0x100] sm:$0xff] }
  0x24   :  { %2676 = vmatprep.subr.mxu1 %v2859_v0  ;;  %2174 = vmatprep.mubr.msk.f32.mxu0 %vm2860_vm0, %v2859_v0 }
  0x25   :  { %2677 = vmatpush3.msra.mxu1 %v2900_v1  ;;  %2175 = vmatmul.mubr.f32.gmra.mxu0 %v41_v19  ;;  %v477_v1 = vld [vmem:[%s4591_s1 + $0xb8] sm:$0xff]  ;;  %v486_v19 = vld [vmem:[%s4591_s1 + $0x100] sm:$0xff] }
  0x26   :  { %2353 = vmatprep.mubr.msk.f32.mxu1 %vm2860_vm0, %v2859_v0  ;;  %2177 = vmatprep.mubr.msk.f32.mxu0 %vm2860_vm0, %v2859_v0 }
  0x27   :  { %2354 = vmatmul.mubr.f32.gmra.mxu1 %v455_v20  ;;  %2499 = vmatprep.subr.mxu0 %v2859_v0  ;;  %v73_v20 = vld [vmem:[%s4590_s0 + $0x108] sm:$0xff] }
  0x28   :  { %2356 = vmatprep.mubr.msk.f32.mxu1 %vm2860_vm0, %v2859_v0  ;;  %2500 = vmatpush3.msra.mxu0 %v2906_v2 }
  0x29   :  { %2178 = vmatmul.mubr.f32.gmra.mxu0 %v42_v21  ;;  %2678 = vmatprep.subr.mxu1 %v2859_v0  ;;  %v487_v21 = vld [vmem:[%s4591_s1 + $0x108] sm:$0xff] }
  0x2a   :  { %2180 = vmatprep.mubr.msk.f32.mxu0 %vm2860_vm0, %v2859_v0  ;;  %2679 = vmatpush3.msra.mxu1 %v2906_v2  ;;  %v64_v2 = vld [vmem:[%s4590_s0 + $0xc0] sm:$0xff] }
  0x2b   :  { %2357 = vmatmul.mubr.f32.gmra.mxu1 %v456_v22  ;;  %2501 = vmatprep.subr.mxu0 %v2859_v0  ;;  %v74_v22 = vld [vmem:[%s4590_s0 + $0x110] sm:$0xff] }
  0x2c   :  { %2359 = vmatprep.mubr.msk.f32.mxu1 %vm2860_vm0, %v2859_v0  ;;  %2502 = vmatpush3.msra.mxu0 %v2915_v3 }
  0x2d   :  { %2181 = vmatmul.mubr.f32.gmra.mxu0 %v43_v23  ;;  %2680 = vmatprep.subr.mxu1 %v2859_v0  ;;  %v488_v23 = vld [vmem:[%s4591_s1 + $0x110] sm:$0xff] }
  0x2e   :  { %2183 = vmatprep.mubr.msk.f32.mxu0 %vm2860_vm0, %v2859_v0  ;;  %2681 = vmatpush3.msra.mxu1 %v2915_v3  ;;  %v478_v3 = vld [vmem:[%s4591_s1 + $0xc0] sm:$0xff] }
  0x2f   :  { %2360 = vmatmul.mubr.f32.gmra.mxu1 %v457_v24  ;;  %2503 = vmatprep.subr.mxu0 %v2859_v0  ;;  %v75_v24 = vld [vmem:[%s4590_s0 + $0x118] sm:$0xff] }
  0x30   :  { %2362 = vmatprep.mubr.msk.f32.mxu1 %vm2860_vm0, %v2859_v0  ;;  %2504 = vmatpush3.msra.mxu0 %v2924_v4 }
  0x31   :  { %2184 = vmatmul.mubr.f32.gmra.mxu0 %v44_v25  ;;  %2682 = vmatprep.subr.mxu1 %v2859_v0  ;;  %v489_v25 = vld [vmem:[%s4591_s1 + $0x118] sm:$0xff] }
  0x32   :  { %2186 = vmatprep.mubr.msk.f32.mxu0 %vm2860_vm0, %v2859_v0  ;;  %2683 = vmatpush3.msra.mxu1 %v2924_v4  ;;  %v65_v4 = vld [vmem:[%s4590_s0 + $0xc8] sm:$0xff] }
  0x33   :  { %2363 = vmatmul.mubr.f32.gmra.mxu1 %v458_v26  ;;  %2505 = vmatprep.subr.mxu0 %v2859_v0  ;;  %v76_v26 = vld [vmem:[%s4590_s0 + $0x120] sm:$0xff] }
  0x34   :  { %2365 = vmatprep.mubr.msk.f32.mxu1 %vm2860_vm0, %v2859_v0  ;;  %2506 = vmatpush3.msra.mxu0 %v2933_v5 }
  0x35   :  { %2187 = vmatmul.mubr.f32.gmra.mxu0 %v45_v27  ;;  %2684 = vmatprep.subr.mxu1 %v2859_v0  ;;  %v490_v27 = vld [vmem:[%s4591_s1 + $0x120] sm:$0xff] }
  0x36   :  { %2189 = vmatprep.mubr.msk.f32.mxu0 %vm2860_vm0, %v2859_v0  ;;  %2685 = vmatpush3.msra.mxu1 %v2933_v5  ;;  %v479_v5 = vld [vmem:[%s4591_s1 + $0xc8] sm:$0xff] }
  0x37   :  { %2366 = vmatmul.mubr.f32.gmra.mxu1 %v459_v28  ;;  %2507 = vmatprep.subr.mxu0 %v2859_v0  ;;  %v77_v28 = vld [vmem:[%s4590_s0 + $0x128] sm:$0xff] }
  0x38   :  { %2368 = vmatprep.mubr.msk.f32.mxu1 %vm2860_vm0, %v2859_v0  ;;  %2508 = vmatpush3.msra.mxu0 %v2942_v6 }
  0x39   :  { %2190 = vmatmul.mubr.f32.gmra.mxu0 %v46_v29  ;;  %2686 = vmatprep.subr.mxu1 %v2859_v0  ;;  %v491_v29 = vld [vmem:[%s4591_s1 + $0x128] sm:$0xff] }
  0x3a   :  { %2192 = vmatprep.mubr.msk.f32.mxu0 %vm2860_vm0, %v2859_v0  ;;  %2687 = vmatpush3.msra.mxu1 %v2942_v6  ;;  %v66_v6 = vld [vmem:[%s4590_s0 + $0xd0] sm:$0xff] }
  0x3b   :  { %2369 = vmatmul.mubr.f32.gmra.mxu1 %v460_v30  ;;  %2509 = vmatprep.subr.mxu0 %v2859_v0  ;;  %v78_v30 = vld [vmem:[%s4590_s0 + $0x130] sm:$0xff] }
  0x3c   :  { %2371 = vmatprep.mubr.msk.f32.mxu1 %vm2860_vm0, %v2859_v0  ;;  %2510 = vmatpush3.msra.mxu0 %v2951_v7 }
  0x3d   :  { %2193 = vmatmul.mubr.f32.gmra.mxu0 %v47_v31  ;;  %2688 = vmatprep.subr.mxu1 %v2859_v0  ;;  %v492_v31 = vld [vmem:[%s4591_s1 + $0x130] sm:$0xff] }
  0x3e   :  { %2195 = vmatprep.mubr.msk.f32.mxu0 %vm2860_vm0, %v2859_v0  ;;  %2689 = vmatpush3.msra.mxu1 %v2951_v7  ;;  %v480_v7 = vld [vmem:[%s4591_s1 + $0xd0] sm:$0xff] }
  0x3f   :  { %2372 = vmatmul.mubr.f32.gmra.mxu1 %v461_v32  ;;  %2511 = vmatprep.subr.mxu0 %v2859_v0  ;;  %v79_v32 = vld [vmem:[%s4590_s0 + $0x138] sm:$0xff] }
  0x40   :  { %2374 = vmatprep.mubr.msk.f32.mxu1 %vm2860_vm0, %v2859_v0  ;;  %2512 = vmatpush3.msra.mxu0 %v2960_v8 }
  0x41   :  { %2196 = vmatmul.mubr.f32.gmra.mxu0 %v48_v33  ;;  %2690 = vmatprep.subr.mxu1 %v2859_v0  ;;  %v493_v33 = vld [vmem:[%s4591_s1 + $0x138] sm:$0xff] }
  0x42   :  { %2198 = vmatprep.mubr.msk.f32.mxu0 %vm2860_vm0, %v2859_v0  ;;  %2691 = vmatpush3.msra.mxu1 %v2960_v8  ;;  %v67_v8 = vld [vmem:[%s4590_s0 + $0xd8] sm:$0xff] }
  0x43   :  { %2375 = vmatmul.mubr.f32.gmra.mxu1 %v462_v34  ;;  %2513 = vmatprep.subr.mxu0 %v2859_v0  ;;  %v80_v34 = vld [vmem:[%s4590_s0 + $0x140] sm:$0xff] }
  0x44   :  { %2377 = vmatprep.mubr.msk.f32.mxu1 %vm2860_vm0, %v2859_v0  ;;  %2514 = vmatpush3.msra.mxu0 %v2969_v9 }
  0x45   :  { %2199 = vmatmul.mubr.f32.gmra.mxu0 %v49_v35  ;;  %2692 = vmatprep.subr.mxu1 %v2859_v0  ;;  %v494_v35 = vld [vmem:[%s4591_s1 + $0x140] sm:$0xff] }
  0x46   :  { %2201 = vmatprep.mubr.msk.f32.mxu0 %vm2860_vm0, %v2859_v0  ;;  %2693 = vmatpush3.msra.mxu1 %v2969_v9  ;;  %v481_v9 = vld [vmem:[%s4591_s1 + $0xd8] sm:$0xff] }
  0x47   :  { %2378 = vmatmul.mubr.f32.gmra.mxu1 %v463_v36  ;;  %2515 = vmatprep.subr.mxu0 %v2859_v0  ;;  %v81_v36 = vld [vmem:[%s4590_s0 + $0x148] sm:$0xff] }
  0x48   :  { %2380 = vmatprep.mubr.msk.f32.mxu1 %vm2860_vm0, %v2859_v0  ;;  %2516 = vmatpush3.msra.mxu0 %v2978_v10 }
  0x49   :  { %2202 = vmatmul.mubr.f32.gmra.mxu0 %v50_v37  ;;  %2694 = vmatprep.subr.mxu1 %v2859_v0  ;;  %v495_v37 = vld [vmem:[%s4591_s1 + $0x148] sm:$0xff] }
  0x4a   :  { %2204 = vmatprep.mubr.msk.f32.mxu0 %vm2860_vm0, %v2859_v0  ;;  %2695 = vmatpush3.msra.mxu1 %v2978_v10  ;;  %v68_v10 = vld [vmem:[%s4590_s0 + $0xe0] sm:$0xff] }
  0x4b   :  { %2381 = vmatmul.mubr.f32.gmra.mxu1 %v464_v38  ;;  %2517 = vmatprep.subr.mxu0 %v2859_v0  ;;  %v82_v38 = vld [vmem:[%s4590_s0 + $0x150] sm:$0xff] }
  0x4c   :  { %2383 = vmatprep.mubr.msk.f32.mxu1 %vm2860_vm0, %v2859_v0  ;;  %2518 = vmatpush3.msra.mxu0 %v2987_v11 }
  0x4d   :  { %2205 = vmatmul.mubr.f32.gmra.mxu0 %v51_v39  ;;  %2696 = vmatprep.subr.mxu1 %v2859_v0  ;;  %v496_v39 = vld [vmem:[%s4591_s1 + $0x150] sm:$0xff] }
  0x4e   :  { %2207 = vmatprep.mubr.msk.f32.mxu0 %vm2860_vm0, %v2859_v0  ;;  %2697 = vmatpush3.msra.mxu1 %v2987_v11  ;;  %v482_v11 = vld [vmem:[%s4591_s1 + $0xe0] sm:$0xff] }
  0x4f   :  { %2384 = vmatmul.mubr.f32.gmra.mxu1 %v465_v40  ;;  %2519 = vmatprep.subr.mxu0 %v2859_v0  ;;  %v83_v40 = vld [vmem:[%s4590_s0 + $0x158] sm:$0xff] }
  0x50   :  { %2386 = vmatprep.mubr.msk.f32.mxu1 %vm2860_vm0, %v2859_v0  ;;  %2520 = vmatpush3.msra.mxu0 %v2996_v12 }
  0x51   :  { %2208 = vmatmul.mubr.f32.gmra.mxu0 %v52_v41  ;;  %2698 = vmatprep.subr.mxu1 %v2859_v0  ;;  %v497_v41 = vld [vmem:[%s4591_s1 + $0x158] sm:$0xff] }
  0x52   :  { %2210 = vmatprep.mubr.msk.f32.mxu0 %vm2860_vm0, %v2859_v0  ;;  %2699 = vmatpush3.msra.mxu1 %v2996_v12  ;;  %v69_v12 = vld [vmem:[%s4590_s0 + $0xe8] sm:$0xff] }
  0x53   :  { %2387 = vmatmul.mubr.f32.gmra.mxu1 %v466_v42  ;;  %2521 = vmatprep.subr.mxu0 %v2859_v0  ;;  %v84_v42 = vld [vmem:[%s4590_s0 + $0x160] sm:$0xff] }
  0x54   :  { %2389 = vmatprep.mubr.msk.f32.mxu1 %vm2860_vm0, %v2859_v0  ;;  %2522 = vmatpush3.msra.mxu0 %v3005_v13 }
  0x55   :  { %2211 = vmatmul.mubr.f32.gmra.mxu0 %v53_v43  ;;  %2700 = vmatprep.subr.mxu1 %v2859_v0  ;;  %v498_v43 = vld [vmem:[%s4591_s1 + $0x160] sm:$0xff] }
  0x56   :  { %2213 = vmatprep.mubr.msk.f32.mxu0 %vm2860_vm0, %v2859_v0  ;;  %2701 = vmatpush3.msra.mxu1 %v3005_v13  ;;  %v483_v13 = vld [vmem:[%s4591_s1 + $0xe8] sm:$0xff] }
  0x57   :  { %2390 = vmatmul.mubr.f32.gmra.mxu1 %v467_v44  ;;  %2523 = vmatprep.subr.mxu0 %v2859_v0  ;;  %v85_v44 = vld [vmem:[%s4590_s0 + $0x168] sm:$0xff] }
  0x58   :  { %2392 = vmatprep.mubr.msk.f32.mxu1 %vm2860_vm0, %v2859_v0  ;;  %2524 = vmatpush3.msra.mxu0 %v3014_v14 }
  0x59   :  { %2214 = vmatmul.mubr.f32.gmra.mxu0 %v54_v45  ;;  %2702 = vmatprep.subr.mxu1 %v2859_v0  ;;  %v499_v45 = vld [vmem:[%s4591_s1 + $0x168] sm:$0xff] }
  0x5a   :  { %2216 = vmatprep.mubr.msk.f32.mxu0 %vm2860_vm0, %v2859_v0  ;;  %2703 = vmatpush3.msra.mxu1 %v3014_v14  ;;  %v70_v14 = vld [vmem:[%s4590_s0 + $0xf0] sm:$0xff] }
  0x5b   :  { %2393 = vmatmul.mubr.f32.gmra.mxu1 %v468_v46  ;;  %2525 = vmatprep.subr.mxu0 %v2859_v0  ;;  %v86_v46 = vld [vmem:[%s4590_s0 + $0x170] sm:$0xff] }
  0x5c   :  { %2395 = vmatprep.mubr.msk.f32.mxu1 %vm2860_vm0, %v2859_v0  ;;  %2526 = vmatpush3.msra.mxu0 %v3023_v15 }
  0x5d   :  { %2217 = vmatmul.mubr.f32.gmra.mxu0 %v55_v47  ;;  %2704 = vmatprep.subr.mxu1 %v2859_v0  ;;  %v500_v47 = vld [vmem:[%s4591_s1 + $0x170] sm:$0xff] }
  0x5e   :  { %2219 = vmatprep.mubr.msk.f32.mxu0 %vm2860_vm0, %v2859_v0  ;;  %2705 = vmatpush3.msra.mxu1 %v3023_v15  ;;  %v484_v15 = vld [vmem:[%s4591_s1 + $0xf0] sm:$0xff] }
  0x5f   :  { %2396 = vmatmul.mubr.f32.gmra.mxu1 %v469_v48  ;;  %2527 = vmatprep.subr.mxu0 %v2859_v0  ;;  %v87_v48 = vld [vmem:[%s4590_s0 + $0x178] sm:$0xff] }
  0x60   :  { %2398 = vmatprep.mubr.msk.f32.mxu1 %vm2860_vm0, %v2859_v0  ;;  %2528 = vmatpush3.msra.mxu0 %v3032_v16 }
  0x61   :  { %2220 = vmatmul.mubr.f32.gmra.mxu0 %v56_v49  ;;  %2706 = vmatprep.subr.mxu1 %v2859_v0  ;;  %v501_v49 = vld [vmem:[%s4591_s1 + $0x178] sm:$0xff] }
  0x62   :  { %2222 = vmatprep.mubr.msk.f32.mxu0 %vm2860_vm0, %v2859_v0  ;;  %2707 = vmatpush3.msra.mxu1 %v3032_v16  ;;  %v71_v16 = vld [vmem:[%s4590_s0 + $0xf8] sm:$0xff] }
  0x63   :  { %2399 = vmatmul.mubr.f32.gmra.mxu1 %v470_v50  ;;  %v88_v50 = vld [vmem:[%s4590_s0 + $0x180] sm:$0xff] }
  0x64   :  { %2401 = vmatprep.mubr.msk.f32.mxu1 %vm2860_vm0, %v2859_v0 }
  0x65   :  { %2223 = vmatmul.mubr.f32.gmra.mxu0 %v57_v51  ;;  %v3592_v51 = vld [vmem:[%s4592_s5] ss:$0 sm:$0xff] }
  0x66   :  { %2225 = vmatprep.mubr.msk.f32.mxu0 %vm2860_vm0, %v2859_v0 }
  0x67   :  { %2402 = vmatmul.mubr.f32.gmra.mxu1 %v471_v52  ;;  %v502_v52 = vld [vmem:[%s4591_s1 + $0x180] sm:$0xff] }
  0x68   :  { %2404 = vmatprep.mubr.msk.f32.mxu1 %vm2860_vm0, %v2859_v0 }
  0x69   :  { %2226 = vmatmul.mubr.f32.gmra.mxu0 %v58_v53 }
  0x6a   :  { %2228 = vmatprep.mubr.msk.f32.mxu0 %vm2860_vm0, %v2859_v0 }
  0x6b   :  { %2405 = vmatmul.mubr.f32.gmra.mxu1 %v472_v54 }
  0x6c   :  { %2407 = vmatprep.mubr.msk.f32.mxu1 %vm2860_vm0, %v2859_v0 }
  0x6d   :  { %2229 = vmatmul.mubr.f32.gmra.mxu0 %v59_v55  ;;  %v911_v55 = vld [vmem:[%s4593_s2] sm:$0xff] }
  0x6e   :  { %2231 = vmatprep.mubr.msk.f32.mxu0 %vm2860_vm0, %v2859_v0 }
  0x6f   :  { %2408 = vmatmul.mubr.f32.gmra.mxu1 %v473_v56 }
  0x70   :  { %2410 = vmatprep.mubr.msk.f32.mxu1 %vm2860_vm0, %v2859_v0 }
  0x71   :  { %2232 = vmatmul.mubr.f32.gmra.mxu0 %v60_v57 }
  0x72   :  { %2234 = vmatprep.mubr.msk.f32.mxu0 %vm2860_vm0, %v2859_v0 }
  0x73   :  { %2411 = vmatmul.mubr.f32.gmra.mxu1 %v474_v58 }
  0x74   :  { %2413 = vmatprep.mubr.msk.f32.mxu1 %vm2860_vm0, %v2859_v0 }
  0x75   :  { %2235 = vmatmul.mubr.f32.gmra.mxu0 %v61_v59 }
  0x76   :  { %2237 = vmatprep.mubr.msk.f32.mxu0 %vm2860_vm0, %v2859_v0 }
  0x77   :  { %2414 = vmatmul.mubr.f32.gmra.mxu1 %v475_v60  ;;  %v1368_v60 = vld [vmem:[%s4594_s3] sm:$0xff] }
  0x78   :  { %2416 = vmatprep.mubr.msk.f32.mxu1 %vm2860_vm0, %v2859_v0 }
  0x79   :  { %2238 = vmatmul.mubr.f32.gmra.mxu0 %v62_v61 }
  0x7a   :  { %2240 = vmatprep.mubr.msk.f32.mxu0 %vm2860_vm0, %v2859_v0 }
  0x7b   :  { %2417 = vmatmul.mubr.f32.gmra.mxu1 %v476_v62 }
  0x7c   :  { %2419 = vmatprep.mubr.msk.f32.mxu1 %vm2860_vm0, %v2859_v0 }
  0x7d   :  { %2241 = vmatmul.mubr.f32.gmra.mxu0 %v63_v63 }
  0x7e   :  { %2243 = vmatprep.mubr.msk.f32.mxu0 %vm2860_vm0, %v2859_v0 }
  0x7f   :  { %2420 = vmatmul.mubr.f32.gmra.mxu1 %v477_v1 }
  0x80   :  { %2422 = vmatprep.mubr.msk.f32.mxu1 %vm2860_vm0, %v2859_v0 }
  0x81   :  { %2244 = vmatmul.mubr.f32.gmra.mxu0 %v64_v2  ;;  %v912_v2 = vld [vmem:[%s4593_s2 + $0x8] sm:$0xff] }
  0x82   :  { %2246 = vmatprep.mubr.msk.f32.mxu0 %vm2860_vm0, %v2859_v0 }
  0x83   :  { %2423 = vmatmul.mubr.f32.gmra.mxu1 %v478_v3 }
  0x84   :  { %2425 = vmatprep.mubr.msk.f32.mxu1 %vm2860_vm0, %v2859_v0 }
  0x85   :  { %2247 = vmatmul.mubr.f32.gmra.mxu0 %v65_v4 }
  0x86   :  { %2249 = vmatprep.mubr.msk.f32.mxu0 %vm2860_vm0, %v2859_v0 }
  0x87   :  { %2426 = vmatmul.mubr.f32.gmra.mxu1 %v479_v5 }
  0x88   :  { %2428 = vmatprep.mubr.msk.f32.mxu1 %vm2860_vm0, %v2859_v0 }
  0x89   :  { %2250 = vmatmul.mubr.f32.gmra.mxu0 %v66_v6 }
  0x8a   :  { %2252 = vmatprep.mubr.msk.f32.mxu0 %vm2860_vm0, %v2859_v0 }
  0x8b   :  { %2429 = vmatmul.mubr.f32.gmra.mxu1 %v480_v7 }
  0x8c   :  { %2431 = vmatprep.mubr.msk.f32.mxu1 %vm2860_vm0, %v2859_v0 }
  0x8d   :  { %2253 = vmatmul.mubr.f32.gmra.mxu0 %v67_v8  ;;  %v1369_v8 = vld [vmem:[%s4594_s3 + $0x8] sm:$0xff] }
  0x8e   :  { %2255 = vmatprep.mubr.msk.f32.mxu0 %vm2860_vm0, %v2859_v0 }
  0x8f   :  { %2432 = vmatmul.mubr.f32.gmra.mxu1 %v481_v9 }
  0x90   :  { %2434 = vmatprep.mubr.msk.f32.mxu1 %vm2860_vm0, %v2859_v0 }
  0x91   :  { %2256 = vmatmul.mubr.f32.gmra.mxu0 %v68_v10 }
  0x92   :  { %2258 = vmatprep.mubr.msk.f32.mxu0 %vm2860_vm0, %v2859_v0 }
  0x93   :  { %2435 = vmatmul.mubr.f32.gmra.mxu1 %v482_v11 }
  0x94   :  { %2437 = vmatprep.mubr.msk.f32.mxu1 %vm2860_vm0, %v2859_v0 }
  0x95   :  { %2259 = vmatmul.mubr.f32.gmra.mxu0 %v69_v12 }
  0x96   :  { %2261 = vmatprep.mubr.msk.f32.mxu0 %vm2860_vm0, %v2859_v0 }
  0x97   :  { %2438 = vmatmul.mubr.f32.gmra.mxu1 %v483_v13  ;;  %v913_v13 = vld [vmem:[%s4593_s2 + $0x10] sm:$0xff] }
  0x98   :  { %2440 = vmatprep.mubr.msk.f32.mxu1 %vm2860_vm0, %v2859_v0 }
  0x99   :  { %2262 = vmatmul.mubr.f32.gmra.mxu0 %v70_v14 }
  0x9a   :  { %2264 = vmatprep.mubr.msk.f32.mxu0 %vm2860_vm0, %v2859_v0 }
  0x9b   :  { %2441 = vmatmul.mubr.f32.gmra.mxu1 %v484_v15 }
  0x9c   :  { %2443 = vmatprep.mubr.msk.f32.mxu1 %vm2860_vm0, %v2859_v0 }
  0x9d   :  { %2265 = vmatmul.mubr.f32.gmra.mxu0 %v71_v16 }
  0x9e   :  { %2267 = vmatprep.mubr.msk.f32.mxu0 %vm2860_vm0, %v2859_v0 }
  0x9f   :  { %2444 = vmatmul.mubr.f32.gmra.mxu1 %v485_v17 }
  0xa0   :  { %2446 = vmatprep.mubr.msk.f32.mxu1 %vm2860_vm0, %v2859_v0 }
  0xa1   :  { %2268 = vmatmul.mubr.f32.gmra.mxu0 %v72_v18 }
  0xa2   :  { %2270 = vmatprep.mubr.msk.f32.mxu0 %vm2860_vm0, %v2859_v0 }
  0xa3   :  { %2447 = vmatmul.mubr.f32.gmra.mxu1 %v486_v19  ;;  %v1370_v19 = vld [vmem:[%s4594_s3 + $0x10] sm:$0xff] }
  0xa4   :  { %2449 = vmatprep.mubr.msk.f32.mxu1 %vm2860_vm0, %v2859_v0 }
  0xa5   :  { %2271 = vmatmul.mubr.f32.gmra.mxu0 %v73_v20 }
  0xa6   :  { %2273 = vmatprep.mubr.msk.f32.mxu0 %vm2860_vm0, %v2859_v0 }
  0xa7   :  { %2450 = vmatmul.mubr.f32.gmra.mxu1 %v487_v21 }
  0xa8   :  { %2452 = vmatprep.mubr.msk.f32.mxu1 %vm2860_vm0, %v2859_v0 }
  0xa9   :  { %2274 = vmatmul.mubr.f32.gmra.mxu0 %v74_v22 }
  0xaa   :  { %2276 = vmatprep.mubr.msk.f32.mxu0 %vm2860_vm0, %v2859_v0 }
  0xab   :  { %2453 = vmatmul.mubr.f32.gmra.mxu1 %v488_v23 }
  0xac   :  { %2455 = vmatprep.mubr.msk.f32.mxu1 %vm2860_vm0, %v2859_v0 }
  0xad   :  { %2277 = vmatmul.mubr.f32.gmra.mxu0 %v75_v24  ;;  %v914_v24 = vld [vmem:[%s4593_s2 + $0x18] sm:$0xff] }
  0xae   :  { %2279 = vmatprep.mubr.msk.f32.mxu0 %vm2860_vm0, %v2859_v0 }
  0xaf   :  { %2456 = vmatmul.mubr.f32.gmra.mxu1 %v489_v25 }
  0xb0   :  { %2458 = vmatprep.mubr.msk.f32.mxu1 %vm2860_vm0, %v2859_v0 }
  0xb1   :  { %2280 = vmatmul.mubr.f32.gmra.mxu0 %v76_v26 }
  0xb2   :  { %2282 = vmatprep.mubr.msk.f32.mxu0 %vm2860_vm0, %v2859_v0 }
  0xb3   :  { %2459 = vmatmul.mubr.f32.gmra.mxu1 %v490_v27 }
  0xb4   :  { %2461 = vmatprep.mubr.msk.f32.mxu1 %vm2860_vm0, %v2859_v0 }
  0xb5   :  { %2283 = vmatmul.mubr.f32.gmra.mxu0 %v77_v28 }
  0xb6   :  { %2285 = vmatprep.mubr.msk.f32.mxu0 %vm2860_vm0, %v2859_v0 }
  0xb7   :  { %2462 = vmatmul.mubr.f32.gmra.mxu1 %v491_v29 }
  0xb8   :  { %2464 = vmatprep.mubr.msk.f32.mxu1 %vm2860_vm0, %v2859_v0 }
  0xb9   :  { %2286 = vmatmul.mubr.f32.gmra.mxu0 %v78_v30  ;;  %v1371_v30 = vld [vmem:[%s4594_s3 + $0x18] sm:$0xff] }
  0xba   :  { %2288 = vmatprep.mubr.msk.f32.mxu0 %vm2860_vm0, %v2859_v0 }
  0xbb   :  { %2465 = vmatmul.mubr.f32.gmra.mxu1 %v492_v31 }
  0xbc   :  { %2467 = vmatprep.mubr.msk.f32.mxu1 %vm2860_vm0, %v2859_v0 }
  0xbd   :  { %2289 = vmatmul.mubr.f32.gmra.mxu0 %v79_v32 }
  0xbe   :  { %2291 = vmatprep.mubr.msk.f32.mxu0 %vm2860_vm0, %v2859_v0 }
  0xbf   :  { %2468 = vmatmul.mubr.f32.gmra.mxu1 %v493_v33 }
  0xc0   :  { %2470 = vmatprep.mubr.msk.f32.mxu1 %vm2860_vm0, %v2859_v0 }
  0xc1   :  { %2292 = vmatmul.mubr.f32.gmra.mxu0 %v80_v34 }
  0xc2   :  { %2294 = vmatprep.mubr.msk.f32.mxu0 %vm2860_vm0, %v2859_v0 }
  0xc3   :  { %2471 = vmatmul.mubr.f32.gmra.mxu1 %v494_v35  ;;  %v915_v35 = vld [vmem:[%s4593_s2 + $0x20] sm:$0xff] }
  0xc4   :  { %2473 = vmatprep.mubr.msk.f32.mxu1 %vm2860_vm0, %v2859_v0 }
  0xc5   :  { %2295 = vmatmul.mubr.f32.gmra.mxu0 %v81_v36 }
  0xc6   :  { %2297 = vmatprep.mubr.msk.f32.mxu0 %vm2860_vm0, %v2859_v0 }
  0xc7   :  { %2474 = vmatmul.mubr.f32.gmra.mxu1 %v495_v37 }
  0xc8   :  { %2476 = vmatprep.mubr.msk.f32.mxu1 %vm2860_vm0, %v2859_v0 }
  0xc9   :  { %2298 = vmatmul.mubr.f32.gmra.mxu0 %v82_v38 }
  0xca   :  { %2300 = vmatprep.mubr.msk.f32.mxu0 %vm2860_vm0, %v2859_v0 }
  0xcb   :  { %2477 = vmatmul.mubr.f32.gmra.mxu1 %v496_v39 }
  0xcc   :  { %2479 = vmatprep.mubr.msk.f32.mxu1 %vm2860_vm0, %v2859_v0 }
  0xcd   :  { %2301 = vmatmul.mubr.f32.gmra.mxu0 %v83_v40 }
  0xce   :  { %2303 = vmatprep.mubr.msk.f32.mxu0 %vm2860_vm0, %v2859_v0 }
  0xcf   :  { %2480 = vmatmul.mubr.f32.gmra.mxu1 %v497_v41  ;;  %v1372_v41 = vld [vmem:[%s4594_s3 + $0x20] sm:$0xff] }
  0xd0   :  { %2482 = vmatprep.mubr.msk.f32.mxu1 %vm2860_vm0, %v2859_v0 }
  0xd1   :  { %2304 = vmatmul.mubr.f32.gmra.mxu0 %v84_v42 }
  0xd2   :  { %2306 = vmatprep.mubr.msk.f32.mxu0 %vm2860_vm0, %v2859_v0 }
  0xd3   :  { %2483 = vmatmul.mubr.f32.gmra.mxu1 %v498_v43 }
  0xd4   :  { %2485 = vmatprep.mubr.msk.f32.mxu1 %vm2860_vm0, %v2859_v0 }
  0xd5   :  { %2307 = vmatmul.mubr.f32.gmra.mxu0 %v85_v44 }
  0xd6   :  { %2309 = vmatprep.mubr.msk.f32.mxu0 %vm2860_vm0, %v2859_v0 }
  0xd7   :  { %2486 = vmatmul.mubr.f32.gmra.mxu1 %v499_v45 }
  0xd8   :  { %2488 = vmatprep.mubr.msk.f32.mxu1 %vm2860_vm0, %v2859_v0 }
  0xd9   :  { %2310 = vmatmul.mubr.f32.gmra.mxu0 %v86_v46  ;;  %v916_v46 = vld [vmem:[%s4593_s2 + $0x28] sm:$0xff] }
  0xda   :  { %2312 = vmatprep.mubr.msk.f32.mxu0 %vm2860_vm0, %v2859_v0 }
  0xdb   :  { %2489 = vmatmul.mubr.f32.gmra.mxu1 %v500_v47 }
  0xdc   :  { %2491 = vmatprep.mubr.msk.f32.mxu1 %vm2860_vm0, %v2859_v0 }
  0xdd   :  { %2313 = vmatmul.mubr.f32.gmra.mxu0 %v87_v48 }
  0xde   :  { %2315 = vmatprep.mubr.msk.f32.mxu0 %vm2860_vm0, %v2859_v0 }
  0xdf   :  { %2492 = vmatmul.mubr.f32.gmra.mxu1 %v501_v49 }
  0xe0   :  { %2494 = vmatprep.mubr.msk.f32.mxu1 %vm2860_vm0, %v2859_v0 }
  0xe1   :  { %v161_v53 = vpop.f32.mrf.mxu0  ;;  %2316 = vmatmul.mubr.f32.gmra.mxu0 %v88_v50 }
  0xe2   :  { %v162_v54 = vadd.f32 %v3592_v51, %v161_v53  ;;  %2529 = vmatprep.mubr.msk.f32.mxu0 %vm2860_vm0, %v2859_v0  ;;  %v1373_v53 = vld [vmem:[%s4594_s3 + $0x28] sm:$0xff] }
  0xe3   :  { %v569_v56 = vpop.f32.mrf.mxu1  ;;  %2495 = vmatmul.mubr.f32.gmra.mxu1 %v502_v52  ;;  %v2173_v57 = vpop.f32.mrf.mxu0 }
  0xe4   :  { %v405_v58 = vmax.f32 %v162_v54, 0.0  ;;  %v570_v59 = vadd.f32 %v3592_v51, %v569_v56  ;;  %2708 = vmatprep.mubr.msk.f32.mxu1 %vm2860_vm0, %v2859_v0 }
  0xe5   :  { %v2352_v61 = vpop.f32.mrf.mxu1  ;;  %v166_v62 = vpop.f32.mrf.mxu0  ;;  %2530 = vmatmul.mubr.f32.vlgmr.msra.gmra.mxu0 %v911_v55 }
  0xe6   :  { %v813_v63 = vmax.f32 %v570_v59, 0.0  ;;  %v167_v1 = vadd.f32 %v3592_v51, %v166_v62  ;;  %2532 = vmatprep.mubr.msk.f32.mxu0 %vm2860_vm0, %v2859_v0 }
  0xe7   :  { %v574_v3 = vpop.f32.mrf.mxu1  ;;  %2709 = vmatmul.mubr.f32.vlgmr.msra.gmra.mxu1 %v1368_v60  ;;  %v2176_v4 = vpop.f32.mrf.mxu0 }
  0xe8   :  { %v3617_v5 = vmax.f32 %v405_v58, %v813_v63  ;;  %v406_v6 = vmax.f32 %v167_v1, 0.0  ;;  %v575_v7 = vadd.f32 %v3592_v51, %v574_v3  ;;  %2711 = vmatprep.mubr.msk.f32.mxu1 %vm2860_vm0, %v2859_v0  ;;  %v917_v58 = vld [vmem:[%s4593_s2 + $0x30] sm:$0xff] }
  0xe9   :  { %v2355_v9 = vpop.f32.mrf.mxu1  ;;  %v171_v10 = vpop.f32.mrf.mxu0  ;;  %2533 = vmatmul.mubr.f32.gmra.mxu0 %v912_v2  ;;  %v1374_v1 = vld [vmem:[%s4594_s3 + $0x30] sm:$0xff] }
  0xea   :  { %v814_v11 = vmax.f32 %v575_v7, 0.0  ;;  %v172_v12 = vadd.f32 %v3592_v51, %v171_v10  ;;  %2535 = vmatprep.mubr.msk.f32.mxu0 %vm2860_vm0, %v2859_v0  ;;  %v918_v7 = vld [vmem:[%s4593_s2 + $0x38] sm:$0xff] }
  0xeb   :  { %v579_v14 = vpop.f32.mrf.mxu1  ;;  %2712 = vmatmul.mubr.f32.gmra.mxu1 %v1369_v8  ;;  %v2179_v15 = vpop.f32.mrf.mxu0 }
  0xec   :  { %v3631_v16 = vmax.f32 %v406_v6, %v814_v11  ;;  %v407_v17 = vmax.f32 %v172_v12, 0.0  ;;  %v580_v18 = vadd.f32 %v3592_v51, %v579_v14  ;;  %2714 = vmatprep.mubr.msk.f32.mxu1 %vm2860_vm0, %v2859_v0 }
  0xed   :  { %v2358_v20 = vpop.f32.mrf.mxu1  ;;  %v176_v21 = vpop.f32.mrf.mxu0  ;;  %2536 = vmatmul.mubr.f32.gmra.mxu0 %v913_v13  ;;  %v1375_v13 = vld [vmem:[%s4594_s3 + $0x38] sm:$0xff] }
  0xee   :  { %v815_v22 = vmax.f32 %v580_v18, 0.0  ;;  %v177_v23 = vadd.f32 %v3592_v51, %v176_v21  ;;  %2538 = vmatprep.mubr.msk.f32.mxu0 %vm2860_vm0, %v2859_v0 }
  0xef   :  { %v584_v25 = vpop.f32.mrf.mxu1  ;;  %2715 = vmatmul.mubr.f32.gmra.mxu1 %v1370_v19  ;;  %v2182_v26 = vpop.f32.mrf.mxu0  ;;  %v919_v19 = vld [vmem:[%s4593_s2 + $0x40] sm:$0xff] }
  0xf0   :  { %v3645_v27 = vmax.f32 %v407_v17, %v815_v22  ;;  %v408_v28 = vmax.f32 %v177_v23, 0.0  ;;  %v585_v29 = vadd.f32 %v3592_v51, %v584_v25  ;;  %2717 = vmatprep.mubr.msk.f32.mxu1 %vm2860_vm0, %v2859_v0  ;;  %v1376_v25 = vld [vmem:[%s4594_s3 + $0x40] sm:$0xff] }
  0xf1   :  { %v2361_v31 = vpop.f32.mrf.mxu1  ;;  %v181_v32 = vpop.f32.mrf.mxu0  ;;  %2539 = vmatmul.mubr.f32.gmra.mxu0 %v914_v24 }
  0xf2   :  { %v816_v33 = vmax.f32 %v585_v29, 0.0  ;;  %v182_v34 = vadd.f32 %v3592_v51, %v181_v32  ;;  %2541 = vmatprep.mubr.msk.f32.mxu0 %vm2860_vm0, %v2859_v0  ;;  %v920_v31 = vld [vmem:[%s4593_s2 + $0x48] sm:$0xff] }
  0xf3   :  { %v589_v36 = vpop.f32.mrf.mxu1  ;;  %2718 = vmatmul.mubr.f32.gmra.mxu1 %v1371_v30  ;;  %v2185_v37 = vpop.f32.mrf.mxu0 }
  0xf4   :  { %v3659_v38 = vmax.f32 %v408_v28, %v816_v33  ;;  %v409_v39 = vmax.f32 %v182_v34, 0.0  ;;  %v590_v40 = vadd.f32 %v3592_v51, %v589_v36  ;;  %2720 = vmatprep.mubr.msk.f32.mxu1 %vm2860_vm0, %v2859_v0  ;;  %v1377_v37 = vld [vmem:[%s4594_s3 + $0x48] sm:$0xff] }
  0xf5   :  { %v2364_v42 = vpop.f32.mrf.mxu1  ;;  %v186_v43 = vpop.f32.mrf.mxu0  ;;  %2542 = vmatmul.mubr.f32.gmra.mxu0 %v915_v35 }
  0xf6   :  { %v817_v44 = vmax.f32 %v590_v40, 0.0  ;;  %v187_v45 = vadd.f32 %v3592_v51, %v186_v43  ;;  %2544 = vmatprep.mubr.msk.f32.mxu0 %vm2860_vm0, %v2859_v0  ;;  %v921_v43 = vld [vmem:[%s4593_s2 + $0x50] sm:$0xff] }
  0xf7   :  { %v594_v47 = vpop.f32.mrf.mxu1  ;;  %2721 = vmatmul.mubr.f32.gmra.mxu1 %v1372_v41  ;;  %v2188_v48 = vpop.f32.mrf.mxu0 }
  0xf8   :  { %v3673_v49 = vmax.f32 %v409_v39, %v817_v44  ;;  %v410_v50 = vmax.f32 %v187_v45, 0.0  ;;  %v595_v52 = vadd.f32 %v3592_v51, %v594_v47  ;;  %2723 = vmatprep.mubr.msk.f32.mxu1 %vm2860_vm0, %v2859_v0 }
  0xf9   :  { %v2367_v54 = vpop.f32.mrf.mxu1  ;;  %v191_v55 = vpop.f32.mrf.mxu0  ;;  %2545 = vmatmul.mubr.f32.gmra.mxu0 %v916_v46 }
  0xfa   :  { %v818_v56 = vmax.f32 %v595_v52, 0.0  ;;  %v192_v57 = vadd.f32 %v3592_v51, %v191_v55  ;;  %2547 = vmatprep.mubr.msk.f32.mxu0 %vm2860_vm0, %v2859_v0 }
  0xfb   :  { %v599_v59 = vpop.f32.mrf.mxu1  ;;  %2724 = vmatmul.mubr.f32.gmra.mxu1 %v1373_v53  ;;  %v2191_v60 = vpop.f32.mrf.mxu0 }
  0xfc   :  { %v3687_v61 = vmax.f32 %v410_v50, %v818_v56  ;;  %v411_v62 = vmax.f32 %v192_v57, 0.0  ;;  %v600_v63 = vadd.f32 %v3592_v51, %v599_v59  ;;  %2726 = vmatprep.mubr.msk.f32.mxu1 %vm2860_vm0, %v2859_v0  ;;  %v1378_v50 = vld [vmem:[%s4594_s3 + $0x50] sm:$0xff]  ;;  %v922_v56 = vld [vmem:[%s4593_s2 + $0x58] sm:$0xff] }
  0xfd   :  { %v2370_v2 = vpop.f32.mrf.mxu1  ;;  %v196_v3 = vpop.f32.mrf.mxu0  ;;  %2548 = vmatmul.mubr.f32.gmra.mxu0 %v917_v58 }
  0xfe   :  { %v819_v4 = vmax.f32 %v600_v63, 0.0  ;;  %v197_v6 = vadd.f32 %v3592_v51, %v196_v3  ;;  %2550 = vmatprep.mubr.msk.f32.mxu0 %vm2860_vm0, %v2859_v0  ;;  %v1379_v63 = vld [vmem:[%s4594_s3 + $0x58] sm:$0xff] }
  0xff   :  { %v604_v8 = vpop.f32.mrf.mxu1  ;;  %2727 = vmatmul.mubr.f32.gmra.mxu1 %v1374_v1  ;;  %v2194_v9 = vpop.f32.mrf.mxu0 }
 0x100   :  { %v3701_v10 = vmax.f32 %v411_v62, %v819_v4  ;;  %v412_v11 = vmax.f32 %v197_v6, 0.0  ;;  %v605_v12 = vadd.f32 %v3592_v51, %v604_v8  ;;  %2729 = vmatprep.mubr.msk.f32.mxu1 %vm2860_vm0, %v2859_v0  ;;  %v923_v6 = vld [vmem:[%s4593_s2 + $0x60] sm:$0xff] }
 0x101   :  { %v2373_v14 = vpop.f32.mrf.mxu1  ;;  %v201_v15 = vpop.f32.mrf.mxu0  ;;  %2551 = vmatmul.mubr.f32.gmra.mxu0 %v918_v7 }
 0x102   :  { %v820_v17 = vmax.f32 %v605_v12, 0.0  ;;  %v202_v18 = vadd.f32 %v3592_v51, %v201_v15  ;;  %2553 = vmatprep.mubr.msk.f32.mxu0 %vm2860_vm0, %v2859_v0 }
 0x103   :  { %v609_v20 = vpop.f32.mrf.mxu1  ;;  %2730 = vmatmul.mubr.f32.gmra.mxu1 %v1375_v13  ;;  %v2197_v21 = vpop.f32.mrf.mxu0  ;;  %v1380_v13 = vld [vmem:[%s4594_s3 + $0x60] sm:$0xff] }
 0x104   :  { %v3715_v22 = vmax.f32 %v412_v11, %v820_v17  ;;  %v413_v23 = vmax.f32 %v202_v18, 0.0  ;;  %v610_v24 = vadd.f32 %v3592_v51, %v609_v20  ;;  %2732 = vmatprep.mubr.msk.f32.mxu1 %vm2860_vm0, %v2859_v0 }
 0x105   :  { %v2376_v26 = vpop.f32.mrf.mxu1  ;;  %v206_v28 = vpop.f32.mrf.mxu0  ;;  %2554 = vmatmul.mubr.f32.gmra.mxu0 %v919_v19  ;;  %v924_v19 = vld [vmem:[%s4593_s2 + $0x68] sm:$0xff] }
 0x106   :  { %v821_v29 = vmax.f32 %v610_v24, 0.0  ;;  %v207_v30 = vadd.f32 %v3592_v51, %v206_v28  ;;  %2556 = vmatprep.mubr.msk.f32.mxu0 %vm2860_vm0, %v2859_v0  ;;  %v1381_v26 = vld [vmem:[%s4594_s3 + $0x68] sm:$0xff] }
 0x107   :  { %v614_v32 = vpop.f32.mrf.mxu1  ;;  %2733 = vmatmul.mubr.f32.gmra.mxu1 %v1376_v25  ;;  %v2200_v33 = vpop.f32.mrf.mxu0 }
 0x108   :  { %v3729_v34 = vmax.f32 %v413_v23, %v821_v29  ;;  %v414_v35 = vmax.f32 %v207_v30, 0.0  ;;  %v615_v36 = vadd.f32 %v3592_v51, %v614_v32  ;;  %2735 = vmatprep.mubr.msk.f32.mxu1 %vm2860_vm0, %v2859_v0  ;;  %v925_v32 = vld [vmem:[%s4593_s2 + $0x70] sm:$0xff] }
 0x109   :  { %v2379_v39 = vpop.f32.mrf.mxu1  ;;  %v211_v40 = vpop.f32.mrf.mxu0  ;;  %2557 = vmatmul.mubr.f32.gmra.mxu0 %v920_v31 }
 0x10a   :  { %v822_v41 = vmax.f32 %v615_v36, 0.0  ;;  %v212_v42 = vadd.f32 %v3592_v51, %v211_v40  ;;  %2559 = vmatprep.mubr.msk.f32.mxu0 %vm2860_vm0, %v2859_v0  ;;  %v1382_v40 = vld [vmem:[%s4594_s3 + $0x70] sm:$0xff] }
 0x10b   :  { %v619_v44 = vpop.f32.mrf.mxu1  ;;  %2736 = vmatmul.mubr.f32.gmra.mxu1 %v1377_v37  ;;  %v2203_v45 = vpop.f32.mrf.mxu0 }
 0x10c   :  { %v3743_v46 = vmax.f32 %v414_v35, %v822_v41  ;;  %v415_v47 = vmax.f32 %v212_v42, 0.0  ;;  %v620_v48 = vadd.f32 %v3592_v51, %v619_v44  ;;  %2738 = vmatprep.mubr.msk.f32.mxu1 %vm2860_vm0, %v2859_v0  ;;  %v926_v45 = vld [vmem:[%s4593_s2 + $0x78] sm:$0xff] }
 0x10d   :  { %v2382_v52 = vpop.f32.mrf.mxu1  ;;  %v216_v53 = vpop.f32.mrf.mxu0  ;;  %2560 = vmatmul.mubr.f32.gmra.mxu0 %v921_v43 }
 0x10e   :  { %v823_v54 = vmax.f32 %v620_v48, 0.0  ;;  %v217_v55 = vadd.f32 %v3592_v51, %v216_v53  ;;  %2562 = vmatprep.mubr.msk.f32.mxu0 %vm2860_vm0, %v2859_v0 }
 0x10f   :  { %v624_v57 = vpop.f32.mrf.mxu1  ;;  %2739 = vmatmul.mubr.f32.gmra.mxu1 %v1378_v50  ;;  %v2206_v58 = vpop.f32.mrf.mxu0 }
 0x110   :  { %v3757_v59 = vmax.f32 %v415_v47, %v823_v54  ;;  %v416_v60 = vmax.f32 %v217_v55, 0.0  ;;  %v625_v62 = vadd.f32 %v3592_v51, %v624_v57  ;;  %2741 = vmatprep.mubr.msk.f32.mxu1 %vm2860_vm0, %v2859_v0  ;;  %v1383_v54 = vld [vmem:[%s4594_s3 + $0x78] sm:$0xff] }
 0x111   :  { %v2385_v1 = vpop.f32.mrf.mxu1  ;;  %v221_v2 = vpop.f32.mrf.mxu0  ;;  %2563 = vmatmul.mubr.f32.gmra.mxu0 %v922_v56 }
 0x112   :  { %v824_v3 = vmax.f32 %v625_v62, 0.0  ;;  %v222_v4 = vadd.f32 %v3592_v51, %v221_v2  ;;  %2565 = vmatprep.mubr.msk.f32.mxu0 %vm2860_vm0, %v2859_v0 }
 0x113   :  { %v629_v7 = vpop.f32.mrf.mxu1  ;;  %2742 = vmatmul.mubr.f32.gmra.mxu1 %v1379_v63  ;;  %v2209_v8 = vpop.f32.mrf.mxu0 }
 0x114   :  { %v3771_v9 = vmax.f32 %v416_v60, %v824_v3  ;;  %v417_v11 = vmax.f32 %v222_v4, 0.0  ;;  %v630_v12 = vadd.f32 %v3592_v51, %v629_v7  ;;  %2744 = vmatprep.mubr.msk.f32.mxu1 %vm2860_vm0, %v2859_v0  ;;  %v927_v60 = vld [vmem:[%s4593_s2 + $0x80] sm:$0xff] }
 0x115   :  { %v2388_v14 = vpop.f32.mrf.mxu1  ;;  %v226_v15 = vpop.f32.mrf.mxu0  ;;  %2566 = vmatmul.mubr.f32.gmra.mxu0 %v923_v6  ;;  %v1384_v4 = vld [vmem:[%s4594_s3 + $0x80] sm:$0xff] }
 0x116   :  { %v825_v17 = vmax.f32 %v630_v12, 0.0  ;;  %v227_v18 = vadd.f32 %v3592_v51, %v226_v15  ;;  %2568 = vmatprep.mubr.msk.f32.mxu0 %vm2860_vm0, %v2859_v0  ;;  %v928_v12 = vld [vmem:[%s4593_s2 + $0x88] sm:$0xff] }
 0x117   :  { %v634_v20 = vpop.f32.mrf.mxu1  ;;  %2745 = vmatmul.mubr.f32.gmra.mxu1 %v1380_v13  ;;  %v2212_v21 = vpop.f32.mrf.mxu0 }
 0x118   :  { %v3785_v23 = vmax.f32 %v417_v11, %v825_v17  ;;  %v418_v24 = vmax.f32 %v227_v18, 0.0  ;;  %v635_v25 = vadd.f32 %v3592_v51, %v634_v20  ;;  %2747 = vmatprep.mubr.msk.f32.mxu1 %vm2860_vm0, %v2859_v0 }
 0x119   :  { %v2391_v28 = vpop.f32.mrf.mxu1  ;;  %v231_v29 = vpop.f32.mrf.mxu0  ;;  %2569 = vmatmul.mubr.f32.gmra.mxu0 %v924_v19  ;;  %v1385_v19 = vld [vmem:[%s4594_s3 + $0x88] sm:$0xff] }
 0x11a   :  { %v826_v30 = vmax.f32 %v635_v25, 0.0  ;;  %v232_v31 = vadd.f32 %v3592_v51, %v231_v29  ;;  %2571 = vmatprep.mubr.msk.f32.mxu0 %vm2860_vm0, %v2859_v0 }
 0x11b   :  { %v639_v33 = vpop.f32.mrf.mxu1  ;;  %2748 = vmatmul.mubr.f32.gmra.mxu1 %v1381_v26  ;;  %v2215_v35 = vpop.f32.mrf.mxu0  ;;  %v929_v26 = vld [vmem:[%s4593_s2 + $0x90] sm:$0xff] }
 0x11c   :  { %v3799_v36 = vmax.f32 %v418_v24, %v826_v30  ;;  %v419_v37 = vmax.f32 %v232_v31, 0.0  ;;  %v640_v39 = vadd.f32 %v3592_v51, %v639_v33  ;;  %2750 = vmatprep.mubr.msk.f32.mxu1 %vm2860_vm0, %v2859_v0  ;;  %v1386_v33 = vld [vmem:[%s4594_s3 + $0x90] sm:$0xff] }
 0x11d   :  { %v2394_v41 = vpop.f32.mrf.mxu1  ;;  %v236_v42 = vpop.f32.mrf.mxu0  ;;  %2572 = vmatmul.mubr.f32.gmra.mxu0 %v925_v32 }
 0x11e   :  { %v827_v43 = vmax.f32 %v640_v39, 0.0  ;;  %v237_v44 = vadd.f32 %v3592_v51, %v236_v42  ;;  %2574 = vmatprep.mubr.msk.f32.mxu0 %vm2860_vm0, %v2859_v0  ;;  %v930_v41 = vld [vmem:[%s4593_s2 + $0x98] sm:$0xff] }
 0x11f   :  { %v644_v47 = vpop.f32.mrf.mxu1  ;;  %2751 = vmatmul.mubr.f32.gmra.mxu1 %v1382_v40  ;;  %v2218_v48 = vpop.f32.mrf.mxu0 }
 0x120   :  { %v3813_v50 = vmax.f32 %v419_v37, %v827_v43  ;;  %v420_v52 = vmax.f32 %v237_v44, 0.0  ;;  %v645_v53 = vadd.f32 %v3592_v51, %v644_v47  ;;  %2753 = vmatprep.mubr.msk.f32.mxu1 %vm2860_vm0, %v2859_v0  ;;  %v1387_v48 = vld [vmem:[%s4594_s3 + $0x98] sm:$0xff] }
 0x121   :  { %v2397_v55 = vpop.f32.mrf.mxu1  ;;  %v241_v56 = vpop.f32.mrf.mxu0  ;;  %2575 = vmatmul.mubr.f32.gmra.mxu0 %v926_v45 }
 0x122   :  { %v828_v57 = vmax.f32 %v645_v53, 0.0  ;;  %v242_v58 = vadd.f32 %v3592_v51, %v241_v56  ;;  %2577 = vmatprep.mubr.msk.f32.mxu0 %vm2860_vm0, %v2859_v0  ;;  %v931_v56 = vld [vmem:[%s4593_s2 + $0xa0] sm:$0xff] }
 0x123   :  { %v649_v62 = vpop.f32.mrf.mxu1  ;;  %2754 = vmatmul.mubr.f32.gmra.mxu1 %v1383_v54  ;;  %v2221_v63 = vpop.f32.mrf.mxu0 }
 0x124   :  { %v3827_v1 = vmax.f32 %v420_v52, %v828_v57  ;;  %v421_v2 = vmax.f32 %v242_v58, 0.0  ;;  %v650_v3 = vadd.f32 %v3592_v51, %v649_v62  ;;  %2756 = vmatprep.mubr.msk.f32.mxu1 %vm2860_vm0, %v2859_v0 }
 0x125   :  { %v2400_v6 = vpop.f32.mrf.mxu1  ;;  %v246_v7 = vpop.f32.mrf.mxu0  ;;  %2578 = vmatmul.mubr.f32.gmra.mxu0 %v927_v60 }
 0x126   :  { %v829_v8 = vmax.f32 %v650_v3, 0.0  ;;  %v247_v11 = vadd.f32 %v3592_v51, %v246_v7  ;;  %2580 = vmatprep.mubr.msk.f32.mxu0 %vm2860_vm0, %v2859_v0 }
 0x127   :  { %v654_v13 = vpop.f32.mrf.mxu1  ;;  %2757 = vmatmul.mubr.f32.gmra.mxu1 %v1384_v4  ;;  %v2224_v14 = vpop.f32.mrf.mxu0 }
 0x128   :  { %v3841_v15 = vmax.f32 %v421_v2, %v829_v8  ;;  %v422_v17 = vmax.f32 %v247_v11, 0.0  ;;  %v655_v18 = vadd.f32 %v3592_v51, %v654_v13  ;;  %2759 = vmatprep.mubr.msk.f32.mxu1 %vm2860_vm0, %v2859_v0  ;;  %v1388_v2 = vld [vmem:[%s4594_s3 + $0xa0] sm:$0xff]  ;;  %v932_v8 = vld [vmem:[%s4593_s2 + $0xa8] sm:$0xff] }
 0x129   :  { %v2403_v20 = vpop.f32.mrf.mxu1  ;;  %v251_v21 = vpop.f32.mrf.mxu0  ;;  %2581 = vmatmul.mubr.f32.gmra.mxu0 %v928_v12 }
 0x12a   :  { %v830_v24 = vmax.f32 %v655_v18, 0.0  ;;  %v252_v25 = vadd.f32 %v3592_v51, %v251_v21  ;;  %2583 = vmatprep.mubr.msk.f32.mxu0 %vm2860_vm0, %v2859_v0  ;;  %v1389_v18 = vld [vmem:[%s4594_s3 + $0xa8] sm:$0xff] }
 0x12b   :  { %v659_v28 = vpop.f32.mrf.mxu1  ;;  %2760 = vmatmul.mubr.f32.gmra.mxu1 %v1385_v19  ;;  %v2227_v29 = vpop.f32.mrf.mxu0 }
 0x12c   :  { %v3855_v30 = vmax.f32 %v422_v17, %v830_v24  ;;  %v423_v31 = vmax.f32 %v252_v25, 0.0  ;;  %v660_v32 = vadd.f32 %v3592_v51, %v659_v28  ;;  %2762 = vmatprep.mubr.msk.f32.mxu1 %vm2860_vm0, %v2859_v0  ;;  %v933_v25 = vld [vmem:[%s4593_s2 + $0xb0] sm:$0xff] }
 0x12d   :  { %v2406_v35 = vpop.f32.mrf.mxu1  ;;  %v256_v37 = vpop.f32.mrf.mxu0  ;;  %2584 = vmatmul.mubr.f32.gmra.mxu0 %v929_v26 }
 0x12e   :  { %v831_v39 = vmax.f32 %v660_v32, 0.0  ;;  %v257_v40 = vadd.f32 %v3592_v51, %v256_v37  ;;  %2586 = vmatprep.mubr.msk.f32.mxu0 %vm2860_vm0, %v2859_v0 }
 0x12f   :  { %v664_v42 = vpop.f32.mrf.mxu1  ;;  %2763 = vmatmul.mubr.f32.gmra.mxu1 %v1386_v33  ;;  %v2230_v43 = vpop.f32.mrf.mxu0  ;;  %v1390_v33 = vld [vmem:[%s4594_s3 + $0xb0] sm:$0xff] }
 0x130   :  { %v3869_v44 = vmax.f32 %v423_v31, %v831_v39  ;;  %v424_v45 = vmax.f32 %v257_v40, 0.0  ;;  %v665_v47 = vadd.f32 %v3592_v51, %v664_v42  ;;  %2765 = vmatprep.mubr.msk.f32.mxu1 %vm2860_vm0, %v2859_v0 }
 0x131   :  { %v2409_v52 = vpop.f32.mrf.mxu1  ;;  %v261_v53 = vpop.f32.mrf.mxu0  ;;  %2587 = vmatmul.mubr.f32.gmra.mxu0 %v930_v41  ;;  %v934_v41 = vld [vmem:[%s4593_s2 + $0xb8] sm:$0xff] }
 0x132   :  { %v832_v54 = vmax.f32 %v665_v47, 0.0  ;;  %v262_v55 = vadd.f32 %v3592_v51, %v261_v53  ;;  %2589 = vmatprep.mubr.msk.f32.mxu0 %vm2860_vm0, %v2859_v0  ;;  %v1391_v52 = vld [vmem:[%s4594_s3 + $0xb8] sm:$0xff] }
 0x133   :  { %v669_v57 = vpop.f32.mrf.mxu1  ;;  %2766 = vmatmul.mubr.f32.gmra.mxu1 %v1387_v48  ;;  %v2233_v58 = vpop.f32.mrf.mxu0 }
 0x134   :  { %v3883_v60 = vmax.f32 %v424_v45, %v832_v54  ;;  %v425_v62 = vmax.f32 %v262_v55, 0.0  ;;  %v670_v63 = vadd.f32 %v3592_v51, %v669_v57  ;;  %2768 = vmatprep.mubr.msk.f32.mxu1 %vm2860_vm0, %v2859_v0  ;;  %v935_v57 = vld [vmem:[%s4593_s2 + $0xc0] sm:$0xff] }
 0x135   :  { %v2412_v3 = vpop.f32.mrf.mxu1  ;;  %v266_v4 = vpop.f32.mrf.mxu0  ;;  %2590 = vmatmul.mubr.f32.gmra.mxu0 %v931_v56 }
 0x136   :  { %v833_v6 = vmax.f32 %v670_v63, 0.0  ;;  %v267_v7 = vadd.f32 %v3592_v51, %v266_v4  ;;  %2592 = vmatprep.mubr.msk.f32.mxu0 %vm2860_vm0, %v2859_v0  ;;  %v1392_v4 = vld [vmem:[%s4594_s3 + $0xc0] sm:$0xff] }
 0x137   :  { %v674_v11 = vpop.f32.mrf.mxu1  ;;  %2769 = vmatmul.mubr.f32.gmra.mxu1 %v1388_v2  ;;  %v2236_v12 = vpop.f32.mrf.mxu0 }
 0x138   :  { %v3897_v13 = vmax.f32 %v425_v62, %v833_v6  ;;  %v426_v14 = vmax.f32 %v267_v7, 0.0  ;;  %v675_v17 = vadd.f32 %v3592_v51, %v674_v11  ;;  %2771 = vmatprep.mubr.msk.f32.mxu1 %vm2860_vm0, %v2859_v0  ;;  %v936_v12 = vld [vmem:[%s4593_s2 + $0xc8] sm:$0xff] }
 0x139   :  { %v2415_v19 = vpop.f32.mrf.mxu1  ;;  %v271_v20 = vpop.f32.mrf.mxu0  ;;  %2593 = vmatmul.mubr.f32.gmra.mxu0 %v932_v8 }
 0x13a   :  { %v834_v21 = vmax.f32 %v675_v17, 0.0  ;;  %v272_v24 = vadd.f32 %v3592_v51, %v271_v20  ;;  %2595 = vmatprep.mubr.msk.f32.mxu0 %vm2860_vm0, %v2859_v0 }
 0x13b   :  { %v679_v26 = vpop.f32.mrf.mxu1  ;;  %2772 = vmatmul.mubr.f32.gmra.mxu1 %v1389_v18  ;;  %v2239_v28 = vpop.f32.mrf.mxu0 }
 0x13c   :  { %v3911_v29 = vmax.f32 %v426_v14, %v834_v21  ;;  %v427_v31 = vmax.f32 %v272_v24, 0.0  ;;  %v680_v32 = vadd.f32 %v3592_v51, %v679_v26  ;;  %2774 = vmatprep.mubr.msk.f32.mxu1 %vm2860_vm0, %v2859_v0  ;;  %v1393_v21 = vld [vmem:[%s4594_s3 + $0xc8] sm:$0xff] }
 0x13d   :  { %v2418_v35 = vpop.f32.mrf.mxu1  ;;  %v276_v37 = vpop.f32.mrf.mxu0  ;;  %2596 = vmatmul.mubr.f32.gmra.mxu0 %v933_v25 }
 0x13e   :  { %v835_v39 = vmax.f32 %v680_v32, 0.0  ;;  %v277_v40 = vadd.f32 %v3592_v51, %v276_v37  ;;  %2598 = vmatprep.mubr.msk.f32.mxu0 %vm2860_vm0, %v2859_v0 }
 0x13f   :  { %v684_v42 = vpop.f32.mrf.mxu1  ;;  %2775 = vmatmul.mubr.f32.gmra.mxu1 %v1390_v33  ;;  %v2242_v43 = vpop.f32.mrf.mxu0 }
 0x140   :  { %v3925_v45 = vmax.f32 %v427_v31, %v835_v39  ;;  %v428_v47 = vmax.f32 %v277_v40, 0.0  ;;  %v685_v48 = vadd.f32 %v3592_v51, %v684_v42  ;;  %2777 = vmatprep.mubr.msk.f32.mxu1 %vm2860_vm0, %v2859_v0  ;;  %v937_v31 = vld [vmem:[%s4593_s2 + $0xd0] sm:$0xff] }
 0x141   :  { %v2421_v53 = vpop.f32.mrf.mxu1  ;;  %v281_v54 = vpop.f32.mrf.mxu0  ;;  %2599 = vmatmul.mubr.f32.gmra.mxu0 %v934_v41  ;;  %v1394_v40 = vld [vmem:[%s4594_s3 + $0xd0] sm:$0xff] }
 0x142   :  { %v836_v55 = vmax.f32 %v685_v48, 0.0  ;;  %v282_v56 = vadd.f32 %v3592_v51, %v281_v54  ;;  %2601 = vmatprep.mubr.msk.f32.mxu0 %vm2860_vm0, %v2859_v0  ;;  %v938_v48 = vld [vmem:[%s4593_s2 + $0xd8] sm:$0xff] }
 0x143   :  { %v689_v58 = vpop.f32.mrf.mxu1  ;;  %2778 = vmatmul.mubr.f32.gmra.mxu1 %v1391_v52  ;;  %v2245_v62 = vpop.f32.mrf.mxu0 }
 0x144   :  { %v3939_v63 = vmax.f32 %v428_v47, %v836_v55  ;;  %v429_v2 = vmax.f32 %v282_v56, 0.0  ;;  %v690_v3 = vadd.f32 %v3592_v51, %v689_v58  ;;  %2780 = vmatprep.mubr.msk.f32.mxu1 %vm2860_vm0, %v2859_v0 }
 0x145   :  { %v2424_v6 = vpop.f32.mrf.mxu1  ;;  %v286_v7 = vpop.f32.mrf.mxu0  ;;  %2602 = vmatmul.mubr.f32.gmra.mxu0 %v935_v57  ;;  %v1395_v57 = vld [vmem:[%s4594_s3 + $0xd8] sm:$0xff] }
 0x146   :  { %v837_v8 = vmax.f32 %v690_v3, 0.0  ;;  %v287_v11 = vadd.f32 %v3592_v51, %v286_v7  ;;  %2604 = vmatprep.mubr.msk.f32.mxu0 %vm2860_vm0, %v2859_v0 }
 0x147   :  { %v694_v14 = vpop.f32.mrf.mxu1  ;;  %2781 = vmatmul.mubr.f32.gmra.mxu1 %v1392_v4  ;;  %v2248_v17 = vpop.f32.mrf.mxu0  ;;  %v939_v4 = vld [vmem:[%s4593_s2 + $0xe0] sm:$0xff] }
 0x148   :  { %v3953_v18 = vmax.f32 %v429_v2, %v837_v8  ;;  %v430_v19 = vmax.f32 %v287_v11, 0.0  ;;  %v695_v20 = vadd.f32 %v3592_v51, %v694_v14  ;;  %2783 = vmatprep.mubr.msk.f32.mxu1 %vm2860_vm0, %v2859_v0  ;;  %v1396_v14 = vld [vmem:[%s4594_s3 + $0xe0] sm:$0xff] }
 0x149   :  { %v2427_v24 = vpop.f32.mrf.mxu1  ;;  %v291_v25 = vpop.f32.mrf.mxu0  ;;  %2605 = vmatmul.mubr.f32.gmra.mxu0 %v936_v12 }
 0x14a   :  { %v838_v26 = vmax.f32 %v695_v20, 0.0  ;;  %v292_v28 = vadd.f32 %v3592_v51, %v291_v25  ;;  %2607 = vmatprep.mubr.msk.f32.mxu0 %vm2860_vm0, %v2859_v0  ;;  %v940_v24 = vld [vmem:[%s4593_s2 + $0xe8] sm:$0xff] }
 0x14b   :  { %v699_v32 = vpop.f32.mrf.mxu1  ;;  %2784 = vmatmul.mubr.f32.gmra.mxu1 %v1393_v21  ;;  %v2251_v33 = vpop.f32.mrf.mxu0 }
 0x14c   :  { %v3967_v35 = vmax.f32 %v430_v19, %v838_v26  ;;  %v431_v37 = vmax.f32 %v292_v28, 0.0  ;;  %v700_v39 = vadd.f32 %v3592_v51, %v699_v32  ;;  %2786 = vmatprep.mubr.msk.f32.mxu1 %vm2860_vm0, %v2859_v0  ;;  %v1397_v33 = vld [vmem:[%s4594_s3 + $0xe8] sm:$0xff] }
 0x14d   :  { %v2430_v41 = vpop.f32.mrf.mxu1  ;;  %v296_v42 = vpop.f32.mrf.mxu0  ;;  %2608 = vmatmul.mubr.f32.gmra.mxu0 %v937_v31 }
 0x14e   :  { %v839_v43 = vmax.f32 %v700_v39, 0.0  ;;  %v297_v47 = vadd.f32 %v3592_v51, %v296_v42  ;;  %2610 = vmatprep.mubr.msk.f32.mxu0 %vm2860_vm0, %v2859_v0  ;;  %v941_v42 = vld [vmem:[%s4593_s2 + $0xf0] sm:$0xff] }
 0x14f   :  { %v704_v52 = vpop.f32.mrf.mxu1  ;;  %2787 = vmatmul.mubr.f32.gmra.mxu1 %v1394_v40  ;;  %v2254_v53 = vpop.f32.mrf.mxu0 }
 0x150   :  { %v3981_v54 = vmax.f32 %v431_v37, %v839_v43  ;;  %v432_v55 = vmax.f32 %v297_v47, 0.0  ;;  %v705_v56 = vadd.f32 %v3592_v51, %v704_v52  ;;  %2789 = vmatprep.mubr.msk.f32.mxu1 %vm2860_vm0, %v2859_v0 }
 0x151   :  { %v2433_v58 = vpop.f32.mrf.mxu1  ;;  %v301_v62 = vpop.f32.mrf.mxu0  ;;  %2611 = vmatmul.mubr.f32.gmra.mxu0 %v938_v48 }
 0x152   :  { %v840_v2 = vmax.f32 %v705_v56, 0.0  ;;  %v302_v3 = vadd.f32 %v3592_v51, %v301_v62  ;;  %2613 = vmatprep.mubr.msk.f32.mxu0 %vm2860_vm0, %v2859_v0 }
 0x153   :  { %v709_v6 = vpop.f32.mrf.mxu1  ;;  %2790 = vmatmul.mubr.f32.gmra.mxu1 %v1395_v57  ;;  %v2257_v7 = vpop.f32.mrf.mxu0 }
 0x154   :  { %v3995_v8 = vmax.f32 %v432_v55, %v840_v2  ;;  %v433_v11 = vmax.f32 %v302_v3, 0.0  ;;  %v710_v12 = vadd.f32 %v3592_v51, %v709_v6  ;;  %2792 = vmatprep.mubr.msk.f32.mxu1 %vm2860_vm0, %v2859_v0  ;;  %v1398_v55 = vld [vmem:[%s4594_s3 + $0xf0] sm:$0xff]  ;;  %v942_v2 = vld [vmem:[%s4593_s2 + $0xf8] sm:$0xff] }
 0x155   :  { %v2436_v17 = vpop.f32.mrf.mxu1  ;;  %v306_v19 = vpop.f32.mrf.mxu0  ;;  %2614 = vmatmul.mubr.f32.gmra.mxu0 %v939_v4 }
 0x156   :  { %v841_v20 = vmax.f32 %v710_v12, 0.0  ;;  %v307_v21 = vadd.f32 %v3592_v51, %v306_v19  ;;  %2616 = vmatprep.mubr.msk.f32.mxu0 %vm2860_vm0, %v2859_v0  ;;  %v1399_v12 = vld [vmem:[%s4594_s3 + $0xf8] sm:$0xff] }
 0x157   :  { %v714_v25 = vpop.f32.mrf.mxu1  ;;  %2793 = vmatmul.mubr.f32.gmra.mxu1 %v1396_v14  ;;  %v2260_v26 = vpop.f32.mrf.mxu0 }
 0x158   :  { %v4009_v28 = vmax.f32 %v433_v11, %v841_v20  ;;  %v434_v31 = vmax.f32 %v307_v21, 0.0  ;;  %v715_v32 = vadd.f32 %v3592_v51, %v714_v25  ;;  %2795 = vmatprep.mubr.msk.f32.mxu1 %vm2860_vm0, %v2859_v0  ;;  %v943_v21 = vld [vmem:[%s4593_s2 + $0x100] sm:$0xff] }
 0x159   :  { %v2439_v37 = vpop.f32.mrf.mxu1  ;;  %v311_v39 = vpop.f32.mrf.mxu0  ;;  %2617 = vmatmul.mubr.f32.gmra.mxu0 %v940_v24 }
 0x15a   :  { %v842_v40 = vmax.f32 %v715_v32, 0.0  ;;  %v312_v41 = vadd.f32 %v3592_v51, %v311_v39  ;;  %2619 = vmatprep.mubr.msk.f32.mxu0 %vm2860_vm0, %v2859_v0 }
 0x15b   :  { %v719_v43 = vpop.f32.mrf.mxu1  ;;  %2796 = vmatmul.mubr.f32.gmra.mxu1 %v1397_v33  ;;  %v2263_v47 = vpop.f32.mrf.mxu0  ;;  %v1400_v33 = vld [vmem:[%s4594_s3 + $0x100] sm:$0xff] }
 0x15c   :  { %v4023_v48 = vmax.f32 %v434_v31, %v842_v40  ;;  %v435_v52 = vmax.f32 %v312_v41, 0.0  ;;  %v720_v53 = vadd.f32 %v3592_v51, %v719_v43  ;;  %2798 = vmatprep.mubr.msk.f32.mxu1 %vm2860_vm0, %v2859_v0 }
 0x15d   :  { %v2442_v56 = vpop.f32.mrf.mxu1  ;;  %v316_v57 = vpop.f32.mrf.mxu0  ;;  %2620 = vmatmul.mubr.f32.gmra.mxu0 %v941_v42  ;;  %v944_v42 = vld [vmem:[%s4593_s2 + $0x108] sm:$0xff] }
 0x15e   :  { %v843_v58 = vmax.f32 %v720_v53, 0.0  ;;  %v317_v62 = vadd.f32 %v3592_v51, %v316_v57  ;;  %2622 = vmatprep.mubr.msk.f32.mxu0 %vm2860_vm0, %v2859_v0  ;;  %v1401_v56 = vld [vmem:[%s4594_s3 + $0x108] sm:$0xff] }
 0x15f   :  { %v724_v3 = vpop.f32.mrf.mxu1  ;;  %2799 = vmatmul.mubr.f32.gmra.mxu1 %v1398_v55  ;;  %v2266_v4 = vpop.f32.mrf.mxu0 }
 0x160   :  { %v4037_v6 = vmax.f32 %v435_v52, %v843_v58  ;;  %v436_v7 = vmax.f32 %v317_v62, 0.0  ;;  %v725_v11 = vadd.f32 %v3592_v51, %v724_v3  ;;  %2801 = vmatprep.mubr.msk.f32.mxu1 %vm2860_vm0, %v2859_v0 }
 0x161   :  { %v2445_v14 = vpop.f32.mrf.mxu1  ;;  %v321_v17 = vpop.f32.mrf.mxu0  ;;  %2623 = vmatmul.mubr.f32.gmra.mxu0 %v942_v2  ;;  %v4076_v2 = vld [vmem:[%s4592_s5] ss:$0 sm:$0xff] }
 0x162   :  { %v844_v19 = vmax.f32 %v725_v11, 0.0  ;;  %v322_v20 = vadd.f32 %v3592_v51, %v321_v17  ;;  %2625 = vmatprep.mubr.msk.f32.mxu0 %vm2860_vm0, %v2859_v0  ;;  %v1402_v17 = vld [vmem:[%s4594_s3 + $0x110] sm:$0xff] }
 0x163   :  { %v729_v24 = vpop.f32.mrf.mxu1  ;;  %2802 = vmatmul.mubr.f32.gmra.mxu1 %v1399_v12  ;;  %v2269_v25 = vpop.f32.mrf.mxu0 }
 0x164   :  { %v4051_v26 = vmax.f32 %v436_v7, %v844_v19  ;;  %v437_v31 = vmax.f32 %v322_v20, 0.0  ;;  %v730_v32 = vadd.f32 %v3592_v51, %v729_v24  ;;  %2804 = vmatprep.mubr.msk.f32.mxu1 %vm2860_vm0, %v2859_v0  ;;  %v946_v25 = vld [vmem:[%s4593_s2 + $0x118] sm:$0xff] }
 0x165   :  { %v2448_v37 = vpop.f32.mrf.mxu1  ;;  %v326_v39 = vpop.f32.mrf.mxu0  ;;  %2626 = vmatmul.mubr.f32.gmra.mxu0 %v943_v21 }
 0x166   :  { %v845_v40 = vmax.f32 %v730_v32, 0.0  ;;  %v327_v41 = vadd.f32 %v3592_v51, %v326_v39  ;;  %2628 = vmatprep.mubr.msk.f32.mxu0 %vm2860_vm0, %v2859_v0 }
 0x167   :  { %v734_v43 = vpop.f32.mrf.mxu1  ;;  %2805 = vmatmul.mubr.f32.gmra.mxu1 %v1400_v33  ;;  %v2272_v47 = vpop.f32.mrf.mxu0 }
 0x168   :  { %v4065_v52 = vmax.f32 %v437_v31, %v845_v40  ;;  %v438_v53 = vmax.f32 %v327_v41, 0.0  ;;  %v735_v55 = vadd.f32 %v3592_v51, %v734_v43  ;;  %2807 = vmatprep.mubr.msk.f32.mxu1 %vm2860_vm0, %v2859_v0  ;;  %v945_v51 = vld [vmem:[%s4593_s2 + $0x110] sm:$0xff]  ;;  %v1403_v40 = vld [vmem:[%s4594_s3 + $0x118] sm:$0xff] }
 0x169   :  { %v2451_v57 = vpop.f32.mrf.mxu1  ;;  %v331_v58 = vpop.f32.mrf.mxu0  ;;  %2629 = vmatmul.mubr.f32.gmra.mxu0 %v944_v42 }
 0x16a   :  { %v846_v62 = vmax.f32 %v735_v55, 0.0  ;;  %v332_v3 = vadd.f32 %v4076_v2, %v331_v58  ;;  %2631 = vmatprep.mubr.msk.f32.mxu0 %vm2860_vm0, %v2859_v0 }
 0x16b   :  { %v739_v4 = vpop.f32.mrf.mxu1  ;;  %2808 = vmatmul.mubr.f32.gmra.mxu1 %v1401_v56  ;;  %v2275_v7 = vpop.f32.mrf.mxu0 }
 0x16c   :  { %v4084_v11 = vmax.f32 %v438_v53, %v846_v62  ;;  %v439_v12 = vmax.f32 %v332_v3, 0.0  ;;  %v740_v14 = vadd.f32 %v4076_v2, %v739_v4  ;;  %2810 = vmatprep.mubr.msk.f32.mxu1 %vm2860_vm0, %v2859_v0  ;;  %v947_v53 = vld [vmem:[%s4593_s2 + $0x120] sm:$0xff] }
 0x16d   :  { %v2454_v19 = vpop.f32.mrf.mxu1  ;;  %v336_v20 = vpop.f32.mrf.mxu0  ;;  %2632 = vmatmul.mubr.f32.gmra.mxu0 %v945_v51  ;;  %v1404_v3 = vld [vmem:[%s4594_s3 + $0x120] sm:$0xff] }
 0x16e   :  { %v847_v21 = vmax.f32 %v740_v14, 0.0  ;;  %v337_v24 = vadd.f32 %v4076_v2, %v336_v20  ;;  %2634 = vmatprep.mubr.msk.f32.mxu0 %vm2860_vm0, %v2859_v0  ;;  %v948_v14 = vld [vmem:[%s4593_s2 + $0x128] sm:$0xff] }
 0x16f   :  { %v744_v31 = vpop.f32.mrf.mxu1  ;;  %2811 = vmatmul.mubr.f32.gmra.mxu1 %v1402_v17  ;;  %v2278_v32 = vpop.f32.mrf.mxu0 }
 0x170   :  { %v4098_v33 = vmax.f32 %v439_v12, %v847_v21  ;;  %v440_v37 = vmax.f32 %v337_v24, 0.0  ;;  %v745_v39 = vadd.f32 %v4076_v2, %v744_v31  ;;  %2813 = vmatprep.mubr.msk.f32.mxu1 %vm2860_vm0, %v2859_v0 }
 0x171   :  { %v2457_v41 = vpop.f32.mrf.mxu1  ;;  %v341_v42 = vpop.f32.mrf.mxu0  ;;  %2635 = vmatmul.mubr.f32.gmra.mxu0 %v946_v25  ;;  %v1405_v25 = vld [vmem:[%s4594_s3 + $0x128] sm:$0xff] }
 0x172   :  { %v848_v43 = vmax.f32 %v745_v39, 0.0  ;;  %v342_v47 = vadd.f32 %v4076_v2, %v341_v42  ;;  %2637 = vmatprep.mubr.msk.f32.mxu0 %vm2860_vm0, %v2859_v0 }
 0x173   :  { %v749_v55 = vpop.f32.mrf.mxu1  ;;  %2814 = vmatmul.mubr.f32.gmra.mxu1 %v1403_v40  ;;  %v2281_v56 = vpop.f32.mrf.mxu0  ;;  %v949_v40 = vld [vmem:[%s4593_s2 + $0x130] sm:$0xff] }
 0x174   :  { %v4112_v57 = vmax.f32 %v440_v37, %v848_v43  ;;  %v441_v58 = vmax.f32 %v342_v47, 0.0  ;;  %v750_v62 = vadd.f32 %v4076_v2, %v749_v55  ;;  %2816 = vmatprep.mubr.msk.f32.mxu1 %vm2860_vm0, %v2859_v0  ;;  %v1406_v55 = vld [vmem:[%s4594_s3 + $0x130] sm:$0xff] }
 0x175   :  { %v2460_v51 = vpop.f32.mrf.mxu1  ;;  %v346_v4 = vpop.f32.mrf.mxu0  ;;  %2638 = vmatmul.mubr.f32.gmra.mxu0 %v947_v53 }
 0x176   :  { %v849_v7 = vmax.f32 %v750_v62, 0.0  ;;  %v347_v12 = vadd.f32 %v4076_v2, %v346_v4  ;;  %2640 = vmatprep.mubr.msk.f32.mxu0 %vm2860_vm0, %v2859_v0  ;;  %v950_v51 = vld [vmem:[%s4593_s2 + $0x138] sm:$0xff] }
 0x177   :  { %v754_v17 = vpop.f32.mrf.mxu1  ;;  %2817 = vmatmul.mubr.f32.gmra.mxu1 %v1404_v3  ;;  %v2284_v19 = vpop.f32.mrf.mxu0 }
 0x178   :  { %v4126_v20 = vmax.f32 %v441_v58, %v849_v7  ;;  %v442_v21 = vmax.f32 %v347_v12, 0.0  ;;  %v755_v24 = vadd.f32 %v4076_v2, %v754_v17  ;;  %2819 = vmatprep.mubr.msk.f32.mxu1 %vm2860_vm0, %v2859_v0  ;;  %v1407_v19 = vld [vmem:[%s4594_s3 + $0x138] sm:$0xff] }
 0x179   :  { %v2463_v31 = vpop.f32.mrf.mxu1  ;;  %v351_v32 = vpop.f32.mrf.mxu0  ;;  %2641 = vmatmul.mubr.f32.gmra.mxu0 %v948_v14 }
 0x17a   :  { %v850_v37 = vmax.f32 %v755_v24, 0.0  ;;  %v352_v39 = vadd.f32 %v4076_v2, %v351_v32  ;;  %2643 = vmatprep.mubr.msk.f32.mxu0 %vm2860_vm0, %v2859_v0  ;;  %v951_v32 = vld [vmem:[%s4593_s2 + $0x140] sm:$0xff] }
 0x17b   :  { %v759_v41 = vpop.f32.mrf.mxu1  ;;  %2820 = vmatmul.mubr.f32.gmra.mxu1 %v1405_v25  ;;  %v2287_v42 = vpop.f32.mrf.mxu0 }
 0x17c   :  { %v4140_v43 = vmax.f32 %v442_v21, %v850_v37  ;;  %v443_v47 = vmax.f32 %v352_v39, 0.0  ;;  %v760_v53 = vadd.f32 %v4076_v2, %v759_v41  ;;  %2822 = vmatprep.mubr.msk.f32.mxu1 %vm2860_vm0, %v2859_v0 }
 0x17d   :  { %v2466_v56 = vpop.f32.mrf.mxu1  ;;  %v356_v58 = vpop.f32.mrf.mxu0  ;;  %2644 = vmatmul.mubr.f32.gmra.mxu0 %v949_v40 }
 0x17e   :  { %v851_v62 = vmax.f32 %v760_v53, 0.0  ;;  %v357_v3 = vadd.f32 %v4076_v2, %v356_v58  ;;  %2646 = vmatprep.mubr.msk.f32.mxu0 %vm2860_vm0, %v2859_v0 }
 0x17f   :  { %v764_v4 = vpop.f32.mrf.mxu1  ;;  %2823 = vmatmul.mubr.f32.gmra.mxu1 %v1406_v55  ;;  %v2290_v7 = vpop.f32.mrf.mxu0 }
 0x180   :  { %v4154_v12 = vmax.f32 %v443_v47, %v851_v62  ;;  %v444_v14 = vmax.f32 %v357_v3, 0.0  ;;  %v765_v17 = vadd.f32 %v4076_v2, %v764_v4  ;;  %2825 = vmatprep.mubr.msk.f32.mxu1 %vm2860_vm0, %v2859_v0  ;;  %v1408_v47 = vld [vmem:[%s4594_s3 + $0x140] sm:$0xff]  ;;  %v952_v62 = vld [vmem:[%s4593_s2 + $0x148] sm:$0xff] }
 0x181   :  { %v2469_v21 = vpop.f32.mrf.mxu1  ;;  %v361_v24 = vpop.f32.mrf.mxu0  ;;  %2647 = vmatmul.mubr.f32.gmra.mxu0 %v950_v51 }
 0x182   :  { %v852_v25 = vmax.f32 %v765_v17, 0.0  ;;  %v362_v31 = vadd.f32 %v4076_v2, %v361_v24  ;;  %2649 = vmatprep.mubr.msk.f32.mxu0 %vm2860_vm0, %v2859_v0  ;;  %v1409_v17 = vld [vmem:[%s4594_s3 + $0x148] sm:$0xff] }
 0x183   :  { %v769_v37 = vpop.f32.mrf.mxu1  ;;  %2826 = vmatmul.mubr.f32.gmra.mxu1 %v1407_v19  ;;  %v2293_v39 = vpop.f32.mrf.mxu0 }
 0x184   :  { %v4168_v40 = vmax.f32 %v444_v14, %v852_v25  ;;  %v445_v41 = vmax.f32 %v362_v31, 0.0  ;;  %v770_v42 = vadd.f32 %v4076_v2, %v769_v37  ;;  %2828 = vmatprep.mubr.msk.f32.mxu1 %vm2860_vm0, %v2859_v0  ;;  %v953_v31 = vld [vmem:[%s4593_s2 + $0x150] sm:$0xff] }
 0x185   :  { %v2472_v53 = vpop.f32.mrf.mxu1  ;;  %v366_v55 = vpop.f32.mrf.mxu0  ;;  %2650 = vmatmul.mubr.f32.gmra.mxu0 %v951_v32 }
 0x186   :  { %v853_v56 = vmax.f32 %v770_v42, 0.0  ;;  %v367_v58 = vadd.f32 %v4076_v2, %v366_v55  ;;  %2652 = vmatprep.mubr.msk.f32.mxu0 %vm2860_vm0, %v2859_v0 }
 0x187   :  { %v774_v3 = vpop.f32.mrf.mxu1  ;;  %2829 = vmatmul.mubr.f32.gmra.mxu1 %v1408_v47  ;;  %v2296_v51 = vpop.f32.mrf.mxu0  ;;  %v1410_v47 = vld [vmem:[%s4594_s3 + $0x150] sm:$0xff] }
 0x188   :  { %v4182_v4 = vmax.f32 %v445_v41, %v853_v56  ;;  %v446_v7 = vmax.f32 %v367_v58, 0.0  ;;  %v775_v14 = vadd.f32 %v4076_v2, %v774_v3  ;;  %2831 = vmatprep.mubr.msk.f32.mxu1 %vm2860_vm0, %v2859_v0 }
 0x189   :  { %v2475_v19 = vpop.f32.mrf.mxu1  ;;  %v371_v21 = vpop.f32.mrf.mxu0  ;;  %2653 = vmatmul.mubr.f32.gmra.mxu0 %v952_v62  ;;  %v954_v62 = vld [vmem:[%s4593_s2 + $0x158] sm:$0xff] }
 0x18a   :  { %v854_v24 = vmax.f32 %v775_v14, 0.0  ;;  %v372_v25 = vadd.f32 %v4076_v2, %v371_v21  ;;  %2655 = vmatprep.mubr.msk.f32.mxu0 %vm2860_vm0, %v2859_v0  ;;  %v1411_v19 = vld [vmem:[%s4594_s3 + $0x158] sm:$0xff] }
 0x18b   :  { %v779_v32 = vpop.f32.mrf.mxu1  ;;  %2832 = vmatmul.mubr.f32.gmra.mxu1 %v1409_v17  ;;  %v2299_v37 = vpop.f32.mrf.mxu0 }
 0x18c   :  { %v4196_v39 = vmax.f32 %v446_v7, %v854_v24  ;;  %v447_v41 = vmax.f32 %v372_v25, 0.0  ;;  %v780_v42 = vadd.f32 %v4076_v2, %v779_v32  ;;  %2834 = vmatprep.mubr.msk.f32.mxu1 %vm2860_vm0, %v2859_v0  ;;  %v955_v32 = vld [vmem:[%s4593_s2 + $0x160] sm:$0xff] }
 0x18d   :  { %v2478_v53 = vpop.f32.mrf.mxu1  ;;  %v376_v55 = vpop.f32.mrf.mxu0  ;;  %2656 = vmatmul.mubr.f32.gmra.mxu0 %v953_v31 }
 0x18e   :  { %v855_v56 = vmax.f32 %v780_v42, 0.0  ;;  %v377_v58 = vadd.f32 %v4076_v2, %v376_v55  ;;  %2658 = vmatprep.mubr.msk.f32.mxu0 %vm2860_vm0, %v2859_v0  ;;  %v1412_v55 = vld [vmem:[%s4594_s3 + $0x160] sm:$0xff] }
 0x18f   :  { %v784_v3 = vpop.f32.mrf.mxu1  ;;  %2835 = vmatmul.mubr.f32.gmra.mxu1 %v1410_v47  ;;  %v2302_v51 = vpop.f32.mrf.mxu0 }
 0x190   :  { %v4210_v7 = vmax.f32 %v447_v41, %v855_v56  ;;  %v448_v14 = vmax.f32 %v377_v58, 0.0  ;;  %v785_v17 = vadd.f32 %v4076_v2, %v784_v3  ;;  %2837 = vmatprep.mubr.msk.f32.mxu1 %vm2860_vm0, %v2859_v0  ;;  %v956_v51 = vld [vmem:[%s4593_s2 + $0x168] sm:$0xff] }
 0x191   :  { %v2481_v21 = vpop.f32.mrf.mxu1  ;;  %v381_v24 = vpop.f32.mrf.mxu0  ;;  %2659 = vmatmul.mubr.f32.gmra.mxu0 %v954_v62 }
 0x192   :  { %v856_v25 = vmax.f32 %v785_v17, 0.0  ;;  %v382_v31 = vadd.f32 %v4076_v2, %v381_v24  ;;  %2661 = vmatprep.mubr.msk.f32.mxu0 %vm2860_vm0, %v2859_v0 }
 0x193   :  { %v789_v37 = vpop.f32.mrf.mxu1  ;;  %2838 = vmatmul.mubr.f32.gmra.mxu1 %v1411_v19  ;;  %v2305_v41 = vpop.f32.mrf.mxu0 }
 0x194   :  { %v4224_v42 = vmax.f32 %v448_v14, %v856_v25  ;;  %v449_v47 = vmax.f32 %v382_v31, 0.0  ;;  %v790_v53 = vadd.f32 %v4076_v2, %v789_v37  ;;  %2840 = vmatprep.mubr.msk.f32.mxu1 %vm2860_vm0, %v2859_v0  ;;  %v1413_v25 = vld [vmem:[%s4594_s3 + $0x168] sm:$0xff] }
 0x195   :  { %v2484_v56 = vpop.f32.mrf.mxu1  ;;  %v386_v58 = vpop.f32.mrf.mxu0  ;;  %2662 = vmatmul.mubr.f32.gmra.mxu0 %v955_v32 }
 0x196   :  { %v857_v62 = vmax.f32 %v790_v53, 0.0  ;;  %v387_v3 = vadd.f32 %v4076_v2, %v386_v58  ;;  %2664 = vmatprep.mubr.msk.f32.mxu0 %vm2860_vm0, %v2859_v0 }
 0x197   :  { %v794_v14 = vpop.f32.mrf.mxu1  ;;  %2841 = vmatmul.mubr.f32.gmra.mxu1 %v1412_v55  ;;  %v2308_v17 = vpop.f32.mrf.mxu0 }
 0x198   :  { %v4238_v19 = vmax.f32 %v449_v47, %v857_v62  ;;  %v450_v21 = vmax.f32 %v387_v3, 0.0  ;;  %v795_v24 = vadd.f32 %v4076_v2, %v794_v14  ;;  %2843 = vmatprep.mubr.msk.f32.mxu1 %vm2860_vm0, %v2859_v0  ;;  %v957_v47 = vld [vmem:[%s4593_s2 + $0x170] sm:$0xff] }
 0x199   :  { %v2487_v31 = vpop.f32.mrf.mxu1  ;;  %v391_v32 = vpop.f32.mrf.mxu0  ;;  %2665 = vmatmul.mubr.f32.gmra.mxu0 %v956_v51  ;;  %v1414_v3 = vld [vmem:[%s4594_s3 + $0x170] sm:$0xff] }
 0x19a   :  { %4596 = vst [vmem:[#allocation2_spill] sm:$0xff] %v4238_v19  ;;  %v858_v37 = vmax.f32 %v795_v24, 0.0  ;;  %v392_v41 = vadd.f32 %v4076_v2, %v391_v32  ;;  %2667 = vmatprep.mubr.msk.f32.mxu0 %vm2860_vm0, %v2859_v0 }
 0x19b   :  { %v799_v53 = vpop.f32.mrf.mxu1  ;;  %2844 = vmatmul.mubr.f32.gmra.mxu1 %v1413_v25  ;;  %v2311_v55 = vpop.f32.mrf.mxu0 }
 0x19c   :  { %v4252_v56 = vmax.f32 %v450_v21, %v858_v37  ;;  %v451_v58 = vmax.f32 %v392_v41, 0.0  ;;  %v800_v62 = vadd.f32 %v4076_v2, %v799_v53  ;;  %2846 = vmatprep.mubr.msk.f32.mxu1 %vm2860_vm0, %v2859_v0  ;;  %v958_v21 = vld [vmem:[%s4593_s2 + $0x178] sm:$0xff] }
 0x19d   :  { %v2490_v51 = vpop.f32.mrf.mxu1  ;;  %v396_v14 = vpop.f32.mrf.mxu0  ;;  %2668 = vmatmul.mubr.f32.gmra.mxu0 %v957_v47  ;;  %v1415_v47 = vld [vmem:[%s4594_s3 + $0x178] sm:$0xff] }
 0x19e   :  { %4597 = vst [vmem:[#allocation3_spill] sm:$0xff] %v4252_v56  ;;  %v859_v17 = vmax.f32 %v800_v62, 0.0  ;;  %v397_v24 = vadd.f32 %v4076_v2, %v396_v14  ;;  %2670 = vmatprep.mubr.msk.f32.mxu0 %vm2860_vm0, %v2859_v0 }
 0x19f   :  { %v804_v25 = vpop.f32.mrf.mxu1  ;;  %2847 = vmatmul.mubr.f32.gmra.mxu1 %v1414_v3  ;;  %v2314_v31 = vpop.f32.mrf.mxu0 }
 0x1a0   :  { %v4266_v32 = vmax.f32 %v451_v58, %v859_v17  ;;  %v452_v37 = vmax.f32 %v397_v24, 0.0  ;;  %v805_v41 = vadd.f32 %v4076_v2, %v804_v25  ;;  %2849 = vmatprep.mubr.msk.f32.mxu1 %vm2860_vm0, %v2859_v0  ;;  %v959_v58 = vld [vmem:[%s4593_s2 + $0x180] sm:$0xff] }
 0x1a1   :  { %v2493_v53 = vpop.f32.mrf.mxu1  ;;  %v401_v55 = vpop.f32.mrf.mxu0  ;;  %2671 = vmatmul.mubr.f32.gmra.mxu0 %v958_v21  ;;  %v1416_v21 = vld [vmem:[%s4594_s3 + $0x180] sm:$0xff] }
 0x1a2   :  { %4598 = vst [vmem:[#allocation4_spill] sm:$0xff] %v4266_v32  ;;  %v860_v62 = vmax.f32 %v805_v41, 0.0  ;;  %v402_v51 = vadd.f32 %v4076_v2, %v401_v55  ;;  %2673 = vmatprep.mubr.msk.f32.mxu0 %vm2860_vm0, %v2859_v0 }
 0x1a3   :  { %v809_v3 = vpop.f32.mrf.mxu1  ;;  %2850 = vmatmul.mubr.f32.gmra.mxu1 %v1415_v47  ;;  %v2317_v14 = vpop.f32.mrf.mxu0 }
 0x1a4   :  { %v4280_v17 = vmax.f32 %v452_v37, %v860_v62  ;;  %v453_v24 = vmax.f32 %v402_v51, 0.0  ;;  %v810_v25 = vadd.f32 %v4076_v2, %v809_v3  ;;  %2852 = vmatprep.mubr.msk.f32.mxu1 %vm2860_vm0, %v2859_v0 }
 0x1a5   :  { %v2496_v31 = vpop.f32.mrf.mxu1  ;;  %v1026_v41 = vpop.f32.mrf.mxu0  ;;  %2674 = vmatmul.mubr.f32.gmra.mxu0 %v959_v58 }
 0x1a6   :  { %4599 = vst [vmem:[#allocation5_spill] sm:$0xff] %v4280_v17  ;;  %v861_v53 = vmax.f32 %v810_v25, 0.0  ;;  %v1027_v55 = vadd.f32 %v4076_v2, %v1026_v41 }
 0x1a7   :  { %v1483_v47 = vpop.f32.mrf.mxu1  ;;  %2853 = vmatmul.mubr.f32.gmra.mxu1 %v1416_v21  ;;  %v2531_v37 = vpop.f32.mrf.mxu0 }
 0x1a8   :  { %v4289_v62 = vmax.f32 %v453_v24, %v861_v53  ;;  %v1270_v51 = vmax.f32 %v1027_v55, 0.0  ;;  %v1484_v3 = vadd.f32 %v4076_v2, %v1483_v47 }
 0x1a9   :  { %v2710_v14 = vpop.f32.mrf.mxu1  ;;  %v1031_v0 = vpop.f32.mrf.mxu0 }
 0x1aa   :  { %v1319_v17 = vmax.f32 %v3617_v5, %v1270_v51  ;;  %v1727_v32 = vmax.f32 %v1484_v3, 0.0  ;;  %v1032_v31 = vadd.f32 %v4076_v2, %v1031_v0 }
 0x1ab   :  { %v1488_v56 = vpop.f32.mrf.mxu1  ;;  %v2534_v58 = vpop.f32.mrf.mxu0 }
 0x1ac   :  { %v1776_v25 = vmax.f32 %v1319_v17, %v1727_v32  ;;  %v1271_v19 = vmax.f32 %v1032_v31, 0.0  ;;  %v1489_v41 = vadd.f32 %v4076_v2, %v1488_v56 }
 0x1ad   :  { %v2713_v21 = vpop.f32.mrf.mxu1  ;;  %v1036_v37 = vpop.f32.mrf.mxu0 }
 0x1ae   :  { %1825 = vst [vmem:[%s4595_s6] sm:$0xff] %v1776_v25  ;;  %v1320_v24 = vmax.f32 %v3631_v16, %v1271_v19  ;;  %v1728_v53 = vmax.f32 %v1489_v41, 0.0  ;;  %v1037_v5 = vadd.f32 %v4076_v2, %v1036_v37 }
 0x1af   :  { %v1493_v55 = vpop.f32.mrf.mxu1  ;;  %v2537_v47 = vpop.f32.mrf.mxu0 }
 0x1b0   :  { %v1777_v51 = vmax.f32 %v1320_v24, %v1728_v53  ;;  %v1272_v3 = vmax.f32 %v1037_v5, 0.0  ;;  %v1494_v32 = vadd.f32 %v4076_v2, %v1493_v55 }
 0x1b1   :  { %v2716_v17 = vpop.f32.mrf.mxu1  ;;  %v1041_v14 = vpop.f32.mrf.mxu0 }
 0x1b2   :  { %1826 = vst [vmem:[%s4595_s6 + $0x8] sm:$0xff] %v1777_v51  ;;  %v1321_v56 = vmax.f32 %v3645_v27, %v1272_v3  ;;  %v1729_v0 = vmax.f32 %v1494_v32, 0.0  ;;  %v1042_v16 = vadd.f32 %v4076_v2, %v1041_v14 }
 0x1b3   :  { %v1498_v19 = vpop.f32.mrf.mxu1  ;;  %v2540_v31 = vpop.f32.mrf.mxu0 }
 0x1b4   :  { %v1778_v58 = vmax.f32 %v1321_v56, %v1729_v0  ;;  %v1273_v25 = vmax.f32 %v1042_v16, 0.0  ;;  %v1499_v41 = vadd.f32 %v4076_v2, %v1498_v19 }
 0x1b5   :  { %v2719_v21 = vpop.f32.mrf.mxu1  ;;  %v1046_v37 = vpop.f32.mrf.mxu0 }
 0x1b6   :  { %1827 = vst [vmem:[%s4595_s6 + $0x10] sm:$0xff] %v1778_v58  ;;  %v1322_v24 = vmax.f32 %v3659_v38, %v1273_v25  ;;  %v1730_v53 = vmax.f32 %v1499_v41, 0.0  ;;  %v1047_v27 = vadd.f32 %v4076_v2, %v1046_v37 }
 0x1b7   :  { %v1503_v5 = vpop.f32.mrf.mxu1  ;;  %v2543_v55 = vpop.f32.mrf.mxu0 }
 0x1b8   :  { %v1779_v47 = vmax.f32 %v1322_v24, %v1730_v53  ;;  %v1274_v51 = vmax.f32 %v1047_v27, 0.0  ;;  %v1504_v3 = vadd.f32 %v4076_v2, %v1503_v5 }
 0x1b9   :  { %v2722_v32 = vpop.f32.mrf.mxu1  ;;  %v1051_v17 = vpop.f32.mrf.mxu0 }
 0x1ba   :  { %1828 = vst [vmem:[%s4595_s6 + $0x18] sm:$0xff] %v1779_v47  ;;  %v1323_v14 = vmax.f32 %v3673_v49, %v1274_v51  ;;  %v1731_v56 = vmax.f32 %v1504_v3, 0.0  ;;  %v1052_v38 = vadd.f32 %v4076_v2, %v1051_v17 }
 0x1bb   :  { %v1508_v0 = vpop.f32.mrf.mxu1  ;;  %v2546_v16 = vpop.f32.mrf.mxu0 }
 0x1bc   :  { %v1780_v19 = vmax.f32 %v1323_v14, %v1731_v56  ;;  %v1275_v31 = vmax.f32 %v1052_v38, 0.0  ;;  %v1509_v58 = vadd.f32 %v4076_v2, %v1508_v0 }
 0x1bd   :  { %v2725_v25 = vpop.f32.mrf.mxu1  ;;  %v1056_v41 = vpop.f32.mrf.mxu0 }
 0x1be   :  { %1829 = vst [vmem:[%s4595_s6 + $0x20] sm:$0xff] %v1780_v19  ;;  %v1324_v21 = vmax.f32 %v3687_v61, %v1275_v31  ;;  %v1732_v37 = vmax.f32 %v1509_v58, 0.0  ;;  %v1057_v49 = vadd.f32 %v4076_v2, %v1056_v41 }
 0x1bf   :  { %v1513_v24 = vpop.f32.mrf.mxu1  ;;  %v2549_v53 = vpop.f32.mrf.mxu0 }
 0x1c0   :  { %v1781_v27 = vmax.f32 %v1324_v21, %v1732_v37  ;;  %v1276_v5 = vmax.f32 %v1057_v49, 0.0  ;;  %v1514_v55 = vadd.f32 %v4076_v2, %v1513_v24 }
 0x1c1   :  { %v2728_v47 = vpop.f32.mrf.mxu1  ;;  %v1061_v51 = vpop.f32.mrf.mxu0 }
 0x1c2   :  { %1830 = vst [vmem:[%s4595_s6 + $0x28] sm:$0xff] %v1781_v27  ;;  %v1325_v3 = vmax.f32 %v3701_v10, %v1276_v5  ;;  %v1733_v32 = vmax.f32 %v1514_v55, 0.0  ;;  %v1062_v61 = vadd.f32 %v4076_v2, %v1061_v51 }
 0x1c3   :  { %v1518_v17 = vpop.f32.mrf.mxu1  ;;  %v2552_v14 = vpop.f32.mrf.mxu0 }
 0x1c4   :  { %v1782_v56 = vmax.f32 %v1325_v3, %v1733_v32  ;;  %v1277_v38 = vmax.f32 %v1062_v61, 0.0  ;;  %v1519_v0 = vadd.f32 %v4076_v2, %v1518_v17 }
 0x1c5   :  { %v2731_v16 = vpop.f32.mrf.mxu1  ;;  %v1066_v19 = vpop.f32.mrf.mxu0 }
 0x1c6   :  { %1831 = vst [vmem:[%s4595_s6 + $0x30] sm:$0xff] %v1782_v56  ;;  %v1326_v31 = vmax.f32 %v3715_v22, %v1277_v38  ;;  %v1734_v58 = vmax.f32 %v1519_v0, 0.0  ;;  %v1067_v10 = vadd.f32 %v4076_v2, %v1066_v19 }
 0x1c7   :  { %v1523_v25 = vpop.f32.mrf.mxu1  ;;  %v2555_v41 = vpop.f32.mrf.mxu0 }
 0x1c8   :  { %v1783_v21 = vmax.f32 %v1326_v31, %v1734_v58  ;;  %v1278_v37 = vmax.f32 %v1067_v10, 0.0  ;;  %v1524_v49 = vadd.f32 %v4076_v2, %v1523_v25 }
 0x1c9   :  { %v2734_v24 = vpop.f32.mrf.mxu1  ;;  %v1071_v53 = vpop.f32.mrf.mxu0 }
 0x1ca   :  { %1832 = vst [vmem:[%s4595_s6 + $0x38] sm:$0xff] %v1783_v21  ;;  %v1327_v27 = vmax.f32 %v3729_v34, %v1278_v37  ;;  %v1735_v5 = vmax.f32 %v1524_v49, 0.0  ;;  %v1072_v22 = vadd.f32 %v4076_v2, %v1071_v53 }
 0x1cb   :  { %v1528_v55 = vpop.f32.mrf.mxu1  ;;  %v2558_v47 = vpop.f32.mrf.mxu0 }
 0x1cc   :  { %v1784_v51 = vmax.f32 %v1327_v27, %v1735_v5  ;;  %v1279_v3 = vmax.f32 %v1072_v22, 0.0  ;;  %v1529_v32 = vadd.f32 %v4076_v2, %v1528_v55 }
 0x1cd   :  { %v2737_v61 = vpop.f32.mrf.mxu1  ;;  %v1076_v17 = vpop.f32.mrf.mxu0 }
 0x1ce   :  { %1833 = vst [vmem:[%s4595_s6 + $0x40] sm:$0xff] %v1784_v51  ;;  %v1328_v14 = vmax.f32 %v3743_v46, %v1279_v3  ;;  %v1736_v56 = vmax.f32 %v1529_v32, 0.0  ;;  %v1077_v34 = vadd.f32 %v4076_v2, %v1076_v17 }
 0x1cf   :  { %v1533_v38 = vpop.f32.mrf.mxu1  ;;  %v2561_v0 = vpop.f32.mrf.mxu0 }
 0x1d0   :  { %v1785_v16 = vmax.f32 %v1328_v14, %v1736_v56  ;;  %v1280_v19 = vmax.f32 %v1077_v34, 0.0  ;;  %v1534_v31 = vadd.f32 %v4076_v2, %v1533_v38 }
 0x1d1   :  { %v2740_v58 = vpop.f32.mrf.mxu1  ;;  %v1081_v10 = vpop.f32.mrf.mxu0 }
 0x1d2   :  { %1834 = vst [vmem:[%s4595_s6 + $0x48] sm:$0xff] %v1785_v16  ;;  %v1329_v25 = vmax.f32 %v3757_v59, %v1280_v19  ;;  %v1737_v41 = vmax.f32 %v1534_v31, 0.0  ;;  %v1082_v46 = vadd.f32 %v4076_v2, %v1081_v10 }
 0x1d3   :  { %v1538_v21 = vpop.f32.mrf.mxu1  ;;  %v2564_v37 = vpop.f32.mrf.mxu0 }
 0x1d4   :  { %v1786_v49 = vmax.f32 %v1329_v25, %v1737_v41  ;;  %v1281_v24 = vmax.f32 %v1082_v46, 0.0  ;;  %v1539_v53 = vadd.f32 %v4076_v2, %v1538_v21 }
 0x1d5   :  { %v2743_v27 = vpop.f32.mrf.mxu1  ;;  %v1086_v5 = vpop.f32.mrf.mxu0 }
 0x1d6   :  { %1835 = vst [vmem:[%s4595_s6 + $0x50] sm:$0xff] %v1786_v49  ;;  %v1330_v22 = vmax.f32 %v3771_v9, %v1281_v24  ;;  %v1738_v55 = vmax.f32 %v1539_v53, 0.0  ;;  %v1087_v59 = vadd.f32 %v4076_v2, %v1086_v5 }
 0x1d7   :  { %v1543_v47 = vpop.f32.mrf.mxu1  ;;  %v2567_v51 = vpop.f32.mrf.mxu0 }
 0x1d8   :  { %v1787_v3 = vmax.f32 %v1330_v22, %v1738_v55  ;;  %v1282_v32 = vmax.f32 %v1087_v59, 0.0  ;;  %v1544_v61 = vadd.f32 %v4076_v2, %v1543_v47 }
 0x1d9   :  { %v2746_v17 = vpop.f32.mrf.mxu1  ;;  %v1091_v14 = vpop.f32.mrf.mxu0 }
 0x1da   :  { %1836 = vst [vmem:[%s4595_s6 + $0x58] sm:$0xff] %v1787_v3  ;;  %v1331_v56 = vmax.f32 %v3785_v23, %v1282_v32  ;;  %v1739_v34 = vmax.f32 %v1544_v61, 0.0  ;;  %v1092_v9 = vadd.f32 %v4076_v2, %v1091_v14 }
 0x1db   :  { %v1548_v38 = vpop.f32.mrf.mxu1  ;;  %v2570_v0 = vpop.f32.mrf.mxu0 }
 0x1dc   :  { %v1788_v16 = vmax.f32 %v1331_v56, %v1739_v34  ;;  %v1283_v19 = vmax.f32 %v1092_v9, 0.0  ;;  %v1549_v31 = vadd.f32 %v4076_v2, %v1548_v38 }
 0x1dd   :  { %v2749_v58 = vpop.f32.mrf.mxu1  ;;  %v1096_v10 = vpop.f32.mrf.mxu0 }
 0x1de   :  { %1837 = vst [vmem:[%s4595_s6 + $0x60] sm:$0xff] %v1788_v16  ;;  %v1332_v25 = vmax.f32 %v3799_v36, %v1283_v19  ;;  %v1740_v41 = vmax.f32 %v1549_v31, 0.0  ;;  %v1097_v23 = vadd.f32 %v4076_v2, %v1096_v10 }
 0x1df   :  { %v1553_v46 = vpop.f32.mrf.mxu1  ;;  %v2573_v21 = vpop.f32.mrf.mxu0 }
 0x1e0   :  { %v1789_v37 = vmax.f32 %v1332_v25, %v1740_v41  ;;  %v1284_v49 = vmax.f32 %v1097_v23, 0.0  ;;  %v1554_v24 = vadd.f32 %v4076_v2, %v1553_v46 }
 0x1e1   :  { %v2752_v53 = vpop.f32.mrf.mxu1  ;;  %v1101_v27 = vpop.f32.mrf.mxu0 }
 0x1e2   :  { %1838 = vst [vmem:[%s4595_s6 + $0x68] sm:$0xff] %v1789_v37  ;;  %v1333_v5 = vmax.f32 %v3813_v50, %v1284_v49  ;;  %v1741_v22 = vmax.f32 %v1554_v24, 0.0  ;;  %v1102_v36 = vadd.f32 %v4076_v2, %v1101_v27 }
 0x1e3   :  { %v1558_v55 = vpop.f32.mrf.mxu1  ;;  %v2576_v59 = vpop.f32.mrf.mxu0 }
 0x1e4   :  { %v1790_v47 = vmax.f32 %v1333_v5, %v1741_v22  ;;  %v1285_v51 = vmax.f32 %v1102_v36, 0.0  ;;  %v1559_v3 = vadd.f32 %v4076_v2, %v1558_v55 }
 0x1e5   :  { %v2755_v32 = vpop.f32.mrf.mxu1  ;;  %v1106_v61 = vpop.f32.mrf.mxu0 }
 0x1e6   :  { %1839 = vst [vmem:[%s4595_s6 + $0x70] sm:$0xff] %v1790_v47  ;;  %v1334_v17 = vmax.f32 %v3827_v1, %v1285_v51  ;;  %v1742_v14 = vmax.f32 %v1559_v3, 0.0  ;;  %v1107_v50 = vadd.f32 %v4076_v2, %v1106_v61 }
 0x1e7   :  { %v1563_v56 = vpop.f32.mrf.mxu1  ;;  %v2579_v34 = vpop.f32.mrf.mxu0 }
 0x1e8   :  { %v1791_v9 = vmax.f32 %v1334_v17, %v1742_v14  ;;  %v1286_v38 = vmax.f32 %v1107_v50, 0.0  ;;  %v1564_v0 = vadd.f32 %v4076_v2, %v1563_v56 }
 0x1e9   :  { %v2758_v16 = vpop.f32.mrf.mxu1  ;;  %v1111_v19 = vpop.f32.mrf.mxu0 }
 0x1ea   :  { %1840 = vst [vmem:[%s4595_s6 + $0x78] sm:$0xff] %v1791_v9  ;;  %v1335_v31 = vmax.f32 %v3841_v15, %v1286_v38  ;;  %v1743_v58 = vmax.f32 %v1564_v0, 0.0  ;;  %v1112_v1 = vadd.f32 %v4076_v2, %v1111_v19 }
 0x1eb   :  { %v1568_v10 = vpop.f32.mrf.mxu1  ;;  %v2582_v25 = vpop.f32.mrf.mxu0 }
 0x1ec   :  { %v1792_v41 = vmax.f32 %v1335_v31, %v1743_v58  ;;  %v1287_v23 = vmax.f32 %v1112_v1, 0.0  ;;  %v1569_v46 = vadd.f32 %v4076_v2, %v1568_v10 }
 0x1ed   :  { %v2761_v21 = vpop.f32.mrf.mxu1  ;;  %v1116_v37 = vpop.f32.mrf.mxu0 }
 0x1ee   :  { %1841 = vst [vmem:[%s4595_s6 + $0x80] sm:$0xff] %v1792_v41  ;;  %v1336_v49 = vmax.f32 %v3855_v30, %v1287_v23  ;;  %v1744_v24 = vmax.f32 %v1569_v46, 0.0  ;;  %v1117_v15 = vadd.f32 %v4076_v2, %v1116_v37 }
 0x1ef   :  { %v1573_v53 = vpop.f32.mrf.mxu1  ;;  %v2585_v27 = vpop.f32.mrf.mxu0 }
 0x1f0   :  { %v1793_v5 = vmax.f32 %v1336_v49, %v1744_v24  ;;  %v1288_v22 = vmax.f32 %v1117_v15, 0.0  ;;  %v1574_v36 = vadd.f32 %v4076_v2, %v1573_v53 }
 0x1f1   :  { %v2764_v55 = vpop.f32.mrf.mxu1  ;;  %v1121_v59 = vpop.f32.mrf.mxu0 }
 0x1f2   :  { %1842 = vst [vmem:[%s4595_s6 + $0x88] sm:$0xff] %v1793_v5  ;;  %v1337_v47 = vmax.f32 %v3869_v44, %v1288_v22  ;;  %v1745_v51 = vmax.f32 %v1574_v36, 0.0  ;;  %v1122_v30 = vadd.f32 %v4076_v2, %v1121_v59 }
 0x1f3   :  { %v1578_v3 = vpop.f32.mrf.mxu1  ;;  %v2588_v32 = vpop.f32.mrf.mxu0 }
 0x1f4   :  { %v1794_v61 = vmax.f32 %v1337_v47, %v1745_v51  ;;  %v1289_v17 = vmax.f32 %v1122_v30, 0.0  ;;  %v1579_v14 = vadd.f32 %v4076_v2, %v1578_v3 }
 0x1f5   :  { %v2767_v50 = vpop.f32.mrf.mxu1  ;;  %v1126_v56 = vpop.f32.mrf.mxu0 }
 0x1f6   :  { %1843 = vst [vmem:[%s4595_s6 + $0x90] sm:$0xff] %v1794_v61  ;;  %v1338_v34 = vmax.f32 %v3883_v60, %v1289_v17  ;;  %v1746_v9 = vmax.f32 %v1579_v14, 0.0  ;;  %v1127_v44 = vadd.f32 %v4076_v2, %v1126_v56 }
 0x1f7   :  { %v1583_v38 = vpop.f32.mrf.mxu1  ;;  %v2591_v0 = vpop.f32.mrf.mxu0 }
 0x1f8   :  { %v1795_v16 = vmax.f32 %v1338_v34, %v1746_v9  ;;  %v1290_v19 = vmax.f32 %v1127_v44, 0.0  ;;  %v1584_v31 = vadd.f32 %v4076_v2, %v1583_v38 }
 0x1f9   :  { %v2770_v58 = vpop.f32.mrf.mxu1  ;;  %v1131_v1 = vpop.f32.mrf.mxu0 }
 0x1fa   :  { %1844 = vst [vmem:[%s4595_s6 + $0x98] sm:$0xff] %v1795_v16  ;;  %v1339_v10 = vmax.f32 %v3897_v13, %v1290_v19  ;;  %v1747_v25 = vmax.f32 %v1584_v31, 0.0  ;;  %v1132_v60 = vadd.f32 %v4076_v2, %v1131_v1 }
 0x1fb   :  { %v1588_v41 = vpop.f32.mrf.mxu1  ;;  %v2594_v23 = vpop.f32.mrf.mxu0 }
 0x1fc   :  { %v1796_v46 = vmax.f32 %v1339_v10, %v1747_v25  ;;  %v1291_v21 = vmax.f32 %v1132_v60, 0.0  ;;  %v1589_v37 = vadd.f32 %v4076_v2, %v1588_v41 }
 0x1fd   :  { %v2773_v49 = vpop.f32.mrf.mxu1  ;;  %v1136_v24 = vpop.f32.mrf.mxu0 }
 0x1fe   :  { %1845 = vst [vmem:[%s4595_s6 + $0xa0] sm:$0xff] %v1796_v46  ;;  %v1340_v15 = vmax.f32 %v3911_v29, %v1291_v21  ;;  %v1748_v53 = vmax.f32 %v1589_v37, 0.0  ;;  %v1137_v13 = vadd.f32 %v4076_v2, %v1136_v24 }
 0x1ff   :  { %v1593_v27 = vpop.f32.mrf.mxu1  ;;  %v2597_v5 = vpop.f32.mrf.mxu0 }
 0x200   :  { %v1797_v22 = vmax.f32 %v1340_v15, %v1748_v53  ;;  %v1292_v36 = vmax.f32 %v1137_v13, 0.0  ;;  %v1594_v55 = vadd.f32 %v4076_v2, %v1593_v27 }
 0x201   :  { %v2776_v59 = vpop.f32.mrf.mxu1  ;;  %v1141_v47 = vpop.f32.mrf.mxu0 }
 0x202   :  { %1846 = vst [vmem:[%s4595_s6 + $0xa8] sm:$0xff] %v1797_v22  ;;  %v1341_v51 = vmax.f32 %v3925_v45, %v1292_v36  ;;  %v1749_v30 = vmax.f32 %v1594_v55, 0.0  ;;  %v1142_v29 = vadd.f32 %v4076_v2, %v1141_v47 }
 0x203   :  { %v1598_v3 = vpop.f32.mrf.mxu1  ;;  %v2600_v32 = vpop.f32.mrf.mxu0 }
 0x204   :  { %v1798_v61 = vmax.f32 %v1341_v51, %v1749_v30  ;;  %v1293_v17 = vmax.f32 %v1142_v29, 0.0  ;;  %v1599_v14 = vadd.f32 %v4076_v2, %v1598_v3 }
 0x205   :  { %v2779_v50 = vpop.f32.mrf.mxu1  ;;  %v1146_v56 = vpop.f32.mrf.mxu0 }
 0x206   :  { %1847 = vst [vmem:[%s4595_s6 + $0xb0] sm:$0xff] %v1798_v61  ;;  %v1342_v34 = vmax.f32 %v3939_v63, %v1293_v17  ;;  %v1750_v9 = vmax.f32 %v1599_v14, 0.0  ;;  %v1147_v45 = vadd.f32 %v4076_v2, %v1146_v56 }
 0x207   :  { %v1603_v44 = vpop.f32.mrf.mxu1  ;;  %v2603_v38 = vpop.f32.mrf.mxu0 }
 0x208   :  { %v1799_v0 = vmax.f32 %v1342_v34, %v1750_v9  ;;  %v1294_v16 = vmax.f32 %v1147_v45, 0.0  ;;  %v1604_v19 = vadd.f32 %v4076_v2, %v1603_v44 }
 0x209   :  { %v2782_v31 = vpop.f32.mrf.mxu1  ;;  %v1151_v58 = vpop.f32.mrf.mxu0 }
 0x20a   :  { %1848 = vst [vmem:[%s4595_s6 + $0xb8] sm:$0xff] %v1799_v0  ;;  %v1343_v1 = vmax.f32 %v3953_v18, %v1294_v16  ;;  %v1751_v10 = vmax.f32 %v1604_v19, 0.0  ;;  %v1152_v63 = vadd.f32 %v4076_v2, %v1151_v58  ;;  %v4446_v18 = vld [vmem:[%s4592_s5] ss:$0 sm:$0xff] }
 0x20b   :  { %v1608_v25 = vpop.f32.mrf.mxu1  ;;  %v2606_v60 = vpop.f32.mrf.mxu0 }
 0x20c   :  { %v1800_v41 = vmax.f32 %v1343_v1, %v1751_v10  ;;  %v1295_v23 = vmax.f32 %v1152_v63, 0.0  ;;  %v1609_v46 = vadd.f32 %v4076_v2, %v1608_v25 }
 0x20d   :  { %v2785_v21 = vpop.f32.mrf.mxu1  ;;  %v1156_v37 = vpop.f32.mrf.mxu0 }
 0x20e   :  { %1849 = vst [vmem:[%s4595_s6 + $0xc0] sm:$0xff] %v1800_v41  ;;  %v1344_v49 = vmax.f32 %v3967_v35, %v1295_v23  ;;  %v1752_v24 = vmax.f32 %v1609_v46, 0.0  ;;  %v1157_v15 = vadd.f32 %v4446_v18, %v1156_v37 }
 0x20f   :  { %v1613_v53 = vpop.f32.mrf.mxu1  ;;  %v2609_v13 = vpop.f32.mrf.mxu0 }
 0x210   :  { %v1801_v27 = vmax.f32 %v1344_v49, %v1752_v24  ;;  %v1296_v2 = vmax.f32 %v1157_v15, 0.0  ;;  %v1614_v5 = vadd.f32 %v4446_v18, %v1613_v53 }
 0x211   :  { %v2788_v22 = vpop.f32.mrf.mxu1  ;;  %v1161_v36 = vpop.f32.mrf.mxu0 }
 0x212   :  { %1850 = vst [vmem:[%s4595_s6 + $0xc8] sm:$0xff] %v1801_v27  ;;  %v1345_v35 = vmax.f32 %v3981_v54, %v1296_v2  ;;  %v1753_v55 = vmax.f32 %v1614_v5, 0.0  ;;  %v1162_v59 = vadd.f32 %v4446_v18, %v1161_v36 }
 0x213   :  { %v1618_v47 = vpop.f32.mrf.mxu1  ;;  %v2612_v51 = vpop.f32.mrf.mxu0 }
 0x214   :  { %v1802_v30 = vmax.f32 %v1345_v35, %v1753_v55  ;;  %v1297_v29 = vmax.f32 %v1162_v59, 0.0  ;;  %v1619_v3 = vadd.f32 %v4446_v18, %v1618_v47 }
 0x215   :  { %v2791_v32 = vpop.f32.mrf.mxu1  ;;  %v1166_v61 = vpop.f32.mrf.mxu0 }
 0x216   :  { %1851 = vst [vmem:[%s4595_s6 + $0xd0] sm:$0xff] %v1802_v30  ;;  %v1346_v17 = vmax.f32 %v3995_v8, %v1297_v29  ;;  %v1754_v14 = vmax.f32 %v1619_v3, 0.0  ;;  %v1167_v54 = vadd.f32 %v4446_v18, %v1166_v61 }
 0x217   :  { %v1623_v50 = vpop.f32.mrf.mxu1  ;;  %v2615_v56 = vpop.f32.mrf.mxu0 }
 0x218   :  { %v1803_v34 = vmax.f32 %v1346_v17, %v1754_v14  ;;  %v1298_v9 = vmax.f32 %v1167_v54, 0.0  ;;  %v1624_v45 = vadd.f32 %v4446_v18, %v1623_v50 }
 0x219   :  { %v2794_v44 = vpop.f32.mrf.mxu1  ;;  %v1171_v38 = vpop.f32.mrf.mxu0 }
 0x21a   :  { %1852 = vst [vmem:[%s4595_s6 + $0xd8] sm:$0xff] %v1803_v34  ;;  %v1347_v0 = vmax.f32 %v4009_v28, %v1298_v9  ;;  %v1755_v16 = vmax.f32 %v1624_v45, 0.0  ;;  %v1172_v8 = vadd.f32 %v4446_v18, %v1171_v38 }
 0x21b   :  { %v1628_v19 = vpop.f32.mrf.mxu1  ;;  %v2618_v31 = vpop.f32.mrf.mxu0 }
 0x21c   :  { %v1804_v58 = vmax.f32 %v1347_v0, %v1755_v16  ;;  %v1299_v1 = vmax.f32 %v1172_v8, 0.0  ;;  %v1629_v10 = vadd.f32 %v4446_v18, %v1628_v19 }
 0x21d   :  { %v2797_v63 = vpop.f32.mrf.mxu1  ;;  %v1176_v25 = vpop.f32.mrf.mxu0 }
 0x21e   :  { %1853 = vst [vmem:[%s4595_s6 + $0xe0] sm:$0xff] %v1804_v58  ;;  %v1348_v60 = vmax.f32 %v4023_v48, %v1299_v1  ;;  %v1756_v41 = vmax.f32 %v1629_v10, 0.0  ;;  %v1177_v28 = vadd.f32 %v4446_v18, %v1176_v25 }
 0x21f   :  { %v1633_v23 = vpop.f32.mrf.mxu1  ;;  %v2621_v46 = vpop.f32.mrf.mxu0 }
 0x220   :  { %v1805_v21 = vmax.f32 %v1348_v60, %v1756_v41  ;;  %v1300_v37 = vmax.f32 %v1177_v28, 0.0  ;;  %v1634_v49 = vadd.f32 %v4446_v18, %v1633_v23 }
 0x221   :  { %v2800_v24 = vpop.f32.mrf.mxu1  ;;  %v1181_v15 = vpop.f32.mrf.mxu0 }
 0x222   :  { %1854 = vst [vmem:[%s4595_s6 + $0xe8] sm:$0xff] %v1805_v21  ;;  %v1349_v53 = vmax.f32 %v4037_v6, %v1300_v37  ;;  %v1757_v13 = vmax.f32 %v1634_v49, 0.0  ;;  %v1182_v48 = vadd.f32 %v4446_v18, %v1181_v15 }
 0x223   :  { %v1638_v27 = vpop.f32.mrf.mxu1  ;;  %v2624_v2 = vpop.f32.mrf.mxu0 }
 0x224   :  { %v1806_v5 = vmax.f32 %v1349_v53, %v1757_v13  ;;  %v1301_v22 = vmax.f32 %v1182_v48, 0.0  ;;  %v1639_v36 = vadd.f32 %v4446_v18, %v1638_v27 }
 0x225   :  { %v2803_v35 = vpop.f32.mrf.mxu1  ;;  %v1186_v55 = vpop.f32.mrf.mxu0 }
 0x226   :  { %1855 = vst [vmem:[%s4595_s6 + $0xf0] sm:$0xff] %v1806_v5  ;;  %v1350_v59 = vmax.f32 %v4051_v26, %v1301_v22  ;;  %v1758_v47 = vmax.f32 %v1639_v36, 0.0  ;;  %v1187_v6 = vadd.f32 %v4446_v18, %v1186_v55 }
 0x227   :  { %v1643_v51 = vpop.f32.mrf.mxu1  ;;  %v2627_v30 = vpop.f32.mrf.mxu0 }
 0x228   :  { %v1807_v29 = vmax.f32 %v1350_v59, %v1758_v47  ;;  %v1302_v3 = vmax.f32 %v1187_v6, 0.0  ;;  %v1644_v32 = vadd.f32 %v4446_v18, %v1643_v51 }
 0x229   :  { %v2806_v61 = vpop.f32.mrf.mxu1  ;;  %v1191_v17 = vpop.f32.mrf.mxu0 }
 0x22a   :  { %1856 = vst [vmem:[%s4595_s6 + $0xf8] sm:$0xff] %v1807_v29  ;;  %v1351_v14 = vmax.f32 %v4065_v52, %v1302_v3  ;;  %v1759_v54 = vmax.f32 %v1644_v32, 0.0  ;;  %v1192_v26 = vadd.f32 %v4446_v18, %v1191_v17 }
 0x22b   :  { %v1648_v50 = vpop.f32.mrf.mxu1  ;;  %v2630_v56 = vpop.f32.mrf.mxu0 }
 0x22c   :  { %v1808_v34 = vmax.f32 %v1351_v14, %v1759_v54  ;;  %v1303_v9 = vmax.f32 %v1192_v26, 0.0  ;;  %v1649_v45 = vadd.f32 %v4446_v18, %v1648_v50 }
 0x22d   :  { %v2809_v44 = vpop.f32.mrf.mxu1  ;;  %v1196_v38 = vpop.f32.mrf.mxu0 }
 0x22e   :  { %1857 = vst [vmem:[%s4595_s6 + $0x100] sm:$0xff] %v1808_v34  ;;  %v1352_v0 = vmax.f32 %v4084_v11, %v1303_v9  ;;  %v1760_v16 = vmax.f32 %v1649_v45, 0.0  ;;  %v1197_v52 = vadd.f32 %v4446_v18, %v1196_v38 }
 0x22f   :  { %v1653_v8 = vpop.f32.mrf.mxu1  ;;  %v2633_v19 = vpop.f32.mrf.mxu0 }
 0x230   :  { %v1809_v31 = vmax.f32 %v1352_v0, %v1760_v16  ;;  %v1304_v58 = vmax.f32 %v1197_v52, 0.0  ;;  %v1654_v1 = vadd.f32 %v4446_v18, %v1653_v8 }
 0x231   :  { %v2812_v10 = vpop.f32.mrf.mxu1  ;;  %v1201_v63 = vpop.f32.mrf.mxu0 }
 0x232   :  { %1858 = vst [vmem:[%s4595_s6 + $0x108] sm:$0xff] %v1809_v31  ;;  %v1353_v25 = vmax.f32 %v4098_v33, %v1304_v58  ;;  %v1761_v60 = vmax.f32 %v1654_v1, 0.0  ;;  %v1202_v11 = vadd.f32 %v4446_v18, %v1201_v63 }
 0x233   :  { %v1658_v41 = vpop.f32.mrf.mxu1  ;;  %v2636_v28 = vpop.f32.mrf.mxu0 }
 0x234   :  { %v1810_v23 = vmax.f32 %v1353_v25, %v1761_v60  ;;  %v1305_v46 = vmax.f32 %v1202_v11, 0.0  ;;  %v1659_v21 = vadd.f32 %v4446_v18, %v1658_v41 }
 0x235   :  { %v2815_v37 = vpop.f32.mrf.mxu1  ;;  %v1206_v49 = vpop.f32.mrf.mxu0 }
 0x236   :  { %1859 = vst [vmem:[%s4595_s6 + $0x110] sm:$0xff] %v1810_v23  ;;  %v1354_v24 = vmax.f32 %v4112_v57, %v1305_v46  ;;  %v1762_v15 = vmax.f32 %v1659_v21, 0.0  ;;  %v1207_v33 = vadd.f32 %v4446_v18, %v1206_v49 }
 0x237   :  { %v1663_v53 = vpop.f32.mrf.mxu1  ;;  %v2639_v13 = vpop.f32.mrf.mxu0 }
 0x238   :  { %v1811_v48 = vmax.f32 %v1354_v24, %v1762_v15  ;;  %v1306_v27 = vmax.f32 %v1207_v33, 0.0  ;;  %v1664_v2 = vadd.f32 %v4446_v18, %v1663_v53 }
 0x239   :  { %v2818_v5 = vpop.f32.mrf.mxu1  ;;  %v1211_v22 = vpop.f32.mrf.mxu0 }
 0x23a   :  { %1860 = vst [vmem:[%s4595_s6 + $0x118] sm:$0xff] %v1811_v48  ;;  %v1355_v36 = vmax.f32 %v4126_v20, %v1306_v27  ;;  %v1763_v35 = vmax.f32 %v1664_v2, 0.0  ;;  %v1212_v57 = vadd.f32 %v4446_v18, %v1211_v22 }
 0x23b   :  { %v1668_v55 = vpop.f32.mrf.mxu1  ;;  %v2642_v59 = vpop.f32.mrf.mxu0 }
 0x23c   :  { %v1812_v47 = vmax.f32 %v1355_v36, %v1763_v35  ;;  %v1307_v6 = vmax.f32 %v1212_v57, 0.0  ;;  %v1669_v51 = vadd.f32 %v4446_v18, %v1668_v55 }
 0x23d   :  { %v2821_v30 = vpop.f32.mrf.mxu1  ;;  %v1216_v29 = vpop.f32.mrf.mxu0 }
 0x23e   :  { %1861 = vst [vmem:[%s4595_s6 + $0x120] sm:$0xff] %v1812_v47  ;;  %v1356_v3 = vmax.f32 %v4140_v43, %v1307_v6  ;;  %v1764_v32 = vmax.f32 %v1669_v51, 0.0  ;;  %v1217_v20 = vadd.f32 %v4446_v18, %v1216_v29 }
 0x23f   :  { %v1673_v61 = vpop.f32.mrf.mxu1  ;;  %v2645_v17 = vpop.f32.mrf.mxu0 }
 0x240   :  { %v1813_v14 = vmax.f32 %v1356_v3, %v1764_v32  ;;  %v1308_v54 = vmax.f32 %v1217_v20, 0.0  ;;  %v1674_v26 = vadd.f32 %v4446_v18, %v1673_v61 }
 0x241   :  { %v2824_v50 = vpop.f32.mrf.mxu1  ;;  %v1221_v56 = vpop.f32.mrf.mxu0 }
 0x242   :  { %1862 = vst [vmem:[%s4595_s6 + $0x128] sm:$0xff] %v1813_v14  ;;  %v1357_v34 = vmax.f32 %v4154_v12, %v1308_v54  ;;  %v1765_v9 = vmax.f32 %v1674_v26, 0.0  ;;  %v1222_v43 = vadd.f32 %v4446_v18, %v1221_v56  ;;  %v4600_v56 = vld [vmem:[#allocation2_spill] sm:$0xff] }
 0x243   :  { %v1678_v45 = vpop.f32.mrf.mxu1  ;;  %v2648_v44 = vpop.f32.mrf.mxu0 }
 0x244   :  { %v1814_v38 = vmax.f32 %v1357_v34, %v1765_v9  ;;  %v1309_v0 = vmax.f32 %v1222_v43, 0.0  ;;  %v1679_v16 = vadd.f32 %v4446_v18, %v1678_v45 }
 0x245   :  { %v2827_v52 = vpop.f32.mrf.mxu1  ;;  %v1226_v8 = vpop.f32.mrf.mxu0 }
 0x246   :  { %1863 = vst [vmem:[%s4595_s6 + $0x130] sm:$0xff] %v1814_v38  ;;  %v1358_v19 = vmax.f32 %v4168_v40, %v1309_v0  ;;  %v1766_v31 = vmax.f32 %v1679_v16, 0.0  ;;  %v1227_v12 = vadd.f32 %v4446_v18, %v1226_v8  ;;  %v4601_v8 = vld [vmem:[#allocation3_spill] sm:$0xff] }
 0x247   :  { %v1683_v58 = vpop.f32.mrf.mxu1  ;;  %v2651_v1 = vpop.f32.mrf.mxu0 }
 0x248   :  { %v1815_v10 = vmax.f32 %v1358_v19, %v1766_v31  ;;  %v1310_v63 = vmax.f32 %v1227_v12, 0.0  ;;  %v1684_v25 = vadd.f32 %v4446_v18, %v1683_v58 }
 0x249   :  { %v2830_v60 = vpop.f32.mrf.mxu1  ;;  %v1231_v11 = vpop.f32.mrf.mxu0 }
 0x24a   :  { %1864 = vst [vmem:[%s4595_s6 + $0x138] sm:$0xff] %v1815_v10  ;;  %v1359_v41 = vmax.f32 %v4182_v4, %v1310_v63  ;;  %v1767_v28 = vmax.f32 %v1684_v25, 0.0  ;;  %v1232_v40 = vadd.f32 %v4446_v18, %v1231_v11 }
 0x24b   :  { %v1688_v23 = vpop.f32.mrf.mxu1  ;;  %v2654_v46 = vpop.f32.mrf.mxu0 }
 0x24c   :  { %v1816_v21 = vmax.f32 %v1359_v41, %v1767_v28  ;;  %v1311_v37 = vmax.f32 %v1232_v40, 0.0  ;;  %v1689_v49 = vadd.f32 %v4446_v18, %v1688_v23  ;;  %v4602_v41 = vld [vmem:[#allocation4_spill] sm:$0xff] }
 0x24d   :  { %v2833_v24 = vpop.f32.mrf.mxu1  ;;  %v1236_v15 = vpop.f32.mrf.mxu0 }
 0x24e   :  { %1865 = vst [vmem:[%s4595_s6 + $0x140] sm:$0xff] %v1816_v21  ;;  %v1360_v33 = vmax.f32 %v4196_v39, %v1311_v37  ;;  %v1768_v53 = vmax.f32 %v1689_v49, 0.0  ;;  %v1237_v4 = vadd.f32 %v4446_v18, %v1236_v15 }
 0x24f   :  { %v1693_v13 = vpop.f32.mrf.mxu1  ;;  %v2657_v48 = vpop.f32.mrf.mxu0 }
 0x250   :  { %v1817_v27 = vmax.f32 %v1360_v33, %v1768_v53  ;;  %v1312_v2 = vmax.f32 %v1237_v4, 0.0  ;;  %v1694_v5 = vadd.f32 %v4446_v18, %v1693_v13  ;;  %v4603_v53 = vld [vmem:[#allocation5_spill] sm:$0xff] }
 0x251   :  { %v2836_v22 = vpop.f32.mrf.mxu1  ;;  %v1241_v36 = vpop.f32.mrf.mxu0 }
 0x252   :  { %1866 = vst [vmem:[%s4595_s6 + $0x148] sm:$0xff] %v1817_v27  ;;  %v1361_v35 = vmax.f32 %v4210_v7, %v1312_v2  ;;  %v1769_v57 = vmax.f32 %v1694_v5, 0.0  ;;  %v1242_v39 = vadd.f32 %v4446_v18, %v1241_v36 }
 0x253   :  { %v1698_v55 = vpop.f32.mrf.mxu1  ;;  %v2660_v59 = vpop.f32.mrf.mxu0 }
 0x254   :  { %v1818_v47 = vmax.f32 %v1361_v35, %v1769_v57  ;;  %v1313_v6 = vmax.f32 %v1242_v39, 0.0  ;;  %v1699_v51 = vadd.f32 %v4446_v18, %v1698_v55 }
 0x255   :  { %v2839_v30 = vpop.f32.mrf.mxu1  ;;  %v1246_v29 = vpop.f32.mrf.mxu0 }
 0x256   :  { %1867 = vst [vmem:[%s4595_s6 + $0x150] sm:$0xff] %v1818_v47  ;;  %v1362_v3 = vmax.f32 %v4224_v42, %v1313_v6  ;;  %v1770_v32 = vmax.f32 %v1699_v51, 0.0  ;;  %v1247_v7 = vadd.f32 %v4446_v18, %v1246_v29 }
 0x257   :  { %v1703_v20 = vpop.f32.mrf.mxu1  ;;  %v2663_v61 = vpop.f32.mrf.mxu0 }
 0x258   :  { %v1819_v17 = vmax.f32 %v1362_v3, %v1770_v32  ;;  %v1314_v14 = vmax.f32 %v1247_v7, 0.0  ;;  %v1704_v54 = vadd.f32 %v4446_v18, %v1703_v20 }
 0x259   :  { %v2842_v26 = vpop.f32.mrf.mxu1  ;;  %v1251_v50 = vpop.f32.mrf.mxu0 }
 0x25a   :  { %1868 = vst [vmem:[%s4595_s6 + $0x158] sm:$0xff] %v1819_v17  ;;  %v1363_v34 = vmax.f32 %v4600_v56, %v1314_v14  ;;  %v1771_v9 = vmax.f32 %v1704_v54, 0.0  ;;  %v1252_v42 = vadd.f32 %v4446_v18, %v1251_v50 }
 0x25b   :  { %v1708_v43 = vpop.f32.mrf.mxu1  ;;  %v2666_v45 = vpop.f32.mrf.mxu0 }
 0x25c   :  { %v1820_v44 = vmax.f32 %v1363_v34, %v1771_v9  ;;  %v1315_v38 = vmax.f32 %v1252_v42, 0.0  ;;  %v1709_v0 = vadd.f32 %v4446_v18, %v1708_v43 }
 0x25d   :  { %v2845_v16 = vpop.f32.mrf.mxu1  ;;  %v1256_v52 = vpop.f32.mrf.mxu0 }
 0x25e   :  { %1869 = vst [vmem:[%s4595_s6 + $0x160] sm:$0xff] %v1820_v44  ;;  %v1364_v19 = vmax.f32 %v4601_v8, %v1315_v38  ;;  %v1772_v31 = vmax.f32 %v1709_v0, 0.0  ;;  %v1257_v12 = vadd.f32 %v4446_v18, %v1256_v52 }
 0x25f   :  { %v1713_v58 = vpop.f32.mrf.mxu1  ;;  %v2669_v1 = vpop.f32.mrf.mxu0 }
 0x260   :  { %v1821_v10 = vmax.f32 %v1364_v19, %v1772_v31  ;;  %v1316_v63 = vmax.f32 %v1257_v12, 0.0  ;;  %v1714_v25 = vadd.f32 %v4446_v18, %v1713_v58 }
 0x261   :  { %v2848_v60 = vpop.f32.mrf.mxu1  ;;  %v1261_v11 = vpop.f32.mrf.mxu0 }
 0x262   :  { %1870 = vst [vmem:[%s4595_s6 + $0x168] sm:$0xff] %v1821_v10  ;;  %v1365_v28 = vmax.f32 %v4602_v41, %v1316_v63  ;;  %v1773_v40 = vmax.f32 %v1714_v25, 0.0  ;;  %v1262_v23 = vadd.f32 %v4446_v18, %v1261_v11 }
 0x263   :  { %v1718_v46 = vpop.f32.mrf.mxu1  ;;  %v2672_v21 = vpop.f32.mrf.mxu0 }
 0x264   :  { %v1822_v37 = vmax.f32 %v1365_v28, %v1773_v40  ;;  %v1317_v49 = vmax.f32 %v1262_v23, 0.0  ;;  %v1719_v24 = vadd.f32 %v4446_v18, %v1718_v46 }
 0x265   :  { %v2851_v15 = vpop.f32.mrf.mxu1  ;;  %v1266_v33 = vpop.f32.mrf.mxu0 }
 0x266   :  { %1871 = vst [vmem:[%s4595_s6 + $0x170] sm:$0xff] %v1822_v37  ;;  %v1366_v4 = vmax.f32 %v4603_v53, %v1317_v49  ;;  %v1774_v13 = vmax.f32 %v1719_v24, 0.0  ;;  %v1267_v48 = vadd.f32 %v4446_v18, %v1266_v33 }
 0x267   :  { %v1723_v27 = vpop.f32.mrf.mxu1  ;;  %v2675_v2 = vpop.f32.mrf.mxu0 }
 0x268   :  { %v1823_v5 = vmax.f32 %v1366_v4, %v1774_v13  ;;  %v1318_v22 = vmax.f32 %v1267_v48, 0.0  ;;  %v1724_v36 = vadd.f32 %v4446_v18, %v1723_v27 }
 0x269   :  { %v2854_v35 = vpop.f32.mrf.mxu1 }
 0x26a   :  { %1872 = vst [vmem:[%s4595_s6 + $0x178] sm:$0xff] %v1823_v5  ;;  %v1367_v57 = vmax.f32 %v4289_v62, %v1318_v22  ;;  %v1775_v39 = vmax.f32 %v1724_v36, 0.0 }
 0x26c   :  { %v1824_v55 = vmax.f32 %v1367_v57, %v1775_v39 }
 0x26e   :  { %1873 = vst [vmem:[%s4595_s6 + $0x180] sm:$0xff] %v1824_v55 }

// kernel: net_forward.4
= control target key start
LH: loop header
LB: loop body
LE: loop exit
PB: predicated region body
PF: predicated region fallthrough
CT: control target
= control target key end

     0   :  { %s1360_s4 = inlined_call_operand.vmem [shape: f32[256,128], index: 4, kind: input, shape index: {}]   ;;  %s1361_s0 = inlined_call_operand.vmem [shape: f32[56,256], index: 0, kind: input, shape index: {}]   ;;  %s1362_s1 = inlined_call_operand.vmem [shape: f32[56,256], index: 1, kind: input, shape index: {}]   ;;  %s1363_s2 = inlined_call_operand.vmem [shape: f32[56,256], index: 2, kind: input, shape index: {}]   ;;  %s1364_s3 = inlined_call_operand.vmem [shape: f32[56,256], index: 3, kind: input, shape index: {}]   ;;  %s1365_s5 = inlined_call_operand.vmem [shape: f32[1,128], index: 5, kind: input, shape index: {}]   ;;  %s1366_s6 = inlined_call_operand.vmem [shape: f32[56,128], index: 6, kind: output, shape index: {}]  }
   0x1   :  { %v829_v0 = vld [vmem:[%s1360_s4 + $0xf8] sm:$0xff]  ;;  %v839_v2 = vld [vmem:[%s1360_s4 + $0xf0] sm:$0xff]  ;;  %v853_v4 = vld [vmem:[%s1360_s4 + $0xe8] sm:$0xff] }
   0x2   :  { %v834_v1 = vld [vmem:[%s1360_s4 + $0x78] sm:$0xff]  ;;  %579 = vmatprep.subr.mxu0 %v829_v0  ;;  %632 = vmatprep.subr.mxu1 %v829_v0  ;;  %v846_v3 = vld [vmem:[%s1360_s4 + $0x70] sm:$0xff]  ;;  %v860_v5 = vld [vmem:[%s1360_s4 + $0x68] sm:$0xff] }
   0x3   :  { %580 = vmatpush3.msra.mxu0 %v834_v1  ;;  %633 = vmatpush3.msra.mxu1 %v834_v1  ;;  %v867_v6 = vld [vmem:[%s1360_s4 + $0xe0] sm:$0xff]  ;;  %v881_v8 = vld [vmem:[%s1360_s4 + $0xd8] sm:$0xff]  ;;  %v895_v10 = vld [vmem:[%s1360_s4 + $0xd0] sm:$0xff] }
   0x4   :  { %581 = vmatprep.subr.mxu0 %v839_v2  ;;  %634 = vmatprep.subr.mxu1 %v839_v2  ;;  %v874_v7 = vld [vmem:[%s1360_s4 + $0x60] sm:$0xff]  ;;  %v888_v9 = vld [vmem:[%s1360_s4 + $0x58] sm:$0xff]  ;;  %v902_v11 = vld [vmem:[%s1360_s4 + $0x50] sm:$0xff] }
   0x5   :  { %582 = vmatpush3.msra.mxu0 %v846_v3  ;;  %635 = vmatpush3.msra.mxu1 %v846_v3  ;;  %v909_v12 = vld [vmem:[%s1360_s4 + $0xc8] sm:$0xff]  ;;  %v923_v14 = vld [vmem:[%s1360_s4 + $0xc0] sm:$0xff]  ;;  %v937_v16 = vld [vmem:[%s1360_s4 + $0xb8] sm:$0xff] }
   0x6   :  { %583 = vmatprep.subr.mxu0 %v853_v4  ;;  %636 = vmatprep.subr.mxu1 %v853_v4  ;;  %v916_v13 = vld [vmem:[%s1360_s4 + $0x48] sm:$0xff]  ;;  %v930_v15 = vld [vmem:[%s1360_s4 + $0x40] sm:$0xff]  ;;  %v944_v17 = vld [vmem:[%s1360_s4 + $0x38] sm:$0xff] }
   0x7   :  { %584 = vmatpush3.msra.mxu0 %v860_v5  ;;  %637 = vmatpush3.msra.mxu1 %v860_v5  ;;  %v951_v18 = vld [vmem:[%s1360_s4 + $0xb0] sm:$0xff]  ;;  %v965_v20 = vld [vmem:[%s1360_s4 + $0xa8] sm:$0xff]  ;;  %v979_v22 = vld [vmem:[%s1360_s4 + $0xa0] sm:$0xff] }
   0x8   :  { %585 = vmatprep.subr.mxu0 %v867_v6  ;;  %638 = vmatprep.subr.mxu1 %v867_v6  ;;  %v958_v19 = vld [vmem:[%s1360_s4 + $0x30] sm:$0xff]  ;;  %v972_v21 = vld [vmem:[%s1360_s4 + $0x28] sm:$0xff]  ;;  %v986_v23 = vld [vmem:[%s1360_s4 + $0x20] sm:$0xff] }
   0x9   :  { %586 = vmatpush3.msra.mxu0 %v874_v7  ;;  %639 = vmatpush3.msra.mxu1 %v874_v7  ;;  %v993_v24 = vld [vmem:[%s1360_s4 + $0x98] sm:$0xff]  ;;  %v1007_v26 = vld [vmem:[%s1360_s4 + $0x90] sm:$0xff]  ;;  %v1021_v28 = vld [vmem:[%s1360_s4 + $0x88] sm:$0xff] }
   0xa   :  { %587 = vmatprep.subr.mxu0 %v881_v8  ;;  %640 = vmatprep.subr.mxu1 %v881_v8  ;;  %v1000_v25 = vld [vmem:[%s1360_s4 + $0x18] sm:$0xff]  ;;  %v1014_v27 = vld [vmem:[%s1360_s4 + $0x10] sm:$0xff]  ;;  %v1028_v29 = vld [vmem:[%s1360_s4 + $0x8] sm:$0xff] }
   0xb   :  { %588 = vmatpush3.msra.mxu0 %v888_v9  ;;  %641 = vmatpush3.msra.mxu1 %v888_v9  ;;  %v1035_v30 = vld [vmem:[%s1360_s4 + $0x80] sm:$0xff]  ;;  %v57_v32 = vld [vmem:[%s1361_s0 + $0x8] sm:$0xff]  ;;  %v59_v36 = vld [vmem:[%s1361_s0 + $0x18] sm:$0xff] }
   0xc   :  { %589 = vmatprep.subr.mxu0 %v895_v10  ;;  %642 = vmatprep.subr.mxu1 %v895_v10  ;;  %v1042_v31 = vld [vmem:[%s1360_s4] sm:$0xff]  ;;  %v184_v33 = vld [vmem:[%s1362_s1 + $0x8] sm:$0xff]  ;;  %v186_v37 = vld [vmem:[%s1362_s1 + $0x18] sm:$0xff] }
   0xd   :  { %590 = vmatpush3.msra.mxu0 %v902_v11  ;;  %643 = vmatpush3.msra.mxu1 %v902_v11  ;;  %v56_v34 = vld [vmem:[%s1361_s0] sm:$0xff]  ;;  %v58_v38 = vld [vmem:[%s1361_s0 + $0x10] sm:$0xff]  ;;  %v61_v40 = vld [vmem:[%s1361_s0 + $0x28] sm:$0xff] }
   0xe   :  { %591 = vmatprep.subr.mxu0 %v909_v12  ;;  %644 = vmatprep.subr.mxu1 %v909_v12  ;;  %v183_v35 = vld [vmem:[%s1362_s1] sm:$0xff]  ;;  %v185_v39 = vld [vmem:[%s1362_s1 + $0x10] sm:$0xff]  ;;  %v188_v41 = vld [vmem:[%s1362_s1 + $0x28] sm:$0xff] }
   0xf   :  { %592 = vmatpush3.msra.mxu0 %v916_v13  ;;  %645 = vmatpush3.msra.mxu1 %v916_v13  ;;  %v60_v42 = vld [vmem:[%s1361_s0 + $0x20] sm:$0xff]  ;;  %v63_v44 = vld [vmem:[%s1361_s0 + $0x38] sm:$0xff]  ;;  %v62_v46 = vld [vmem:[%s1361_s0 + $0x30] sm:$0xff] }
  0x10   :  { %593 = vmatprep.subr.mxu0 %v923_v14  ;;  %646 = vmatprep.subr.mxu1 %v923_v14  ;;  %v187_v43 = vld [vmem:[%s1362_s1 + $0x20] sm:$0xff]  ;;  %v190_v45 = vld [vmem:[%s1362_s1 + $0x38] sm:$0xff]  ;;  %v189_v47 = vld [vmem:[%s1362_s1 + $0x30] sm:$0xff] }
  0x11   :  { %594 = vmatpush3.msra.mxu0 %v930_v15  ;;  %647 = vmatpush3.msra.mxu1 %v930_v15  ;;  %v65_v48 = vld [vmem:[%s1361_s0 + $0x48] sm:$0xff]  ;;  %v64_v50 = vld [vmem:[%s1361_s0 + $0x40] sm:$0xff]  ;;  %v67_v52 = vld [vmem:[%s1361_s0 + $0x58] sm:$0xff] }
  0x12   :  { %595 = vmatprep.subr.mxu0 %v937_v16  ;;  %648 = vmatprep.subr.mxu1 %v937_v16  ;;  %v192_v49 = vld [vmem:[%s1362_s1 + $0x48] sm:$0xff]  ;;  %v191_v51 = vld [vmem:[%s1362_s1 + $0x40] sm:$0xff]  ;;  %v194_v53 = vld [vmem:[%s1362_s1 + $0x58] sm:$0xff] }
  0x13   :  { %596 = vmatpush3.msra.mxu0 %v944_v17  ;;  %649 = vmatpush3.msra.mxu1 %v944_v17  ;;  %v66_v54 = vld [vmem:[%s1361_s0 + $0x50] sm:$0xff]  ;;  %v69_v56 = vld [vmem:[%s1361_s0 + $0x68] sm:$0xff]  ;;  %v68_v58 = vld [vmem:[%s1361_s0 + $0x60] sm:$0xff] }
  0x14   :  { %597 = vmatprep.subr.mxu0 %v951_v18  ;;  %650 = vmatprep.subr.mxu1 %v951_v18  ;;  %v193_v55 = vld [vmem:[%s1362_s1 + $0x50] sm:$0xff]  ;;  %v196_v57 = vld [vmem:[%s1362_s1 + $0x68] sm:$0xff]  ;;  %v195_v59 = vld [vmem:[%s1362_s1 + $0x60] sm:$0xff] }
  0x15   :  { %598 = vmatpush3.msra.mxu0 %v958_v19  ;;  %651 = vmatpush3.msra.mxu1 %v958_v19  ;;  %v312_v60 = vld [vmem:[%s1363_s2 + $0x8] sm:$0xff]  ;;  %v311_v62 = vld [vmem:[%s1363_s2] sm:$0xff] }
  0x16   :  { %599 = vmatprep.subr.mxu0 %v965_v20  ;;  %652 = vmatprep.subr.mxu1 %v965_v20  ;;  %v440_v61 = vld [vmem:[%s1364_s3 + $0x8] sm:$0xff]  ;;  %v439_v63 = vld [vmem:[%s1364_s3] sm:$0xff] }
  0x17   :  { %600 = vmatpush3.msra.mxu0 %v972_v21  ;;  %653 = vmatpush3.msra.mxu1 %v972_v21 }
  0x18   :  { %601 = vmatprep.subr.mxu0 %v979_v22  ;;  %654 = vmatprep.subr.mxu1 %v979_v22 }
  0x19   :  { %602 = vmatpush3.msra.mxu0 %v986_v23  ;;  %655 = vmatpush3.msra.mxu1 %v986_v23 }
  0x1a   :  { %603 = vmatprep.subr.mxu0 %v993_v24  ;;  %656 = vmatprep.subr.mxu1 %v993_v24 }
  0x1b   :  { %604 = vmatpush3.msra.mxu0 %v1000_v25  ;;  %657 = vmatpush3.msra.mxu1 %v1000_v25 }
  0x1c   :  { %605 = vmatprep.subr.mxu0 %v1007_v26  ;;  %658 = vmatprep.subr.mxu1 %v1007_v26 }
  0x1d   :  { %606 = vmatpush3.msra.mxu0 %v1014_v27  ;;  %659 = vmatpush3.msra.mxu1 %v1014_v27 }
  0x1e   :  { %607 = vmatprep.subr.mxu0 %v1021_v28  ;;  %660 = vmatprep.subr.mxu1 %v1021_v28 }
  0x1f   :  { %608 = vmatpush3.msra.mxu0 %v1028_v29  ;;  %661 = vmatpush3.msra.mxu1 %v1028_v29 }
  0x20   :  { %609 = vmatprep.subr.mxu0 %v1035_v30  ;;  %662 = vmatprep.subr.mxu1 %v1035_v30 }
  0x21   :  { %610 = vmatpush3.msra.mxu0 %v1042_v31  ;;  %140 = vmatprep.mubr.f32.mxu0 %v57_v32 }
  0x22   :  { %663 = vmatpush3.msra.mxu1 %v1042_v31  ;;  %261 = vmatprep.mubr.f32.mxu1 %v184_v33 }
  0x23   :  { %141 = vmatmul.mubr.f32.vlgmr.msra.gmra.mxu0 %v56_v34  ;;  %262 = vmatmul.mubr.f32.vlgmr.msra.gmra.mxu1 %v183_v35 }
  0x24   :  { %685 = vmatprep.subr.mxu0 %v829_v0  ;;  %738 = vmatprep.subr.mxu1 %v829_v0  ;;  %v314_v0 = vld [vmem:[%s1363_s2 + $0x18] sm:$0xff] }
  0x25   :  { %686 = vmatpush3.msra.mxu0 %v834_v1  ;;  %739 = vmatpush3.msra.mxu1 %v834_v1  ;;  %v442_v1 = vld [vmem:[%s1364_s3 + $0x18] sm:$0xff] }
  0x26   :  { %687 = vmatprep.subr.mxu0 %v839_v2  ;;  %740 = vmatprep.subr.mxu1 %v839_v2  ;;  %v313_v2 = vld [vmem:[%s1363_s2 + $0x10] sm:$0xff] }
  0x27   :  { %688 = vmatpush3.msra.mxu0 %v846_v3  ;;  %741 = vmatpush3.msra.mxu1 %v846_v3  ;;  %v441_v3 = vld [vmem:[%s1364_s3 + $0x10] sm:$0xff] }
  0x28   :  { %689 = vmatprep.subr.mxu0 %v853_v4  ;;  %742 = vmatprep.subr.mxu1 %v853_v4  ;;  %v316_v4 = vld [vmem:[%s1363_s2 + $0x28] sm:$0xff] }
  0x29   :  { %145 = vmatprep.mubr.f32.mxu0 %v59_v36  ;;  %266 = vmatprep.mubr.f32.mxu1 %v186_v37 }
  0x2a   :  { %690 = vmatpush3.msra.mxu0 %v860_v5  ;;  %743 = vmatpush3.msra.mxu1 %v860_v5  ;;  %v444_v5 = vld [vmem:[%s1364_s3 + $0x28] sm:$0xff] }
  0x2b   :  { %146 = vmatmul.mubr.f32.gmra.mxu0 %v58_v38  ;;  %267 = vmatmul.mubr.f32.gmra.mxu1 %v185_v39 }
  0x2c   :  { %691 = vmatprep.subr.mxu0 %v867_v6  ;;  %744 = vmatprep.subr.mxu1 %v867_v6  ;;  %v315_v6 = vld [vmem:[%s1363_s2 + $0x20] sm:$0xff] }
  0x2d   :  { %692 = vmatpush3.msra.mxu0 %v874_v7  ;;  %745 = vmatpush3.msra.mxu1 %v874_v7  ;;  %v443_v7 = vld [vmem:[%s1364_s3 + $0x20] sm:$0xff] }
  0x2e   :  { %693 = vmatprep.subr.mxu0 %v881_v8  ;;  %746 = vmatprep.subr.mxu1 %v881_v8  ;;  %v318_v8 = vld [vmem:[%s1363_s2 + $0x38] sm:$0xff] }
  0x2f   :  { %150 = vmatprep.mubr.f32.mxu0 %v61_v40  ;;  %271 = vmatprep.mubr.f32.mxu1 %v188_v41 }
  0x30   :  { %694 = vmatpush3.msra.mxu0 %v888_v9  ;;  %747 = vmatpush3.msra.mxu1 %v888_v9  ;;  %v446_v9 = vld [vmem:[%s1364_s3 + $0x38] sm:$0xff] }
  0x31   :  { %151 = vmatmul.mubr.f32.gmra.mxu0 %v60_v42  ;;  %272 = vmatmul.mubr.f32.gmra.mxu1 %v187_v43 }
  0x32   :  { %695 = vmatprep.subr.mxu0 %v895_v10  ;;  %748 = vmatprep.subr.mxu1 %v895_v10  ;;  %v317_v10 = vld [vmem:[%s1363_s2 + $0x30] sm:$0xff] }
  0x33   :  { %696 = vmatpush3.msra.mxu0 %v902_v11  ;;  %749 = vmatpush3.msra.mxu1 %v902_v11  ;;  %v445_v11 = vld [vmem:[%s1364_s3 + $0x30] sm:$0xff] }
  0x34   :  { %697 = vmatprep.subr.mxu0 %v909_v12  ;;  %750 = vmatprep.subr.mxu1 %v909_v12  ;;  %v320_v12 = vld [vmem:[%s1363_s2 + $0x48] sm:$0xff] }
  0x35   :  { %155 = vmatprep.mubr.f32.mxu0 %v63_v44  ;;  %276 = vmatprep.mubr.f32.mxu1 %v190_v45 }
  0x36   :  { %698 = vmatpush3.msra.mxu0 %v916_v13  ;;  %751 = vmatpush3.msra.mxu1 %v916_v13  ;;  %v448_v13 = vld [vmem:[%s1364_s3 + $0x48] sm:$0xff] }
  0x37   :  { %156 = vmatmul.mubr.f32.gmra.mxu0 %v62_v46  ;;  %277 = vmatmul.mubr.f32.gmra.mxu1 %v189_v47 }
  0x38   :  { %699 = vmatprep.subr.mxu0 %v923_v14  ;;  %752 = vmatprep.subr.mxu1 %v923_v14  ;;  %v319_v14 = vld [vmem:[%s1363_s2 + $0x40] sm:$0xff] }
  0x39   :  { %700 = vmatpush3.msra.mxu0 %v930_v15  ;;  %753 = vmatpush3.msra.mxu1 %v930_v15  ;;  %v447_v15 = vld [vmem:[%s1364_s3 + $0x40] sm:$0xff] }
  0x3a   :  { %701 = vmatprep.subr.mxu0 %v937_v16  ;;  %754 = vmatprep.subr.mxu1 %v937_v16  ;;  %v322_v16 = vld [vmem:[%s1363_s2 + $0x58] sm:$0xff] }
  0x3b   :  { %160 = vmatprep.mubr.f32.mxu0 %v65_v48  ;;  %281 = vmatprep.mubr.f32.mxu1 %v192_v49 }
  0x3c   :  { %702 = vmatpush3.msra.mxu0 %v944_v17  ;;  %755 = vmatpush3.msra.mxu1 %v944_v17  ;;  %v450_v17 = vld [vmem:[%s1364_s3 + $0x58] sm:$0xff] }
  0x3d   :  { %161 = vmatmul.mubr.f32.gmra.mxu0 %v64_v50  ;;  %282 = vmatmul.mubr.f32.gmra.mxu1 %v191_v51 }
  0x3e   :  { %703 = vmatprep.subr.mxu0 %v951_v18  ;;  %756 = vmatprep.subr.mxu1 %v951_v18  ;;  %v321_v18 = vld [vmem:[%s1363_s2 + $0x50] sm:$0xff] }
  0x3f   :  { %704 = vmatpush3.msra.mxu0 %v958_v19  ;;  %757 = vmatpush3.msra.mxu1 %v958_v19  ;;  %v449_v19 = vld [vmem:[%s1364_s3 + $0x50] sm:$0xff] }
  0x40   :  { %705 = vmatprep.subr.mxu0 %v965_v20  ;;  %758 = vmatprep.subr.mxu1 %v965_v20  ;;  %v324_v20 = vld [vmem:[%s1363_s2 + $0x68] sm:$0xff] }
  0x41   :  { %165 = vmatprep.mubr.f32.mxu0 %v67_v52  ;;  %286 = vmatprep.mubr.f32.mxu1 %v194_v53  ;;  %v1297_v52 = vld [vmem:[%s1365_s5] ss:$0 sm:$0xff] }
  0x42   :  { %706 = vmatpush3.msra.mxu0 %v972_v21  ;;  %759 = vmatpush3.msra.mxu1 %v972_v21  ;;  %v452_v21 = vld [vmem:[%s1364_s3 + $0x68] sm:$0xff] }
  0x43   :  { %166 = vmatmul.mubr.f32.gmra.mxu0 %v66_v54  ;;  %287 = vmatmul.mubr.f32.gmra.mxu1 %v193_v55 }
  0x44   :  { %707 = vmatprep.subr.mxu0 %v979_v22  ;;  %760 = vmatprep.subr.mxu1 %v979_v22  ;;  %v323_v22 = vld [vmem:[%s1363_s2 + $0x60] sm:$0xff] }
  0x45   :  { %708 = vmatpush3.msra.mxu0 %v986_v23  ;;  %761 = vmatpush3.msra.mxu1 %v986_v23  ;;  %v451_v23 = vld [vmem:[%s1364_s3 + $0x60] sm:$0xff] }
  0x46   :  { %709 = vmatprep.subr.mxu0 %v993_v24  ;;  %762 = vmatprep.subr.mxu1 %v993_v24 }
  0x47   :  { %170 = vmatprep.mubr.f32.mxu0 %v69_v56  ;;  %291 = vmatprep.mubr.f32.mxu1 %v196_v57 }
  0x48   :  { %710 = vmatpush3.msra.mxu0 %v1000_v25  ;;  %763 = vmatpush3.msra.mxu1 %v1000_v25 }
  0x49   :  { %171 = vmatmul.mubr.f32.gmra.mxu0 %v68_v58  ;;  %292 = vmatmul.mubr.f32.gmra.mxu1 %v195_v59 }
  0x4a   :  { %711 = vmatprep.subr.mxu0 %v1007_v26  ;;  %764 = vmatprep.subr.mxu1 %v1007_v26 }
  0x4b   :  { %712 = vmatpush3.msra.mxu0 %v1014_v27  ;;  %765 = vmatpush3.msra.mxu1 %v1014_v27 }
  0x4c   :  { %713 = vmatprep.subr.mxu0 %v1021_v28  ;;  %766 = vmatprep.subr.mxu1 %v1021_v28 }
  0x4d   :  { %714 = vmatpush3.msra.mxu0 %v1028_v29  ;;  %767 = vmatpush3.msra.mxu1 %v1028_v29 }
  0x4e   :  { %715 = vmatprep.subr.mxu0 %v1035_v30  ;;  %768 = vmatprep.subr.mxu1 %v1035_v30 }
  0x4f   :  { %716 = vmatpush3.msra.mxu0 %v1042_v31  ;;  %389 = vmatprep.mubr.f32.mxu0 %v312_v60 }
  0x50   :  { %769 = vmatpush3.msra.mxu1 %v1042_v31  ;;  %517 = vmatprep.mubr.f32.mxu1 %v440_v61 }
  0x51   :  { %390 = vmatmul.mubr.f32.vlgmr.msra.gmra.mxu0 %v311_v62  ;;  %518 = vmatmul.mubr.f32.vlgmr.msra.gmra.mxu1 %v439_v63 }
  0x52   :  { %394 = vmatprep.mubr.f32.mxu0 %v314_v0  ;;  %522 = vmatprep.mubr.f32.mxu1 %v442_v1 }
  0x55   :  { %395 = vmatmul.mubr.f32.gmra.mxu0 %v313_v2  ;;  %523 = vmatmul.mubr.f32.gmra.mxu1 %v441_v3 }
  0x56   :  { %399 = vmatprep.mubr.f32.mxu0 %v316_v4  ;;  %527 = vmatprep.mubr.f32.mxu1 %v444_v5 }
  0x59   :  { %400 = vmatmul.mubr.f32.gmra.mxu0 %v315_v6  ;;  %528 = vmatmul.mubr.f32.gmra.mxu1 %v443_v7 }
  0x5a   :  { %404 = vmatprep.mubr.f32.mxu0 %v318_v8  ;;  %532 = vmatprep.mubr.f32.mxu1 %v446_v9 }
  0x5d   :  { %405 = vmatmul.mubr.f32.gmra.mxu0 %v317_v10  ;;  %533 = vmatmul.mubr.f32.gmra.mxu1 %v445_v11 }
  0x5e   :  { %409 = vmatprep.mubr.f32.mxu0 %v320_v12  ;;  %537 = vmatprep.mubr.f32.mxu1 %v448_v13 }
  0x61   :  { %410 = vmatmul.mubr.f32.gmra.mxu0 %v319_v14  ;;  %538 = vmatmul.mubr.f32.gmra.mxu1 %v447_v15 }
  0x62   :  { %414 = vmatprep.mubr.f32.mxu0 %v322_v16  ;;  %542 = vmatprep.mubr.f32.mxu1 %v450_v17 }
  0x65   :  { %415 = vmatmul.mubr.f32.gmra.mxu0 %v321_v18  ;;  %543 = vmatmul.mubr.f32.gmra.mxu1 %v449_v19 }
  0x66   :  { %419 = vmatprep.mubr.f32.mxu0 %v324_v20  ;;  %547 = vmatprep.mubr.f32.mxu1 %v452_v21 }
  0x69   :  { %420 = vmatmul.mubr.f32.gmra.mxu0 %v323_v22  ;;  %548 = vmatmul.mubr.f32.gmra.mxu1 %v451_v23 }
  0xe3   :  { %v611_v24 = vpop.f32.mrf.mxu0  ;;  %v664_v25 = vpop.f32.mrf.mxu1 }
  0xe5   :  { %v612_v26 = vpop.f32.mrf.mxu0  ;;  %v665_v27 = vpop.f32.mrf.mxu1 }
  0xe6   :  { %v613_v48 = vadd.f32 %v612_v26, %v611_v24  ;;  %v666_v49 = vadd.f32 %v665_v27, %v664_v25 }
  0xe8   :  { %v143_v53 = vadd.f32 %v613_v48, %v1297_v52  ;;  %v264_v54 = vadd.f32 %v666_v49, %v1297_v52 }
  0xea   :  { %v176_v63 = vmax.f32 %v143_v53, 0.0  ;;  %v297_v0 = vmax.f32 %v264_v54, 0.0 }
  0xeb   :  { %v614_v28 = vpop.f32.mrf.mxu0  ;;  %v667_v29 = vpop.f32.mrf.mxu1 }
  0xec   :  { %v304_v13 = vmax.f32 %v176_v63, %v297_v0 }
  0xed   :  { %v615_v30 = vpop.f32.mrf.mxu0  ;;  %v668_v31 = vpop.f32.mrf.mxu1 }
  0xee   :  { %v616_v55 = vadd.f32 %v615_v30, %v614_v28  ;;  %v669_v58 = vadd.f32 %v668_v31, %v667_v29 }
  0xf0   :  { %v148_v1 = vadd.f32 %v616_v55, %v1297_v52  ;;  %v269_v4 = vadd.f32 %v669_v58, %v1297_v52 }
  0xf1   :  { %v617_v32 = vpop.f32.mrf.mxu0  ;;  %v670_v33 = vpop.f32.mrf.mxu1 }
  0xf2   :  { %v177_v14 = vmax.f32 %v148_v1, 0.0  ;;  %v298_v19 = vmax.f32 %v269_v4, 0.0 }
  0xf3   :  { %v618_v34 = vpop.f32.mrf.mxu0  ;;  %v671_v35 = vpop.f32.mrf.mxu1 }
  0xf4   :  { %v619_v59 = vadd.f32 %v618_v34, %v617_v32  ;;  %v672_v60 = vadd.f32 %v671_v35, %v670_v33 }
  0xf6   :  { %v153_v7 = vadd.f32 %v619_v59, %v1297_v52  ;;  %v274_v8 = vadd.f32 %v672_v60, %v1297_v52 }
  0xf7   :  { %v620_v36 = vpop.f32.mrf.mxu0  ;;  %v673_v37 = vpop.f32.mrf.mxu1 }
  0xf8   :  { %v178_v23 = vmax.f32 %v153_v7, 0.0  ;;  %v299_v24 = vmax.f32 %v274_v8, 0.0 }
  0xf9   :  { %v621_v38 = vpop.f32.mrf.mxu0  ;;  %v674_v39 = vpop.f32.mrf.mxu1 }
  0xfa   :  { %v622_v15 = vadd.f32 %v621_v38, %v620_v36  ;;  %v675_v16 = vadd.f32 %v674_v39, %v673_v37  ;;  %v305_v37 = vmax.f32 %v177_v14, %v298_v19  ;;  %v306_v54 = vmax.f32 %v178_v23, %v299_v24 }
  0xfc   :  { %v158_v33 = vadd.f32 %v622_v15, %v1297_v52  ;;  %v279_v34 = vadd.f32 %v675_v16, %v1297_v52 }
  0xfd   :  { %v623_v40 = vpop.f32.mrf.mxu0  ;;  %v676_v41 = vpop.f32.mrf.mxu1 }
  0xfe   :  { %v179_v60 = vmax.f32 %v158_v33, 0.0 }
  0xff   :  { %v624_v42 = vpop.f32.mrf.mxu0  ;;  %v677_v43 = vpop.f32.mrf.mxu1 }
 0x100   :  { %v625_v25 = vadd.f32 %v624_v42, %v623_v40  ;;  %v678_v26 = vadd.f32 %v677_v43, %v676_v41 }
 0x102   :  { %v163_v40 = vadd.f32 %v625_v25, %v1297_v52  ;;  %v284_v41 = vadd.f32 %v678_v26, %v1297_v52 }
 0x103   :  { %v1282_v44 = vpop.f32.mrf.mxu0  ;;  %v1284_v45 = vpop.f32.mrf.mxu1 }
 0x104   :  { %v180_v4 = vmax.f32 %v163_v40, 0.0 }
 0x105   :  { %v1286_v46 = vpop.f32.mrf.mxu0  ;;  %v1288_v47 = vpop.f32.mrf.mxu1 }
 0x106   :  { %v628_v42 = vadd.f32 %v1286_v46, %v1282_v44 }
 0x109   :  { %v1290_v50 = vpop.f32.mrf.mxu0  ;;  %v1292_v51 = vpop.f32.mrf.mxu1 }
 0x10b   :  { %v1301_v56 = vpop.f32.mrf.mxu0  ;;  %v1303_v57 = vpop.f32.mrf.mxu1 }
 0x111   :  { %v717_v61 = vpop.f32.mrf.mxu0  ;;  %v770_v62 = vpop.f32.mrf.mxu1 }
 0x113   :  { %v718_v2 = vpop.f32.mrf.mxu0  ;;  %v771_v3 = vpop.f32.mrf.mxu1 }
 0x114   :  { %v719_v5 = vadd.f32 %v718_v2, %v717_v61  ;;  %v772_v6 = vadd.f32 %v771_v3, %v770_v62  ;;  %v300_v61 = vmax.f32 %v279_v34, 0.0  ;;  %v681_v62 = vadd.f32 %v1288_v47, %v1284_v45 }
 0x115   :  { %v720_v9 = vpop.f32.mrf.mxu0  ;;  %v773_v10 = vpop.f32.mrf.mxu1 }
 0x116   :  { %v392_v11 = vadd.f32 %v719_v5, %v1297_v52  ;;  %v520_v12 = vadd.f32 %v772_v6, %v1297_v52  ;;  %v301_v5 = vmax.f32 %v284_v41, 0.0  ;;  %v168_v6 = vadd.f32 %v628_v42, %v1297_v52 }
 0x117   :  { %v721_v17 = vpop.f32.mrf.mxu0  ;;  %v774_v18 = vpop.f32.mrf.mxu1  ;;  %v307_v16 = vmax.f32 %v179_v60, %v300_v61 }
 0x118   :  { %v425_v20 = vmax.f32 %v392_v11, 0.0  ;;  %v722_v21 = vadd.f32 %v721_v17, %v720_v9  ;;  %v775_v22 = vadd.f32 %v774_v18, %v773_v10  ;;  %v553_v30 = vmax.f32 %v520_v12, 0.0 }
 0x119   :  { %v723_v27 = vpop.f32.mrf.mxu0  ;;  %v776_v28 = vpop.f32.mrf.mxu1  ;;  %v289_v11 = vadd.f32 %v681_v62, %v1297_v52  ;;  %v631_v12 = vadd.f32 %v1301_v56, %v1290_v50  ;;  %v181_v24 = vmax.f32 %v168_v6, 0.0 }
 0x11a   :  { %v432_v29 = vmax.f32 %v304_v13, %v425_v20  ;;  %v397_v31 = vadd.f32 %v722_v21, %v1297_v52  ;;  %v525_v32 = vadd.f32 %v775_v22, %v1297_v52  ;;  %v684_v13 = vadd.f32 %v1303_v57, %v1292_v51 }
 0x11b   :  { %v724_v35 = vpop.f32.mrf.mxu0  ;;  %v777_v36 = vpop.f32.mrf.mxu1  ;;  %v308_v20 = vmax.f32 %v180_v4, %v301_v5  ;;  %v302_v51 = vmax.f32 %v289_v11, 0.0  ;;  %v173_v57 = vadd.f32 %v631_v12, %v1297_v52 }
 0x11c   :  { %v560_v38 = vmax.f32 %v432_v29, %v553_v30  ;;  %v426_v39 = vmax.f32 %v397_v31, 0.0  ;;  %v725_v48 = vadd.f32 %v724_v35, %v723_v27  ;;  %v778_v43 = vadd.f32 %v777_v36, %v776_v28 }
 0x11d   :  { %v726_v49 = vpop.f32.mrf.mxu0  ;;  %v779_v53 = vpop.f32.mrf.mxu1  ;;  %v554_v58 = vmax.f32 %v525_v32, 0.0  ;;  %v294_v26 = vadd.f32 %v684_v13, %v1297_v52  ;;  %v182_v40 = vmax.f32 %v173_v57, 0.0 }
 0x11e   :  { %567 = vst [vmem:[%s1366_s6] sm:$0xff] %v560_v38  ;;  %v433_v55 = vmax.f32 %v305_v37, %v426_v39  ;;  %v402_v59 = vadd.f32 %v725_v48, %v1297_v52  ;;  %v530_v63 = vadd.f32 %v778_v43, %v1297_v52  ;;  %v309_v48 = vmax.f32 %v181_v24, %v302_v51 }
 0x11f   :  { %v727_v44 = vpop.f32.mrf.mxu0  ;;  %v780_v46 = vpop.f32.mrf.mxu1  ;;  %v303_v43 = vmax.f32 %v294_v26, 0.0 }
 0x120   :  { %v561_v0 = vmax.f32 %v433_v55, %v554_v58  ;;  %v427_v1 = vmax.f32 %v402_v59, 0.0  ;;  %v728_v2 = vadd.f32 %v727_v44, %v726_v49  ;;  %v781_v3 = vadd.f32 %v780_v46, %v779_v53 }
 0x121   :  { %v729_v7 = vpop.f32.mrf.mxu0  ;;  %v782_v8 = vpop.f32.mrf.mxu1  ;;  %v555_v45 = vmax.f32 %v530_v63, 0.0  ;;  %v310_v62 = vmax.f32 %v182_v40, %v303_v43 }
 0x122   :  { %568 = vst [vmem:[%s1366_s6 + $0x8] sm:$0xff] %v561_v0  ;;  %v434_v9 = vmax.f32 %v306_v54, %v427_v1  ;;  %v407_v47 = vadd.f32 %v728_v2, %v1297_v52  ;;  %v535_v10 = vadd.f32 %v781_v3, %v1297_v52 }
 0x123   :  { %v730_v14 = vpop.f32.mrf.mxu0  ;;  %v783_v15 = vpop.f32.mrf.mxu1 }
 0x124   :  { %v562_v17 = vmax.f32 %v434_v9, %v555_v45  ;;  %v428_v18 = vmax.f32 %v407_v47, 0.0  ;;  %v731_v19 = vadd.f32 %v730_v14, %v729_v7  ;;  %v784_v21 = vadd.f32 %v783_v15, %v782_v8 }
 0x125   :  { %v732_v22 = vpop.f32.mrf.mxu0  ;;  %v785_v23 = vpop.f32.mrf.mxu1  ;;  %v556_v50 = vmax.f32 %v535_v10, 0.0 }
 0x126   :  { %569 = vst [vmem:[%s1366_s6 + $0x10] sm:$0xff] %v562_v17  ;;  %v435_v25 = vmax.f32 %v307_v16, %v428_v18  ;;  %v412_v56 = vadd.f32 %v731_v19, %v1297_v52  ;;  %v540_v27 = vadd.f32 %v784_v21, %v1297_v52 }
 0x127   :  { %v733_v28 = vpop.f32.mrf.mxu0  ;;  %v786_v29 = vpop.f32.mrf.mxu1 }
 0x128   :  { %v563_v30 = vmax.f32 %v435_v25, %v556_v50  ;;  %v429_v31 = vmax.f32 %v412_v56, 0.0  ;;  %v734_v32 = vadd.f32 %v733_v28, %v732_v22  ;;  %v787_v33 = vadd.f32 %v786_v29, %v785_v23 }
 0x129   :  { %v735_v34 = vpop.f32.mrf.mxu0  ;;  %v788_v35 = vpop.f32.mrf.mxu1  ;;  %v557_v37 = vmax.f32 %v540_v27, 0.0 }
 0x12a   :  { %570 = vst [vmem:[%s1366_s6 + $0x18] sm:$0xff] %v563_v30  ;;  %v436_v36 = vmax.f32 %v308_v20, %v429_v31  ;;  %v417_v38 = vadd.f32 %v734_v32, %v1297_v52  ;;  %v545_v39 = vadd.f32 %v787_v33, %v1297_v52 }
 0x12b   :  { %v736_v41 = vpop.f32.mrf.mxu0  ;;  %v789_v42 = vpop.f32.mrf.mxu1 }
 0x12c   :  { %v564_v49 = vmax.f32 %v436_v36, %v557_v37  ;;  %v430_v53 = vmax.f32 %v417_v38, 0.0  ;;  %v737_v54 = vadd.f32 %v736_v41, %v735_v34  ;;  %v790_v55 = vadd.f32 %v789_v42, %v788_v35 }
 0x12d   :  { %v558_v59 = vmax.f32 %v545_v39, 0.0 }
 0x12e   :  { %571 = vst [vmem:[%s1366_s6 + $0x20] sm:$0xff] %v564_v49  ;;  %v437_v58 = vmax.f32 %v309_v48, %v430_v53  ;;  %v422_v60 = vadd.f32 %v737_v54, %v1297_v52  ;;  %v550_v61 = vadd.f32 %v790_v55, %v1297_v52 }
 0x130   :  { %v565_v63 = vmax.f32 %v437_v58, %v558_v59  ;;  %v431_v44 = vmax.f32 %v422_v60, 0.0  ;;  %v559_v0 = vmax.f32 %v550_v61, 0.0 }
 0x132   :  { %572 = vst [vmem:[%s1366_s6 + $0x28] sm:$0xff] %v565_v63  ;;  %v438_v46 = vmax.f32 %v310_v62, %v431_v44 }
 0x134   :  { %v566_v1 = vmax.f32 %v438_v46, %v559_v0 }
 0x136   :  { %573 = vst [vmem:[%s1366_s6 + $0x30] sm:$0xff] %v566_v1 }

// kernel: net_forward.5
= control target key start
LH: loop header
LB: loop body
LE: loop exit
PB: predicated region body
PF: predicated region fallthrough
CT: control target
= control target key end

     0   :  { %vm2143_vm0 = vmmov 0   ;;  %s3621_s1 = inlined_call_operand.vmem [shape: f32[3200,128], index: 1, kind: input, shape index: {}]   ;;  %s3622_s0 = inlined_call_operand.vmem [shape: f32[8,3200], index: 0, kind: input, shape index: {}]   ;;  %s3623_s3 = inlined_call_operand.vmem [shape: f32[128,128], index: 3, kind: input, shape index: {}]   ;;  %s3624_s5 = inlined_call_operand.vmem [shape: f32[128,128], index: 5, kind: input, shape index: {}]   ;;  %s3625_s2 = inlined_call_operand.vmem [shape: f32[1,128], index: 2, kind: input, shape index: {}]   ;;  %s3626_s4 = inlined_call_operand.vmem [shape: f32[1,128], index: 4, kind: input, shape index: {}]   ;;  %s3627_s6 = inlined_call_operand.vmem [shape: f32[1,128], index: 6, kind: input, shape index: {}]   ;;  %s3628_s7 = inlined_call_operand.vmem [shape: f32[8,128], index: 7, kind: output, shape index: {}]  }
   0x1   :  { %v82_v0 = vld [vmem:[%s3621_s1 + $0xf8] sm:$0xff]  ;;  %v81_v2 = vld [vmem:[%s3621_s1 + $0xf0] sm:$0xff]  ;;  %v80_v6 = vld [vmem:[%s3621_s1 + $0xe8] sm:$0xff] }
   0x2   :  { %v66_v1 = vld [vmem:[%s3621_s1 + $0x78] sm:$0xff]  ;;  %1564 = vmatprep.subr.mxu0 %v82_v0  ;;  %v65_v4 = vld [vmem:[%s3621_s1 + $0x70] sm:$0xff]  ;;  %v64_v8 = vld [vmem:[%s3621_s1 + $0x68] sm:$0xff] }
   0x3   :  { %v114_v3 = vld [vmem:[%s3621_s1 + $0x1f8] sm:$0xff]  ;;  %1565 = vmatpush3.msra.mxu0 %v66_v1  ;;  %v113_v7 = vld [vmem:[%s3621_s1 + $0x1f0] sm:$0xff]  ;;  %v112_v10 = vld [vmem:[%s3621_s1 + $0x1e8] sm:$0xff] }
   0x4   :  { %v98_v5 = vld [vmem:[%s3621_s1 + $0x178] sm:$0xff]  ;;  %1599 = vmatprep.subr.mxu1 %v114_v3  ;;  %1566 = vmatprep.subr.mxu0 %v81_v2  ;;  %v97_v9 = vld [vmem:[%s3621_s1 + $0x170] sm:$0xff]  ;;  %v79_v11 = vld [vmem:[%s3621_s1 + $0xe0] sm:$0xff] }
   0x5   :  { %1600 = vmatpush3.msra.mxu1 %v98_v5  ;;  %1567 = vmatpush3.msra.mxu0 %v65_v4  ;;  %v96_v12 = vld [vmem:[%s3621_s1 + $0x168] sm:$0xff]  ;;  %v63_v13 = vld [vmem:[%s3621_s1 + $0x60] sm:$0xff]  ;;  %v78_v15 = vld [vmem:[%s3621_s1 + $0xd8] sm:$0xff] }
   0x6   :  { %1601 = vmatprep.subr.mxu1 %v113_v7  ;;  %1568 = vmatprep.subr.mxu0 %v80_v6  ;;  %v111_v14 = vld [vmem:[%s3621_s1 + $0x1e0] sm:$0xff]  ;;  %v62_v17 = vld [vmem:[%s3621_s1 + $0x58] sm:$0xff]  ;;  %v77_v19 = vld [vmem:[%s3621_s1 + $0xd0] sm:$0xff] }
   0x7   :  { %1602 = vmatpush3.msra.mxu1 %v97_v9  ;;  %1569 = vmatpush3.msra.mxu0 %v64_v8  ;;  %v95_v16 = vld [vmem:[%s3621_s1 + $0x160] sm:$0xff]  ;;  %v110_v18 = vld [vmem:[%s3621_s1 + $0x1d8] sm:$0xff]  ;;  %v61_v21 = vld [vmem:[%s3621_s1 + $0x50] sm:$0xff] }
   0x8   :  { %1603 = vmatprep.subr.mxu1 %v112_v10  ;;  %1570 = vmatprep.subr.mxu0 %v79_v11  ;;  %v94_v20 = vld [vmem:[%s3621_s1 + $0x158] sm:$0xff]  ;;  %v109_v22 = vld [vmem:[%s3621_s1 + $0x1d0] sm:$0xff]  ;;  %v76_v23 = vld [vmem:[%s3621_s1 + $0xc8] sm:$0xff] }
   0x9   :  { %1604 = vmatpush3.msra.mxu1 %v96_v12  ;;  %1571 = vmatpush3.msra.mxu0 %v63_v13  ;;  %v93_v24 = vld [vmem:[%s3621_s1 + $0x150] sm:$0xff]  ;;  %v60_v25 = vld [vmem:[%s3621_s1 + $0x48] sm:$0xff]  ;;  %v75_v27 = vld [vmem:[%s3621_s1 + $0xc0] sm:$0xff] }
   0xa   :  { %1605 = vmatprep.subr.mxu1 %v111_v14  ;;  %1572 = vmatprep.subr.mxu0 %v78_v15  ;;  %v108_v26 = vld [vmem:[%s3621_s1 + $0x1c8] sm:$0xff]  ;;  %v59_v29 = vld [vmem:[%s3621_s1 + $0x40] sm:$0xff]  ;;  %v74_v31 = vld [vmem:[%s3621_s1 + $0xb8] sm:$0xff] }
   0xb   :  { %1606 = vmatpush3.msra.mxu1 %v95_v16  ;;  %1573 = vmatpush3.msra.mxu0 %v62_v17  ;;  %v92_v28 = vld [vmem:[%s3621_s1 + $0x148] sm:$0xff]  ;;  %v107_v30 = vld [vmem:[%s3621_s1 + $0x1c0] sm:$0xff]  ;;  %v58_v33 = vld [vmem:[%s3621_s1 + $0x38] sm:$0xff] }
   0xc   :  { %1607 = vmatprep.subr.mxu1 %v110_v18  ;;  %1574 = vmatprep.subr.mxu0 %v77_v19  ;;  %v91_v32 = vld [vmem:[%s3621_s1 + $0x140] sm:$0xff]  ;;  %v106_v34 = vld [vmem:[%s3621_s1 + $0x1b8] sm:$0xff]  ;;  %v73_v35 = vld [vmem:[%s3621_s1 + $0xb0] sm:$0xff] }
   0xd   :  { %1608 = vmatpush3.msra.mxu1 %v94_v20  ;;  %1575 = vmatpush3.msra.mxu0 %v61_v21  ;;  %v90_v36 = vld [vmem:[%s3621_s1 + $0x138] sm:$0xff]  ;;  %v57_v37 = vld [vmem:[%s3621_s1 + $0x30] sm:$0xff]  ;;  %v72_v39 = vld [vmem:[%s3621_s1 + $0xa8] sm:$0xff] }
   0xe   :  { %1609 = vmatprep.subr.mxu1 %v109_v22  ;;  %1576 = vmatprep.subr.mxu0 %v76_v23  ;;  %v105_v38 = vld [vmem:[%s3621_s1 + $0x1b0] sm:$0xff]  ;;  %v56_v41 = vld [vmem:[%s3621_s1 + $0x28] sm:$0xff]  ;;  %v71_v43 = vld [vmem:[%s3621_s1 + $0xa0] sm:$0xff] }
   0xf   :  { %1610 = vmatpush3.msra.mxu1 %v93_v24  ;;  %1577 = vmatpush3.msra.mxu0 %v60_v25  ;;  %v89_v40 = vld [vmem:[%s3621_s1 + $0x130] sm:$0xff]  ;;  %v104_v42 = vld [vmem:[%s3621_s1 + $0x1a8] sm:$0xff]  ;;  %v55_v45 = vld [vmem:[%s3621_s1 + $0x20] sm:$0xff] }
  0x10   :  { %1611 = vmatprep.subr.mxu1 %v108_v26  ;;  %1578 = vmatprep.subr.mxu0 %v75_v27  ;;  %v88_v44 = vld [vmem:[%s3621_s1 + $0x128] sm:$0xff]  ;;  %v103_v46 = vld [vmem:[%s3621_s1 + $0x1a0] sm:$0xff]  ;;  %v70_v47 = vld [vmem:[%s3621_s1 + $0x98] sm:$0xff] }
  0x11   :  { %1612 = vmatpush3.msra.mxu1 %v92_v28  ;;  %1579 = vmatpush3.msra.mxu0 %v59_v29  ;;  %v87_v48 = vld [vmem:[%s3621_s1 + $0x120] sm:$0xff]  ;;  %v54_v49 = vld [vmem:[%s3621_s1 + $0x18] sm:$0xff]  ;;  %v69_v51 = vld [vmem:[%s3621_s1 + $0x90] sm:$0xff] }
  0x12   :  { %1613 = vmatprep.subr.mxu1 %v107_v30  ;;  %1580 = vmatprep.subr.mxu0 %v74_v31  ;;  %v102_v50 = vld [vmem:[%s3621_s1 + $0x198] sm:$0xff]  ;;  %v53_v53 = vld [vmem:[%s3621_s1 + $0x10] sm:$0xff]  ;;  %v68_v55 = vld [vmem:[%s3621_s1 + $0x88] sm:$0xff] }
  0x13   :  { %1614 = vmatpush3.msra.mxu1 %v91_v32  ;;  %1581 = vmatpush3.msra.mxu0 %v58_v33  ;;  %v86_v52 = vld [vmem:[%s3621_s1 + $0x118] sm:$0xff]  ;;  %v101_v54 = vld [vmem:[%s3621_s1 + $0x190] sm:$0xff]  ;;  %v52_v57 = vld [vmem:[%s3621_s1 + $0x8] sm:$0xff] }
  0x14   :  { %1615 = vmatprep.subr.mxu1 %v106_v34  ;;  %1582 = vmatprep.subr.mxu0 %v73_v35  ;;  %v85_v56 = vld [vmem:[%s3621_s1 + $0x110] sm:$0xff]  ;;  %v100_v58 = vld [vmem:[%s3621_s1 + $0x188] sm:$0xff]  ;;  %v67_v59 = vld [vmem:[%s3621_s1 + $0x80] sm:$0xff] }
  0x15   :  { %1616 = vmatpush3.msra.mxu1 %v90_v36  ;;  %1583 = vmatpush3.msra.mxu0 %v57_v37  ;;  %v27_v60 = vld [vmem:[%s3622_s0 + $0x8] sm:$0xff]  ;;  %v51_v61 = vld [vmem:[%s3621_s1] sm:$0xff]  ;;  %v146_v1 = vld [vmem:[%s3621_s1 + $0x2f8] sm:$0xff] }
  0x16   :  { %1617 = vmatprep.subr.mxu1 %v105_v38  ;;  %1584 = vmatprep.subr.mxu0 %v72_v39  ;;  %v84_v62 = vld [vmem:[%s3621_s1 + $0x108] sm:$0xff]  ;;  %v26_v63 = vld [vmem:[%s3622_s0] sm:$0xff]  ;;  %v29_v3 = vld [vmem:[%s3622_s0 + $0x18] sm:$0xff] }
  0x17   :  { %1618 = vmatpush3.msra.mxu1 %v89_v40  ;;  %1585 = vmatpush3.msra.mxu0 %v56_v41  ;;  %v99_v0 = vld [vmem:[%s3621_s1 + $0x180] sm:$0xff]  ;;  %v130_v4 = vld [vmem:[%s3621_s1 + $0x278] sm:$0xff]  ;;  %v28_v5 = vld [vmem:[%s3622_s0 + $0x10] sm:$0xff] }
  0x18   :  { %1619 = vmatprep.subr.mxu1 %v104_v42  ;;  %1586 = vmatprep.subr.mxu0 %v71_v43  ;;  %v83_v2 = vld [vmem:[%s3621_s1 + $0x100] sm:$0xff]  ;;  %v145_v6 = vld [vmem:[%s3621_s1 + $0x2f0] sm:$0xff]  ;;  %v178_v7 = vld [vmem:[%s3621_s1 + $0x3f8] sm:$0xff] }
  0x19   :  { %1620 = vmatpush3.msra.mxu1 %v88_v44  ;;  %1587 = vmatpush3.msra.mxu0 %v55_v45  ;;  %v129_v8 = vld [vmem:[%s3621_s1 + $0x270] sm:$0xff]  ;;  %v162_v9 = vld [vmem:[%s3621_s1 + $0x378] sm:$0xff]  ;;  %v144_v10 = vld [vmem:[%s3621_s1 + $0x2e8] sm:$0xff] }
  0x1a   :  { %1621 = vmatprep.subr.mxu1 %v103_v46  ;;  %1588 = vmatprep.subr.mxu0 %v70_v47  ;;  %v177_v11 = vld [vmem:[%s3621_s1 + $0x3f0] sm:$0xff]  ;;  %v128_v12 = vld [vmem:[%s3621_s1 + $0x268] sm:$0xff]  ;;  %v143_v14 = vld [vmem:[%s3621_s1 + $0x2e0] sm:$0xff] }
  0x1b   :  { %1622 = vmatpush3.msra.mxu1 %v87_v48  ;;  %1589 = vmatpush3.msra.mxu0 %v54_v49  ;;  %v161_v13 = vld [vmem:[%s3621_s1 + $0x370] sm:$0xff]  ;;  %v176_v15 = vld [vmem:[%s3621_s1 + $0x3e8] sm:$0xff]  ;;  %v127_v16 = vld [vmem:[%s3621_s1 + $0x260] sm:$0xff] }
  0x1c   :  { %1623 = vmatprep.subr.mxu1 %v102_v50  ;;  %1590 = vmatprep.subr.mxu0 %v69_v51  ;;  %v160_v17 = vld [vmem:[%s3621_s1 + $0x368] sm:$0xff]  ;;  %v142_v18 = vld [vmem:[%s3621_s1 + $0x2d8] sm:$0xff]  ;;  %v175_v19 = vld [vmem:[%s3621_s1 + $0x3e0] sm:$0xff] }
  0x1d   :  { %1624 = vmatpush3.msra.mxu1 %v86_v52  ;;  %1591 = vmatpush3.msra.mxu0 %v53_v53  ;;  %v126_v20 = vld [vmem:[%s3621_s1 + $0x258] sm:$0xff]  ;;  %v159_v21 = vld [vmem:[%s3621_s1 + $0x360] sm:$0xff]  ;;  %v141_v22 = vld [vmem:[%s3621_s1 + $0x2d0] sm:$0xff] }
  0x1e   :  { %1625 = vmatprep.subr.mxu1 %v101_v54  ;;  %1592 = vmatprep.subr.mxu0 %v68_v55  ;;  %v174_v23 = vld [vmem:[%s3621_s1 + $0x3d8] sm:$0xff]  ;;  %v125_v24 = vld [vmem:[%s3621_s1 + $0x250] sm:$0xff]  ;;  %v140_v26 = vld [vmem:[%s3621_s1 + $0x2c8] sm:$0xff] }
  0x1f   :  { %1626 = vmatpush3.msra.mxu1 %v85_v56  ;;  %1593 = vmatpush3.msra.mxu0 %v52_v57  ;;  %v158_v25 = vld [vmem:[%s3621_s1 + $0x358] sm:$0xff]  ;;  %v173_v27 = vld [vmem:[%s3621_s1 + $0x3d0] sm:$0xff]  ;;  %v124_v28 = vld [vmem:[%s3621_s1 + $0x248] sm:$0xff] }
  0x20   :  { %1627 = vmatprep.subr.mxu1 %v100_v58  ;;  %1594 = vmatprep.subr.mxu0 %v67_v59  ;;  %v157_v29 = vld [vmem:[%s3621_s1 + $0x350] sm:$0xff]  ;;  %v139_v30 = vld [vmem:[%s3621_s1 + $0x2c0] sm:$0xff]  ;;  %v172_v31 = vld [vmem:[%s3621_s1 + $0x3c8] sm:$0xff] }
  0x21   :  { %522 = vmatprep.mubr.f32.mxu0 %v27_v60  ;;  %1595 = vmatpush3.msra.mxu0 %v51_v61  ;;  %v123_v32 = vld [vmem:[%s3621_s1 + $0x240] sm:$0xff]  ;;  %v156_v33 = vld [vmem:[%s3621_s1 + $0x348] sm:$0xff]  ;;  %v138_v34 = vld [vmem:[%s3621_s1 + $0x2b8] sm:$0xff] }
  0x22   :  { %1628 = vmatpush3.msra.mxu1 %v84_v62  ;;  %523 = vmatmul.mubr.f32.vlgmr.msra.gmra.mxu0 %v26_v63  ;;  %v171_v35 = vld [vmem:[%s3621_s1 + $0x3c0] sm:$0xff]  ;;  %v122_v36 = vld [vmem:[%s3621_s1 + $0x238] sm:$0xff]  ;;  %v137_v38 = vld [vmem:[%s3621_s1 + $0x2b0] sm:$0xff] }
  0x23   :  { %1629 = vmatprep.subr.mxu1 %v99_v0  ;;  %1634 = vmatprep.subr.mxu0 %v146_v1  ;;  %v155_v37 = vld [vmem:[%s3621_s1 + $0x340] sm:$0xff]  ;;  %v170_v39 = vld [vmem:[%s3621_s1 + $0x3b8] sm:$0xff]  ;;  %v121_v40 = vld [vmem:[%s3621_s1 + $0x230] sm:$0xff] }
  0x24   :  { %1630 = vmatpush3.msra.mxu1 %v83_v2  ;;  %592 = vmatprep.mubr.f32.mxu1 %v29_v3  ;;  %v154_v41 = vld [vmem:[%s3621_s1 + $0x338] sm:$0xff]  ;;  %v136_v42 = vld [vmem:[%s3621_s1 + $0x2a8] sm:$0xff]  ;;  %v169_v43 = vld [vmem:[%s3621_s1 + $0x3b0] sm:$0xff] }
  0x25   :  { %1635 = vmatpush3.msra.mxu0 %v130_v4  ;;  %593 = vmatmul.mubr.f32.vlgmr.msra.gmra.mxu1 %v28_v5  ;;  %v120_v44 = vld [vmem:[%s3621_s1 + $0x228] sm:$0xff]  ;;  %v153_v45 = vld [vmem:[%s3621_s1 + $0x330] sm:$0xff]  ;;  %v135_v46 = vld [vmem:[%s3621_s1 + $0x2a0] sm:$0xff] }
  0x26   :  { %1636 = vmatprep.subr.mxu0 %v145_v6  ;;  %1669 = vmatprep.subr.mxu1 %v178_v7  ;;  %v168_v47 = vld [vmem:[%s3621_s1 + $0x3a8] sm:$0xff]  ;;  %v119_v48 = vld [vmem:[%s3621_s1 + $0x220] sm:$0xff]  ;;  %v134_v50 = vld [vmem:[%s3621_s1 + $0x298] sm:$0xff] }
  0x27   :  { %1637 = vmatpush3.msra.mxu0 %v129_v8  ;;  %1670 = vmatpush3.msra.mxu1 %v162_v9  ;;  %v152_v49 = vld [vmem:[%s3621_s1 + $0x328] sm:$0xff]  ;;  %v167_v51 = vld [vmem:[%s3621_s1 + $0x3a0] sm:$0xff]  ;;  %v118_v52 = vld [vmem:[%s3621_s1 + $0x218] sm:$0xff] }
  0x28   :  { %1638 = vmatprep.subr.mxu0 %v144_v10  ;;  %1671 = vmatprep.subr.mxu1 %v177_v11  ;;  %v151_v53 = vld [vmem:[%s3621_s1 + $0x320] sm:$0xff]  ;;  %v133_v54 = vld [vmem:[%s3621_s1 + $0x290] sm:$0xff]  ;;  %v166_v55 = vld [vmem:[%s3621_s1 + $0x398] sm:$0xff] }
  0x29   :  { %1639 = vmatpush3.msra.mxu0 %v128_v12  ;;  %1672 = vmatpush3.msra.mxu1 %v161_v13  ;;  %v117_v56 = vld [vmem:[%s3621_s1 + $0x210] sm:$0xff]  ;;  %v150_v57 = vld [vmem:[%s3621_s1 + $0x318] sm:$0xff]  ;;  %v132_v58 = vld [vmem:[%s3621_s1 + $0x288] sm:$0xff] }
  0x2a   :  { %1640 = vmatprep.subr.mxu0 %v143_v14  ;;  %1673 = vmatprep.subr.mxu1 %v176_v15  ;;  %v165_v59 = vld [vmem:[%s3621_s1 + $0x390] sm:$0xff]  ;;  %v116_v60 = vld [vmem:[%s3621_s1 + $0x208] sm:$0xff]  ;;  %v131_v62 = vld [vmem:[%s3621_s1 + $0x280] sm:$0xff] }
  0x2b   :  { %1641 = vmatpush3.msra.mxu0 %v127_v16  ;;  %1674 = vmatpush3.msra.mxu1 %v160_v17  ;;  %v149_v61 = vld [vmem:[%s3621_s1 + $0x310] sm:$0xff]  ;;  %v164_v63 = vld [vmem:[%s3621_s1 + $0x388] sm:$0xff]  ;;  %v115_v0 = vld [vmem:[%s3621_s1 + $0x200] sm:$0xff] }
  0x2c   :  { %1642 = vmatprep.subr.mxu0 %v142_v18  ;;  %1675 = vmatprep.subr.mxu1 %v175_v19  ;;  %v31_v1 = vld [vmem:[%s3622_s0 + $0x28] sm:$0xff]  ;;  %v30_v3 = vld [vmem:[%s3622_s0 + $0x20] sm:$0xff]  ;;  %v210_v5 = vld [vmem:[%s3621_s1 + $0x4f8] sm:$0xff] }
  0x2d   :  { %1643 = vmatpush3.msra.mxu0 %v126_v20  ;;  %1676 = vmatpush3.msra.mxu1 %v159_v21  ;;  %v148_v2 = vld [vmem:[%s3621_s1 + $0x308] sm:$0xff]  ;;  %v163_v4 = vld [vmem:[%s3621_s1 + $0x380] sm:$0xff]  ;;  %v33_v7 = vld [vmem:[%s3622_s0 + $0x38] sm:$0xff] }
  0x2e   :  { %1644 = vmatprep.subr.mxu0 %v141_v22  ;;  %1677 = vmatprep.subr.mxu1 %v174_v23  ;;  %v147_v6 = vld [vmem:[%s3621_s1 + $0x300] sm:$0xff]  ;;  %v194_v8 = vld [vmem:[%s3621_s1 + $0x478] sm:$0xff]  ;;  %v32_v9 = vld [vmem:[%s3622_s0 + $0x30] sm:$0xff] }
  0x2f   :  { %1645 = vmatpush3.msra.mxu0 %v125_v24  ;;  %1678 = vmatpush3.msra.mxu1 %v158_v25  ;;  %v209_v10 = vld [vmem:[%s3621_s1 + $0x4f0] sm:$0xff]  ;;  %v242_v11 = vld [vmem:[%s3621_s1 + $0x5f8] sm:$0xff]  ;;  %v208_v14 = vld [vmem:[%s3621_s1 + $0x4e8] sm:$0xff] }
  0x30   :  { %1646 = vmatprep.subr.mxu0 %v140_v26  ;;  %1679 = vmatprep.subr.mxu1 %v173_v27  ;;  %v193_v12 = vld [vmem:[%s3621_s1 + $0x470] sm:$0xff]  ;;  %v226_v13 = vld [vmem:[%s3621_s1 + $0x578] sm:$0xff]  ;;  %v192_v16 = vld [vmem:[%s3621_s1 + $0x468] sm:$0xff] }
  0x31   :  { %1647 = vmatpush3.msra.mxu0 %v124_v28  ;;  %1680 = vmatpush3.msra.mxu1 %v157_v29  ;;  %v241_v15 = vld [vmem:[%s3621_s1 + $0x5f0] sm:$0xff]  ;;  %v207_v18 = vld [vmem:[%s3621_s1 + $0x4e0] sm:$0xff]  ;;  %v240_v19 = vld [vmem:[%s3621_s1 + $0x5e8] sm:$0xff] }
  0x32   :  { %1648 = vmatprep.subr.mxu0 %v139_v30  ;;  %1681 = vmatprep.subr.mxu1 %v172_v31  ;;  %v225_v17 = vld [vmem:[%s3621_s1 + $0x570] sm:$0xff]  ;;  %v191_v20 = vld [vmem:[%s3621_s1 + $0x460] sm:$0xff]  ;;  %v224_v21 = vld [vmem:[%s3621_s1 + $0x568] sm:$0xff] }
  0x33   :  { %1649 = vmatpush3.msra.mxu0 %v123_v32  ;;  %1682 = vmatpush3.msra.mxu1 %v156_v33  ;;  %v206_v22 = vld [vmem:[%s3621_s1 + $0x4d8] sm:$0xff]  ;;  %v239_v23 = vld [vmem:[%s3621_s1 + $0x5e0] sm:$0xff]  ;;  %v205_v26 = vld [vmem:[%s3621_s1 + $0x4d0] sm:$0xff] }
  0x34   :  { %1650 = vmatprep.subr.mxu0 %v138_v34  ;;  %1683 = vmatprep.subr.mxu1 %v171_v35  ;;  %v190_v24 = vld [vmem:[%s3621_s1 + $0x458] sm:$0xff]  ;;  %v223_v25 = vld [vmem:[%s3621_s1 + $0x560] sm:$0xff]  ;;  %v189_v28 = vld [vmem:[%s3621_s1 + $0x450] sm:$0xff] }
  0x35   :  { %1651 = vmatpush3.msra.mxu0 %v122_v36  ;;  %1684 = vmatpush3.msra.mxu1 %v155_v37  ;;  %v238_v27 = vld [vmem:[%s3621_s1 + $0x5d8] sm:$0xff]  ;;  %v204_v30 = vld [vmem:[%s3621_s1 + $0x4c8] sm:$0xff]  ;;  %v237_v31 = vld [vmem:[%s3621_s1 + $0x5d0] sm:$0xff] }
  0x36   :  { %1652 = vmatprep.subr.mxu0 %v137_v38  ;;  %1685 = vmatprep.subr.mxu1 %v170_v39  ;;  %v222_v29 = vld [vmem:[%s3621_s1 + $0x558] sm:$0xff]  ;;  %v188_v32 = vld [vmem:[%s3621_s1 + $0x448] sm:$0xff]  ;;  %v221_v33 = vld [vmem:[%s3621_s1 + $0x550] sm:$0xff] }
  0x37   :  { %1653 = vmatpush3.msra.mxu0 %v121_v40  ;;  %1686 = vmatpush3.msra.mxu1 %v154_v41  ;;  %v203_v34 = vld [vmem:[%s3621_s1 + $0x4c0] sm:$0xff]  ;;  %v236_v35 = vld [vmem:[%s3621_s1 + $0x5c8] sm:$0xff]  ;;  %v202_v38 = vld [vmem:[%s3621_s1 + $0x4b8] sm:$0xff] }
  0x38   :  { %1654 = vmatprep.subr.mxu0 %v136_v42  ;;  %1687 = vmatprep.subr.mxu1 %v169_v43  ;;  %v187_v36 = vld [vmem:[%s3621_s1 + $0x440] sm:$0xff]  ;;  %v220_v37 = vld [vmem:[%s3621_s1 + $0x548] sm:$0xff]  ;;  %v186_v40 = vld [vmem:[%s3621_s1 + $0x438] sm:$0xff] }
  0x39   :  { %1655 = vmatpush3.msra.mxu0 %v120_v44  ;;  %1688 = vmatpush3.msra.mxu1 %v153_v45  ;;  %v235_v39 = vld [vmem:[%s3621_s1 + $0x5c0] sm:$0xff]  ;;  %v201_v42 = vld [vmem:[%s3621_s1 + $0x4b0] sm:$0xff]  ;;  %v234_v43 = vld [vmem:[%s3621_s1 + $0x5b8] sm:$0xff] }
  0x3a   :  { %1656 = vmatprep.subr.mxu0 %v135_v46  ;;  %1689 = vmatprep.subr.mxu1 %v168_v47  ;;  %v219_v41 = vld [vmem:[%s3621_s1 + $0x540] sm:$0xff]  ;;  %v185_v44 = vld [vmem:[%s3621_s1 + $0x430] sm:$0xff]  ;;  %v218_v45 = vld [vmem:[%s3621_s1 + $0x538] sm:$0xff] }
  0x3b   :  { %1657 = vmatpush3.msra.mxu0 %v119_v48  ;;  %1690 = vmatpush3.msra.mxu1 %v152_v49  ;;  %v200_v46 = vld [vmem:[%s3621_s1 + $0x4a8] sm:$0xff]  ;;  %v233_v47 = vld [vmem:[%s3621_s1 + $0x5b0] sm:$0xff] }
  0x3c   :  { %1658 = vmatprep.subr.mxu0 %v134_v50  ;;  %1691 = vmatprep.subr.mxu1 %v167_v51  ;;  %v184_v48 = vld [vmem:[%s3621_s1 + $0x428] sm:$0xff]  ;;  %v217_v49 = vld [vmem:[%s3621_s1 + $0x530] sm:$0xff]  ;;  %v199_v50 = vld [vmem:[%s3621_s1 + $0x4a0] sm:$0xff] }
  0x3d   :  { %1659 = vmatpush3.msra.mxu0 %v118_v52  ;;  %1692 = vmatpush3.msra.mxu1 %v151_v53  ;;  %v232_v51 = vld [vmem:[%s3621_s1 + $0x5a8] sm:$0xff]  ;;  %v183_v52 = vld [vmem:[%s3621_s1 + $0x420] sm:$0xff] }
  0x3e   :  { %1660 = vmatprep.subr.mxu0 %v133_v54  ;;  %1693 = vmatprep.subr.mxu1 %v166_v55  ;;  %v216_v53 = vld [vmem:[%s3621_s1 + $0x528] sm:$0xff]  ;;  %v198_v54 = vld [vmem:[%s3621_s1 + $0x498] sm:$0xff]  ;;  %v231_v55 = vld [vmem:[%s3621_s1 + $0x5a0] sm:$0xff] }
  0x3f   :  { %1661 = vmatpush3.msra.mxu0 %v117_v56  ;;  %1694 = vmatpush3.msra.mxu1 %v150_v57  ;;  %v182_v56 = vld [vmem:[%s3621_s1 + $0x418] sm:$0xff]  ;;  %v215_v57 = vld [vmem:[%s3621_s1 + $0x520] sm:$0xff] }
  0x40   :  { %1662 = vmatprep.subr.mxu0 %v132_v58  ;;  %1695 = vmatprep.subr.mxu1 %v165_v59  ;;  %v197_v58 = vld [vmem:[%s3621_s1 + $0x490] sm:$0xff]  ;;  %v230_v59 = vld [vmem:[%s3621_s1 + $0x598] sm:$0xff] }
  0x41   :  { %1663 = vmatpush3.msra.mxu0 %v116_v60  ;;  %1696 = vmatpush3.msra.mxu1 %v149_v61  ;;  %v181_v60 = vld [vmem:[%s3621_s1 + $0x410] sm:$0xff]  ;;  %v214_v61 = vld [vmem:[%s3621_s1 + $0x518] sm:$0xff] }
  0x42   :  { %1664 = vmatprep.subr.mxu0 %v131_v62  ;;  %1697 = vmatprep.subr.mxu1 %v164_v63  ;;  %v196_v62 = vld [vmem:[%s3621_s1 + $0x488] sm:$0xff]  ;;  %v229_v63 = vld [vmem:[%s3621_s1 + $0x590] sm:$0xff] }
  0x43   :  { %1665 = vmatpush3.msra.mxu0 %v115_v0  ;;  %662 = vmatprep.mubr.f32.mxu0 %v31_v1  ;;  %v180_v0 = vld [vmem:[%s3621_s1 + $0x408] sm:$0xff]  ;;  %v213_v1 = vld [vmem:[%s3621_s1 + $0x510] sm:$0xff] }
  0x44   :  { %1698 = vmatpush3.msra.mxu1 %v148_v2  ;;  %663 = vmatmul.mubr.f32.vlgmr.msra.gmra.mxu0 %v30_v3  ;;  %v195_v2 = vld [vmem:[%s3621_s1 + $0x480] sm:$0xff]  ;;  %v228_v3 = vld [vmem:[%s3621_s1 + $0x588] sm:$0xff] }
  0x45   :  { %1699 = vmatprep.subr.mxu1 %v163_v4  ;;  %1704 = vmatprep.subr.mxu0 %v210_v5  ;;  %v179_v4 = vld [vmem:[%s3621_s1 + $0x400] sm:$0xff]  ;;  %v35_v5 = vld [vmem:[%s3622_s0 + $0x48] sm:$0xff] }
  0x46   :  { %1700 = vmatpush3.msra.mxu1 %v147_v6  ;;  %732 = vmatprep.mubr.f32.mxu1 %v33_v7  ;;  %v212_v6 = vld [vmem:[%s3621_s1 + $0x508] sm:$0xff]  ;;  %v34_v7 = vld [vmem:[%s3622_s0 + $0x40] sm:$0xff] }
  0x47   :  { %1705 = vmatpush3.msra.mxu0 %v194_v8  ;;  %733 = vmatmul.mubr.f32.vlgmr.msra.gmra.mxu1 %v32_v9  ;;  %v227_v8 = vld [vmem:[%s3621_s1 + $0x580] sm:$0xff]  ;;  %v274_v9 = vld [vmem:[%s3621_s1 + $0x6f8] sm:$0xff] }
  0x48   :  { %1706 = vmatprep.subr.mxu0 %v209_v10  ;;  %1739 = vmatprep.subr.mxu1 %v242_v11  ;;  %v211_v10 = vld [vmem:[%s3621_s1 + $0x500] sm:$0xff]  ;;  %v37_v11 = vld [vmem:[%s3622_s0 + $0x58] sm:$0xff] }
  0x49   :  { %1707 = vmatpush3.msra.mxu0 %v193_v12  ;;  %1740 = vmatpush3.msra.mxu1 %v226_v13  ;;  %v258_v12 = vld [vmem:[%s3621_s1 + $0x678] sm:$0xff]  ;;  %v36_v13 = vld [vmem:[%s3622_s0 + $0x50] sm:$0xff] }
  0x4a   :  { %1708 = vmatprep.subr.mxu0 %v208_v14  ;;  %1741 = vmatprep.subr.mxu1 %v241_v15  ;;  %v273_v14 = vld [vmem:[%s3621_s1 + $0x6f0] sm:$0xff]  ;;  %v306_v15 = vld [vmem:[%s3621_s1 + $0x7f8] sm:$0xff] }
  0x4b   :  { %1709 = vmatpush3.msra.mxu0 %v192_v16  ;;  %1742 = vmatpush3.msra.mxu1 %v225_v17  ;;  %v257_v16 = vld [vmem:[%s3621_s1 + $0x670] sm:$0xff]  ;;  %v290_v17 = vld [vmem:[%s3621_s1 + $0x778] sm:$0xff] }
  0x4c   :  { %1710 = vmatprep.subr.mxu0 %v207_v18  ;;  %1743 = vmatprep.subr.mxu1 %v240_v19  ;;  %v272_v18 = vld [vmem:[%s3621_s1 + $0x6e8] sm:$0xff]  ;;  %v305_v19 = vld [vmem:[%s3621_s1 + $0x7f0] sm:$0xff] }
  0x4d   :  { %1711 = vmatpush3.msra.mxu0 %v191_v20  ;;  %1744 = vmatpush3.msra.mxu1 %v224_v21  ;;  %v256_v20 = vld [vmem:[%s3621_s1 + $0x668] sm:$0xff]  ;;  %v289_v21 = vld [vmem:[%s3621_s1 + $0x770] sm:$0xff] }
  0x4e   :  { %1712 = vmatprep.subr.mxu0 %v206_v22  ;;  %1745 = vmatprep.subr.mxu1 %v239_v23  ;;  %v271_v22 = vld [vmem:[%s3621_s1 + $0x6e0] sm:$0xff]  ;;  %v304_v23 = vld [vmem:[%s3621_s1 + $0x7e8] sm:$0xff] }
  0x4f   :  { %1713 = vmatpush3.msra.mxu0 %v190_v24  ;;  %1746 = vmatpush3.msra.mxu1 %v223_v25  ;;  %v255_v24 = vld [vmem:[%s3621_s1 + $0x660] sm:$0xff]  ;;  %v288_v25 = vld [vmem:[%s3621_s1 + $0x768] sm:$0xff] }
  0x50   :  { %1714 = vmatprep.subr.mxu0 %v205_v26  ;;  %1747 = vmatprep.subr.mxu1 %v238_v27  ;;  %v270_v26 = vld [vmem:[%s3621_s1 + $0x6d8] sm:$0xff]  ;;  %v303_v27 = vld [vmem:[%s3621_s1 + $0x7e0] sm:$0xff] }
  0x51   :  { %1715 = vmatpush3.msra.mxu0 %v189_v28  ;;  %1748 = vmatpush3.msra.mxu1 %v222_v29  ;;  %v254_v28 = vld [vmem:[%s3621_s1 + $0x658] sm:$0xff]  ;;  %v287_v29 = vld [vmem:[%s3621_s1 + $0x760] sm:$0xff] }
  0x52   :  { %1716 = vmatprep.subr.mxu0 %v204_v30  ;;  %1749 = vmatprep.subr.mxu1 %v237_v31  ;;  %v269_v30 = vld [vmem:[%s3621_s1 + $0x6d0] sm:$0xff]  ;;  %v302_v31 = vld [vmem:[%s3621_s1 + $0x7d8] sm:$0xff] }
  0x53   :  { %1717 = vmatpush3.msra.mxu0 %v188_v32  ;;  %1750 = vmatpush3.msra.mxu1 %v221_v33  ;;  %v253_v32 = vld [vmem:[%s3621_s1 + $0x650] sm:$0xff]  ;;  %v286_v33 = vld [vmem:[%s3621_s1 + $0x758] sm:$0xff] }
  0x54   :  { %1718 = vmatprep.subr.mxu0 %v203_v34  ;;  %1751 = vmatprep.subr.mxu1 %v236_v35  ;;  %v268_v34 = vld [vmem:[%s3621_s1 + $0x6c8] sm:$0xff]  ;;  %v301_v35 = vld [vmem:[%s3621_s1 + $0x7d0] sm:$0xff] }
  0x55   :  { %1719 = vmatpush3.msra.mxu0 %v187_v36  ;;  %1752 = vmatpush3.msra.mxu1 %v220_v37  ;;  %v252_v36 = vld [vmem:[%s3621_s1 + $0x648] sm:$0xff]  ;;  %v285_v37 = vld [vmem:[%s3621_s1 + $0x750] sm:$0xff] }
  0x56   :  { %1720 = vmatprep.subr.mxu0 %v202_v38  ;;  %1753 = vmatprep.subr.mxu1 %v235_v39  ;;  %v267_v38 = vld [vmem:[%s3621_s1 + $0x6c0] sm:$0xff]  ;;  %v300_v39 = vld [vmem:[%s3621_s1 + $0x7c8] sm:$0xff] }
  0x57   :  { %1721 = vmatpush3.msra.mxu0 %v186_v40  ;;  %1754 = vmatpush3.msra.mxu1 %v219_v41  ;;  %v251_v40 = vld [vmem:[%s3621_s1 + $0x640] sm:$0xff]  ;;  %v284_v41 = vld [vmem:[%s3621_s1 + $0x748] sm:$0xff] }
  0x58   :  { %1722 = vmatprep.subr.mxu0 %v201_v42  ;;  %1755 = vmatprep.subr.mxu1 %v234_v43  ;;  %v266_v42 = vld [vmem:[%s3621_s1 + $0x6b8] sm:$0xff]  ;;  %v299_v43 = vld [vmem:[%s3621_s1 + $0x7c0] sm:$0xff] }
  0x59   :  { %1723 = vmatpush3.msra.mxu0 %v185_v44  ;;  %1756 = vmatpush3.msra.mxu1 %v218_v45  ;;  %v250_v44 = vld [vmem:[%s3621_s1 + $0x638] sm:$0xff]  ;;  %v283_v45 = vld [vmem:[%s3621_s1 + $0x740] sm:$0xff] }
  0x5a   :  { %1724 = vmatprep.subr.mxu0 %v200_v46  ;;  %1757 = vmatprep.subr.mxu1 %v233_v47  ;;  %v265_v46 = vld [vmem:[%s3621_s1 + $0x6b0] sm:$0xff]  ;;  %v298_v47 = vld [vmem:[%s3621_s1 + $0x7b8] sm:$0xff] }
  0x5b   :  { %1725 = vmatpush3.msra.mxu0 %v184_v48  ;;  %1758 = vmatpush3.msra.mxu1 %v217_v49  ;;  %v249_v48 = vld [vmem:[%s3621_s1 + $0x630] sm:$0xff]  ;;  %v282_v49 = vld [vmem:[%s3621_s1 + $0x738] sm:$0xff] }
  0x5c   :  { %1726 = vmatprep.subr.mxu0 %v199_v50  ;;  %1759 = vmatprep.subr.mxu1 %v232_v51  ;;  %v264_v50 = vld [vmem:[%s3621_s1 + $0x6a8] sm:$0xff]  ;;  %v297_v51 = vld [vmem:[%s3621_s1 + $0x7b0] sm:$0xff] }
  0x5d   :  { %1727 = vmatpush3.msra.mxu0 %v183_v52  ;;  %1760 = vmatpush3.msra.mxu1 %v216_v53  ;;  %v248_v52 = vld [vmem:[%s3621_s1 + $0x628] sm:$0xff]  ;;  %v281_v53 = vld [vmem:[%s3621_s1 + $0x730] sm:$0xff] }
  0x5e   :  { %1728 = vmatprep.subr.mxu0 %v198_v54  ;;  %1761 = vmatprep.subr.mxu1 %v231_v55  ;;  %v263_v54 = vld [vmem:[%s3621_s1 + $0x6a0] sm:$0xff]  ;;  %v296_v55 = vld [vmem:[%s3621_s1 + $0x7a8] sm:$0xff] }
  0x5f   :  { %1729 = vmatpush3.msra.mxu0 %v182_v56  ;;  %1762 = vmatpush3.msra.mxu1 %v215_v57  ;;  %v247_v56 = vld [vmem:[%s3621_s1 + $0x620] sm:$0xff]  ;;  %v280_v57 = vld [vmem:[%s3621_s1 + $0x728] sm:$0xff] }
  0x60   :  { %1730 = vmatprep.subr.mxu0 %v197_v58  ;;  %1763 = vmatprep.subr.mxu1 %v230_v59  ;;  %v262_v58 = vld [vmem:[%s3621_s1 + $0x698] sm:$0xff]  ;;  %v295_v59 = vld [vmem:[%s3621_s1 + $0x7a0] sm:$0xff] }
  0x61   :  { %1731 = vmatpush3.msra.mxu0 %v181_v60  ;;  %1764 = vmatpush3.msra.mxu1 %v214_v61  ;;  %v246_v60 = vld [vmem:[%s3621_s1 + $0x618] sm:$0xff]  ;;  %v279_v61 = vld [vmem:[%s3621_s1 + $0x720] sm:$0xff] }
  0x62   :  { %1732 = vmatprep.subr.mxu0 %v196_v62  ;;  %1765 = vmatprep.subr.mxu1 %v229_v63  ;;  %v261_v62 = vld [vmem:[%s3621_s1 + $0x690] sm:$0xff]  ;;  %v294_v63 = vld [vmem:[%s3621_s1 + $0x798] sm:$0xff] }
  0x63   :  { %1733 = vmatpush3.msra.mxu0 %v180_v0  ;;  %1766 = vmatpush3.msra.mxu1 %v213_v1  ;;  %v245_v0 = vld [vmem:[%s3621_s1 + $0x610] sm:$0xff]  ;;  %v278_v1 = vld [vmem:[%s3621_s1 + $0x718] sm:$0xff] }
  0x64   :  { %1734 = vmatprep.subr.mxu0 %v195_v2  ;;  %1767 = vmatprep.subr.mxu1 %v228_v3  ;;  %v260_v2 = vld [vmem:[%s3621_s1 + $0x688] sm:$0xff]  ;;  %v293_v3 = vld [vmem:[%s3621_s1 + $0x790] sm:$0xff] }
  0x65   :  { %1735 = vmatpush3.msra.mxu0 %v179_v4  ;;  %802 = vmatprep.mubr.f32.mxu0 %v35_v5  ;;  %v244_v4 = vld [vmem:[%s3621_s1 + $0x608] sm:$0xff]  ;;  %v277_v5 = vld [vmem:[%s3621_s1 + $0x710] sm:$0xff] }
  0x66   :  { %1768 = vmatpush3.msra.mxu1 %v212_v6  ;;  %803 = vmatmul.mubr.f32.vlgmr.msra.gmra.mxu0 %v34_v7  ;;  %v259_v6 = vld [vmem:[%s3621_s1 + $0x680] sm:$0xff]  ;;  %v292_v7 = vld [vmem:[%s3621_s1 + $0x788] sm:$0xff] }
  0x67   :  { %1769 = vmatprep.subr.mxu1 %v227_v8  ;;  %1774 = vmatprep.subr.mxu0 %v274_v9  ;;  %v243_v8 = vld [vmem:[%s3621_s1 + $0x600] sm:$0xff]  ;;  %v39_v9 = vld [vmem:[%s3622_s0 + $0x68] sm:$0xff] }
  0x68   :  { %1770 = vmatpush3.msra.mxu1 %v211_v10  ;;  %872 = vmatprep.mubr.f32.mxu1 %v37_v11  ;;  %v276_v10 = vld [vmem:[%s3621_s1 + $0x708] sm:$0xff]  ;;  %v38_v11 = vld [vmem:[%s3622_s0 + $0x60] sm:$0xff] }
  0x69   :  { %1775 = vmatpush3.msra.mxu0 %v258_v12  ;;  %873 = vmatmul.mubr.f32.vlgmr.msra.gmra.mxu1 %v36_v13  ;;  %v291_v12 = vld [vmem:[%s3621_s1 + $0x780] sm:$0xff]  ;;  %v338_v13 = vld [vmem:[%s3621_s1 + $0x8f8] sm:$0xff] }
  0x6a   :  { %1776 = vmatprep.subr.mxu0 %v273_v14  ;;  %1809 = vmatprep.subr.mxu1 %v306_v15  ;;  %v275_v14 = vld [vmem:[%s3621_s1 + $0x700] sm:$0xff]  ;;  %v41_v15 = vld [vmem:[%s3622_s0 + $0x78] sm:$0xff] }
  0x6b   :  { %1777 = vmatpush3.msra.mxu0 %v257_v16  ;;  %1810 = vmatpush3.msra.mxu1 %v290_v17  ;;  %v322_v16 = vld [vmem:[%s3621_s1 + $0x878] sm:$0xff]  ;;  %v40_v17 = vld [vmem:[%s3622_s0 + $0x70] sm:$0xff] }
  0x6c   :  { %1778 = vmatprep.subr.mxu0 %v272_v18  ;;  %1811 = vmatprep.subr.mxu1 %v305_v19  ;;  %v337_v18 = vld [vmem:[%s3621_s1 + $0x8f0] sm:$0xff]  ;;  %v370_v19 = vld [vmem:[%s3621_s1 + $0x9f8] sm:$0xff] }
  0x6d   :  { %1779 = vmatpush3.msra.mxu0 %v256_v20  ;;  %1812 = vmatpush3.msra.mxu1 %v289_v21  ;;  %v321_v20 = vld [vmem:[%s3621_s1 + $0x870] sm:$0xff]  ;;  %v354_v21 = vld [vmem:[%s3621_s1 + $0x978] sm:$0xff] }
  0x6e   :  { %1780 = vmatprep.subr.mxu0 %v271_v22  ;;  %1813 = vmatprep.subr.mxu1 %v304_v23  ;;  %v336_v22 = vld [vmem:[%s3621_s1 + $0x8e8] sm:$0xff]  ;;  %v369_v23 = vld [vmem:[%s3621_s1 + $0x9f0] sm:$0xff] }
  0x6f   :  { %1781 = vmatpush3.msra.mxu0 %v255_v24  ;;  %1814 = vmatpush3.msra.mxu1 %v288_v25  ;;  %v320_v24 = vld [vmem:[%s3621_s1 + $0x868] sm:$0xff]  ;;  %v353_v25 = vld [vmem:[%s3621_s1 + $0x970] sm:$0xff] }
  0x70   :  { %1782 = vmatprep.subr.mxu0 %v270_v26  ;;  %1815 = vmatprep.subr.mxu1 %v303_v27  ;;  %v335_v26 = vld [vmem:[%s3621_s1 + $0x8e0] sm:$0xff]  ;;  %v368_v27 = vld [vmem:[%s3621_s1 + $0x9e8] sm:$0xff] }
  0x71   :  { %1783 = vmatpush3.msra.mxu0 %v254_v28  ;;  %1816 = vmatpush3.msra.mxu1 %v287_v29  ;;  %v319_v28 = vld [vmem:[%s3621_s1 + $0x860] sm:$0xff]  ;;  %v352_v29 = vld [vmem:[%s3621_s1 + $0x968] sm:$0xff] }
  0x72   :  { %1784 = vmatprep.subr.mxu0 %v269_v30  ;;  %1817 = vmatprep.subr.mxu1 %v302_v31  ;;  %v334_v30 = vld [vmem:[%s3621_s1 + $0x8d8] sm:$0xff]  ;;  %v367_v31 = vld [vmem:[%s3621_s1 + $0x9e0] sm:$0xff] }
  0x73   :  { %1785 = vmatpush3.msra.mxu0 %v253_v32  ;;  %1818 = vmatpush3.msra.mxu1 %v286_v33  ;;  %v318_v32 = vld [vmem:[%s3621_s1 + $0x858] sm:$0xff]  ;;  %v351_v33 = vld [vmem:[%s3621_s1 + $0x960] sm:$0xff] }
  0x74   :  { %1786 = vmatprep.subr.mxu0 %v268_v34  ;;  %1819 = vmatprep.subr.mxu1 %v301_v35  ;;  %v333_v34 = vld [vmem:[%s3621_s1 + $0x8d0] sm:$0xff]  ;;  %v366_v35 = vld [vmem:[%s3621_s1 + $0x9d8] sm:$0xff] }
  0x75   :  { %1787 = vmatpush3.msra.mxu0 %v252_v36  ;;  %1820 = vmatpush3.msra.mxu1 %v285_v37  ;;  %v317_v36 = vld [vmem:[%s3621_s1 + $0x850] sm:$0xff]  ;;  %v350_v37 = vld [vmem:[%s3621_s1 + $0x958] sm:$0xff] }
  0x76   :  { %1788 = vmatprep.subr.mxu0 %v267_v38  ;;  %1821 = vmatprep.subr.mxu1 %v300_v39  ;;  %v332_v38 = vld [vmem:[%s3621_s1 + $0x8c8] sm:$0xff]  ;;  %v365_v39 = vld [vmem:[%s3621_s1 + $0x9d0] sm:$0xff] }
  0x77   :  { %1789 = vmatpush3.msra.mxu0 %v251_v40  ;;  %1822 = vmatpush3.msra.mxu1 %v284_v41  ;;  %v316_v40 = vld [vmem:[%s3621_s1 + $0x848] sm:$0xff]  ;;  %v349_v41 = vld [vmem:[%s3621_s1 + $0x950] sm:$0xff] }
  0x78   :  { %1790 = vmatprep.subr.mxu0 %v266_v42  ;;  %1823 = vmatprep.subr.mxu1 %v299_v43  ;;  %v331_v42 = vld [vmem:[%s3621_s1 + $0x8c0] sm:$0xff]  ;;  %v364_v43 = vld [vmem:[%s3621_s1 + $0x9c8] sm:$0xff] }
  0x79   :  { %1791 = vmatpush3.msra.mxu0 %v250_v44  ;;  %1824 = vmatpush3.msra.mxu1 %v283_v45  ;;  %v315_v44 = vld [vmem:[%s3621_s1 + $0x840] sm:$0xff]  ;;  %v348_v45 = vld [vmem:[%s3621_s1 + $0x948] sm:$0xff] }
  0x7a   :  { %1792 = vmatprep.subr.mxu0 %v265_v46  ;;  %1825 = vmatprep.subr.mxu1 %v298_v47  ;;  %v330_v46 = vld [vmem:[%s3621_s1 + $0x8b8] sm:$0xff]  ;;  %v363_v47 = vld [vmem:[%s3621_s1 + $0x9c0] sm:$0xff] }
  0x7b   :  { %1793 = vmatpush3.msra.mxu0 %v249_v48  ;;  %1826 = vmatpush3.msra.mxu1 %v282_v49  ;;  %v314_v48 = vld [vmem:[%s3621_s1 + $0x838] sm:$0xff]  ;;  %v347_v49 = vld [vmem:[%s3621_s1 + $0x940] sm:$0xff] }
  0x7c   :  { %1794 = vmatprep.subr.mxu0 %v264_v50  ;;  %1827 = vmatprep.subr.mxu1 %v297_v51  ;;  %v329_v50 = vld [vmem:[%s3621_s1 + $0x8b0] sm:$0xff]  ;;  %v362_v51 = vld [vmem:[%s3621_s1 + $0x9b8] sm:$0xff] }
  0x7d   :  { %1795 = vmatpush3.msra.mxu0 %v248_v52  ;;  %1828 = vmatpush3.msra.mxu1 %v281_v53  ;;  %v313_v52 = vld [vmem:[%s3621_s1 + $0x830] sm:$0xff]  ;;  %v346_v53 = vld [vmem:[%s3621_s1 + $0x938] sm:$0xff] }
  0x7e   :  { %1796 = vmatprep.subr.mxu0 %v263_v54  ;;  %1829 = vmatprep.subr.mxu1 %v296_v55  ;;  %v328_v54 = vld [vmem:[%s3621_s1 + $0x8a8] sm:$0xff]  ;;  %v361_v55 = vld [vmem:[%s3621_s1 + $0x9b0] sm:$0xff] }
  0x7f   :  { %1797 = vmatpush3.msra.mxu0 %v247_v56  ;;  %1830 = vmatpush3.msra.mxu1 %v280_v57  ;;  %v312_v56 = vld [vmem:[%s3621_s1 + $0x828] sm:$0xff]  ;;  %v345_v57 = vld [vmem:[%s3621_s1 + $0x930] sm:$0xff] }
  0x80   :  { %1798 = vmatprep.subr.mxu0 %v262_v58  ;;  %1831 = vmatprep.subr.mxu1 %v295_v59  ;;  %v327_v58 = vld [vmem:[%s3621_s1 + $0x8a0] sm:$0xff]  ;;  %v360_v59 = vld [vmem:[%s3621_s1 + $0x9a8] sm:$0xff] }
  0x81   :  { %1799 = vmatpush3.msra.mxu0 %v246_v60  ;;  %1832 = vmatpush3.msra.mxu1 %v279_v61  ;;  %v311_v60 = vld [vmem:[%s3621_s1 + $0x820] sm:$0xff]  ;;  %v344_v61 = vld [vmem:[%s3621_s1 + $0x928] sm:$0xff] }
  0x82   :  { %1800 = vmatprep.subr.mxu0 %v261_v62  ;;  %1833 = vmatprep.subr.mxu1 %v294_v63  ;;  %v326_v62 = vld [vmem:[%s3621_s1 + $0x898] sm:$0xff]  ;;  %v359_v63 = vld [vmem:[%s3621_s1 + $0x9a0] sm:$0xff] }
  0x83   :  { %1801 = vmatpush3.msra.mxu0 %v245_v0  ;;  %1834 = vmatpush3.msra.mxu1 %v278_v1  ;;  %v310_v0 = vld [vmem:[%s3621_s1 + $0x818] sm:$0xff]  ;;  %v343_v1 = vld [vmem:[%s3621_s1 + $0x920] sm:$0xff] }
  0x84   :  { %1802 = vmatprep.subr.mxu0 %v260_v2  ;;  %1835 = vmatprep.subr.mxu1 %v293_v3  ;;  %v325_v2 = vld [vmem:[%s3621_s1 + $0x890] sm:$0xff]  ;;  %v358_v3 = vld [vmem:[%s3621_s1 + $0x998] sm:$0xff] }
  0x85   :  { %1803 = vmatpush3.msra.mxu0 %v244_v4  ;;  %1836 = vmatpush3.msra.mxu1 %v277_v5  ;;  %v309_v4 = vld [vmem:[%s3621_s1 + $0x810] sm:$0xff]  ;;  %v342_v5 = vld [vmem:[%s3621_s1 + $0x918] sm:$0xff] }
  0x86   :  { %1804 = vmatprep.subr.mxu0 %v259_v6  ;;  %1837 = vmatprep.subr.mxu1 %v292_v7  ;;  %v324_v6 = vld [vmem:[%s3621_s1 + $0x888] sm:$0xff]  ;;  %v357_v7 = vld [vmem:[%s3621_s1 + $0x990] sm:$0xff] }
  0x87   :  { %1805 = vmatpush3.msra.mxu0 %v243_v8  ;;  %942 = vmatprep.mubr.f32.mxu0 %v39_v9  ;;  %v308_v8 = vld [vmem:[%s3621_s1 + $0x808] sm:$0xff]  ;;  %v341_v9 = vld [vmem:[%s3621_s1 + $0x910] sm:$0xff] }
  0x88   :  { %1838 = vmatpush3.msra.mxu1 %v276_v10  ;;  %943 = vmatmul.mubr.f32.vlgmr.msra.gmra.mxu0 %v38_v11  ;;  %v323_v10 = vld [vmem:[%s3621_s1 + $0x880] sm:$0xff]  ;;  %v356_v11 = vld [vmem:[%s3621_s1 + $0x988] sm:$0xff] }
  0x89   :  { %1839 = vmatprep.subr.mxu1 %v291_v12  ;;  %1844 = vmatprep.subr.mxu0 %v338_v13  ;;  %v307_v12 = vld [vmem:[%s3621_s1 + $0x800] sm:$0xff]  ;;  %v43_v13 = vld [vmem:[%s3622_s0 + $0x88] sm:$0xff] }
  0x8a   :  { %1840 = vmatpush3.msra.mxu1 %v275_v14  ;;  %1012 = vmatprep.mubr.f32.mxu1 %v41_v15  ;;  %v340_v14 = vld [vmem:[%s3621_s1 + $0x908] sm:$0xff]  ;;  %v42_v15 = vld [vmem:[%s3622_s0 + $0x80] sm:$0xff] }
  0x8b   :  { %1845 = vmatpush3.msra.mxu0 %v322_v16  ;;  %1013 = vmatmul.mubr.f32.vlgmr.msra.gmra.mxu1 %v40_v17  ;;  %v355_v16 = vld [vmem:[%s3621_s1 + $0x980] sm:$0xff]  ;;  %v402_v17 = vld [vmem:[%s3621_s1 + $0xaf8] sm:$0xff] }
  0x8c   :  { %1846 = vmatprep.subr.mxu0 %v337_v18  ;;  %1879 = vmatprep.subr.mxu1 %v370_v19  ;;  %v339_v18 = vld [vmem:[%s3621_s1 + $0x900] sm:$0xff]  ;;  %v45_v19 = vld [vmem:[%s3622_s0 + $0x98] sm:$0xff] }
  0x8d   :  { %1847 = vmatpush3.msra.mxu0 %v321_v20  ;;  %1880 = vmatpush3.msra.mxu1 %v354_v21  ;;  %v386_v20 = vld [vmem:[%s3621_s1 + $0xa78] sm:$0xff]  ;;  %v44_v21 = vld [vmem:[%s3622_s0 + $0x90] sm:$0xff] }
  0x8e   :  { %1848 = vmatprep.subr.mxu0 %v336_v22  ;;  %1881 = vmatprep.subr.mxu1 %v369_v23  ;;  %v401_v22 = vld [vmem:[%s3621_s1 + $0xaf0] sm:$0xff]  ;;  %v434_v23 = vld [vmem:[%s3621_s1 + $0xbf8] sm:$0xff] }
  0x8f   :  { %1849 = vmatpush3.msra.mxu0 %v320_v24  ;;  %1882 = vmatpush3.msra.mxu1 %v353_v25  ;;  %v385_v24 = vld [vmem:[%s3621_s1 + $0xa70] sm:$0xff]  ;;  %v418_v25 = vld [vmem:[%s3621_s1 + $0xb78] sm:$0xff] }
  0x90   :  { %1850 = vmatprep.subr.mxu0 %v335_v26  ;;  %1883 = vmatprep.subr.mxu1 %v368_v27  ;;  %v400_v26 = vld [vmem:[%s3621_s1 + $0xae8] sm:$0xff]  ;;  %v433_v27 = vld [vmem:[%s3621_s1 + $0xbf0] sm:$0xff] }
  0x91   :  { %1851 = vmatpush3.msra.mxu0 %v319_v28  ;;  %1884 = vmatpush3.msra.mxu1 %v352_v29  ;;  %v384_v28 = vld [vmem:[%s3621_s1 + $0xa68] sm:$0xff]  ;;  %v417_v29 = vld [vmem:[%s3621_s1 + $0xb70] sm:$0xff] }
  0x92   :  { %1852 = vmatprep.subr.mxu0 %v334_v30  ;;  %1885 = vmatprep.subr.mxu1 %v367_v31  ;;  %v399_v30 = vld [vmem:[%s3621_s1 + $0xae0] sm:$0xff]  ;;  %v432_v31 = vld [vmem:[%s3621_s1 + $0xbe8] sm:$0xff] }
  0x93   :  { %1853 = vmatpush3.msra.mxu0 %v318_v32  ;;  %1886 = vmatpush3.msra.mxu1 %v351_v33  ;;  %v383_v32 = vld [vmem:[%s3621_s1 + $0xa60] sm:$0xff]  ;;  %v416_v33 = vld [vmem:[%s3621_s1 + $0xb68] sm:$0xff] }
  0x94   :  { %1854 = vmatprep.subr.mxu0 %v333_v34  ;;  %1887 = vmatprep.subr.mxu1 %v366_v35  ;;  %v398_v34 = vld [vmem:[%s3621_s1 + $0xad8] sm:$0xff]  ;;  %v431_v35 = vld [vmem:[%s3621_s1 + $0xbe0] sm:$0xff] }
  0x95   :  { %1855 = vmatpush3.msra.mxu0 %v317_v36  ;;  %1888 = vmatpush3.msra.mxu1 %v350_v37  ;;  %v382_v36 = vld [vmem:[%s3621_s1 + $0xa58] sm:$0xff]  ;;  %v415_v37 = vld [vmem:[%s3621_s1 + $0xb60] sm:$0xff] }
  0x96   :  { %1856 = vmatprep.subr.mxu0 %v332_v38  ;;  %1889 = vmatprep.subr.mxu1 %v365_v39  ;;  %v397_v38 = vld [vmem:[%s3621_s1 + $0xad0] sm:$0xff]  ;;  %v430_v39 = vld [vmem:[%s3621_s1 + $0xbd8] sm:$0xff] }
  0x97   :  { %1857 = vmatpush3.msra.mxu0 %v316_v40  ;;  %1890 = vmatpush3.msra.mxu1 %v349_v41  ;;  %v381_v40 = vld [vmem:[%s3621_s1 + $0xa50] sm:$0xff]  ;;  %v414_v41 = vld [vmem:[%s3621_s1 + $0xb58] sm:$0xff] }
  0x98   :  { %1858 = vmatprep.subr.mxu0 %v331_v42  ;;  %1891 = vmatprep.subr.mxu1 %v364_v43  ;;  %v396_v42 = vld [vmem:[%s3621_s1 + $0xac8] sm:$0xff]  ;;  %v429_v43 = vld [vmem:[%s3621_s1 + $0xbd0] sm:$0xff] }
  0x99   :  { %1859 = vmatpush3.msra.mxu0 %v315_v44  ;;  %1892 = vmatpush3.msra.mxu1 %v348_v45  ;;  %v380_v44 = vld [vmem:[%s3621_s1 + $0xa48] sm:$0xff]  ;;  %v413_v45 = vld [vmem:[%s3621_s1 + $0xb50] sm:$0xff] }
  0x9a   :  { %1860 = vmatprep.subr.mxu0 %v330_v46  ;;  %1893 = vmatprep.subr.mxu1 %v363_v47  ;;  %v395_v46 = vld [vmem:[%s3621_s1 + $0xac0] sm:$0xff]  ;;  %v428_v47 = vld [vmem:[%s3621_s1 + $0xbc8] sm:$0xff] }
  0x9b   :  { %1861 = vmatpush3.msra.mxu0 %v314_v48  ;;  %1894 = vmatpush3.msra.mxu1 %v347_v49  ;;  %v379_v48 = vld [vmem:[%s3621_s1 + $0xa40] sm:$0xff]  ;;  %v412_v49 = vld [vmem:[%s3621_s1 + $0xb48] sm:$0xff] }
  0x9c   :  { %1862 = vmatprep.subr.mxu0 %v329_v50  ;;  %1895 = vmatprep.subr.mxu1 %v362_v51  ;;  %v394_v50 = vld [vmem:[%s3621_s1 + $0xab8] sm:$0xff]  ;;  %v427_v51 = vld [vmem:[%s3621_s1 + $0xbc0] sm:$0xff] }
  0x9d   :  { %1863 = vmatpush3.msra.mxu0 %v313_v52  ;;  %1896 = vmatpush3.msra.mxu1 %v346_v53  ;;  %v378_v52 = vld [vmem:[%s3621_s1 + $0xa38] sm:$0xff]  ;;  %v411_v53 = vld [vmem:[%s3621_s1 + $0xb40] sm:$0xff] }
  0x9e   :  { %1864 = vmatprep.subr.mxu0 %v328_v54  ;;  %1897 = vmatprep.subr.mxu1 %v361_v55  ;;  %v393_v54 = vld [vmem:[%s3621_s1 + $0xab0] sm:$0xff]  ;;  %v426_v55 = vld [vmem:[%s3621_s1 + $0xbb8] sm:$0xff] }
  0x9f   :  { %1865 = vmatpush3.msra.mxu0 %v312_v56  ;;  %1898 = vmatpush3.msra.mxu1 %v345_v57  ;;  %v377_v56 = vld [vmem:[%s3621_s1 + $0xa30] sm:$0xff]  ;;  %v410_v57 = vld [vmem:[%s3621_s1 + $0xb38] sm:$0xff] }
  0xa0   :  { %1866 = vmatprep.subr.mxu0 %v327_v58  ;;  %1899 = vmatprep.subr.mxu1 %v360_v59  ;;  %v392_v58 = vld [vmem:[%s3621_s1 + $0xaa8] sm:$0xff]  ;;  %v425_v59 = vld [vmem:[%s3621_s1 + $0xbb0] sm:$0xff] }
  0xa1   :  { %1867 = vmatpush3.msra.mxu0 %v311_v60  ;;  %1900 = vmatpush3.msra.mxu1 %v344_v61  ;;  %v376_v60 = vld [vmem:[%s3621_s1 + $0xa28] sm:$0xff]  ;;  %v409_v61 = vld [vmem:[%s3621_s1 + $0xb30] sm:$0xff] }
  0xa2   :  { %1868 = vmatprep.subr.mxu0 %v326_v62  ;;  %1901 = vmatprep.subr.mxu1 %v359_v63  ;;  %v391_v62 = vld [vmem:[%s3621_s1 + $0xaa0] sm:$0xff]  ;;  %v424_v63 = vld [vmem:[%s3621_s1 + $0xba8] sm:$0xff] }
  0xa3   :  { %1869 = vmatpush3.msra.mxu0 %v310_v0  ;;  %1902 = vmatpush3.msra.mxu1 %v343_v1  ;;  %v375_v0 = vld [vmem:[%s3621_s1 + $0xa20] sm:$0xff]  ;;  %v408_v1 = vld [vmem:[%s3621_s1 + $0xb28] sm:$0xff] }
  0xa4   :  { %1870 = vmatprep.subr.mxu0 %v325_v2  ;;  %1903 = vmatprep.subr.mxu1 %v358_v3  ;;  %v390_v2 = vld [vmem:[%s3621_s1 + $0xa98] sm:$0xff]  ;;  %v423_v3 = vld [vmem:[%s3621_s1 + $0xba0] sm:$0xff] }
  0xa5   :  { %1871 = vmatpush3.msra.mxu0 %v309_v4  ;;  %1904 = vmatpush3.msra.mxu1 %v342_v5  ;;  %v374_v4 = vld [vmem:[%s3621_s1 + $0xa18] sm:$0xff]  ;;  %v407_v5 = vld [vmem:[%s3621_s1 + $0xb20] sm:$0xff] }
  0xa6   :  { %1872 = vmatprep.subr.mxu0 %v324_v6  ;;  %1905 = vmatprep.subr.mxu1 %v357_v7  ;;  %v389_v6 = vld [vmem:[%s3621_s1 + $0xa90] sm:$0xff]  ;;  %v422_v7 = vld [vmem:[%s3621_s1 + $0xb98] sm:$0xff] }
  0xa7   :  { %1873 = vmatpush3.msra.mxu0 %v308_v8  ;;  %1906 = vmatpush3.msra.mxu1 %v341_v9  ;;  %v373_v8 = vld [vmem:[%s3621_s1 + $0xa10] sm:$0xff]  ;;  %v406_v9 = vld [vmem:[%s3621_s1 + $0xb18] sm:$0xff] }
  0xa8   :  { %1874 = vmatprep.subr.mxu0 %v323_v10  ;;  %1907 = vmatprep.subr.mxu1 %v356_v11  ;;  %v388_v10 = vld [vmem:[%s3621_s1 + $0xa88] sm:$0xff]  ;;  %v421_v11 = vld [vmem:[%s3621_s1 + $0xb90] sm:$0xff] }
  0xa9   :  { %1875 = vmatpush3.msra.mxu0 %v307_v12  ;;  %1082 = vmatprep.mubr.f32.mxu0 %v43_v13  ;;  %v372_v12 = vld [vmem:[%s3621_s1 + $0xa08] sm:$0xff]  ;;  %v405_v13 = vld [vmem:[%s3621_s1 + $0xb10] sm:$0xff] }
  0xaa   :  { %1908 = vmatpush3.msra.mxu1 %v340_v14  ;;  %1083 = vmatmul.mubr.f32.vlgmr.msra.gmra.mxu0 %v42_v15  ;;  %v387_v14 = vld [vmem:[%s3621_s1 + $0xa80] sm:$0xff]  ;;  %v420_v15 = vld [vmem:[%s3621_s1 + $0xb88] sm:$0xff] }
  0xab   :  { %1909 = vmatprep.subr.mxu1 %v355_v16  ;;  %1914 = vmatprep.subr.mxu0 %v402_v17  ;;  %v371_v16 = vld [vmem:[%s3621_s1 + $0xa00] sm:$0xff]  ;;  %v47_v17 = vld [vmem:[%s3622_s0 + $0xa8] sm:$0xff] }
  0xac   :  { %1910 = vmatpush3.msra.mxu1 %v339_v18  ;;  %1152 = vmatprep.mubr.f32.mxu1 %v45_v19  ;;  %v404_v18 = vld [vmem:[%s3621_s1 + $0xb08] sm:$0xff]  ;;  %v46_v19 = vld [vmem:[%s3622_s0 + $0xa0] sm:$0xff] }
  0xad   :  { %1915 = vmatpush3.msra.mxu0 %v386_v20  ;;  %1153 = vmatmul.mubr.f32.vlgmr.msra.gmra.mxu1 %v44_v21  ;;  %v419_v20 = vld [vmem:[%s3621_s1 + $0xb80] sm:$0xff] }
  0xae   :  { %1916 = vmatprep.subr.mxu0 %v401_v22  ;;  %1949 = vmatprep.subr.mxu1 %v434_v23  ;;  %v403_v21 = vld [vmem:[%s3621_s1 + $0xb00] sm:$0xff]  ;;  %v49_v22 = vld [vmem:[%s3622_s0 + $0xb8] sm:$0xff] }
  0xaf   :  { %1917 = vmatpush3.msra.mxu0 %v385_v24  ;;  %1950 = vmatpush3.msra.mxu1 %v418_v25  ;;  %v450_v23 = vld [vmem:[%s3621_s1 + $0xc78] sm:$0xff]  ;;  %v48_v24 = vld [vmem:[%s3622_s0 + $0xb0] sm:$0xff]  ;;  %v2142_v25 = vmov 0.0  }
  0xb0   :  { %1918 = vmatprep.subr.mxu0 %v400_v26  ;;  %1951 = vmatprep.subr.mxu1 %v433_v27  ;;  %v449_v26 = vld [vmem:[%s3621_s1 + $0xc70] sm:$0xff]  ;;  %v448_v27 = vld [vmem:[%s3621_s1 + $0xc68] sm:$0xff] }
  0xb1   :  { %1919 = vmatpush3.msra.mxu0 %v384_v28  ;;  %1952 = vmatpush3.msra.mxu1 %v417_v29  ;;  %v447_v28 = vld [vmem:[%s3621_s1 + $0xc60] sm:$0xff]  ;;  %v446_v29 = vld [vmem:[%s3621_s1 + $0xc58] sm:$0xff] }
  0xb2   :  { %1920 = vmatprep.subr.mxu0 %v399_v30  ;;  %1953 = vmatprep.subr.mxu1 %v432_v31  ;;  %v445_v30 = vld [vmem:[%s3621_s1 + $0xc50] sm:$0xff]  ;;  %v444_v31 = vld [vmem:[%s3621_s1 + $0xc48] sm:$0xff] }
  0xb3   :  { %1921 = vmatpush3.msra.mxu0 %v383_v32  ;;  %1954 = vmatpush3.msra.mxu1 %v416_v33  ;;  %v443_v32 = vld [vmem:[%s3621_s1 + $0xc40] sm:$0xff]  ;;  %v442_v33 = vld [vmem:[%s3621_s1 + $0xc38] sm:$0xff] }
  0xb4   :  { %1922 = vmatprep.subr.mxu0 %v398_v34  ;;  %1955 = vmatprep.subr.mxu1 %v431_v35  ;;  %v441_v34 = vld [vmem:[%s3621_s1 + $0xc30] sm:$0xff]  ;;  %v440_v35 = vld [vmem:[%s3621_s1 + $0xc28] sm:$0xff] }
  0xb5   :  { %1923 = vmatpush3.msra.mxu0 %v382_v36  ;;  %1956 = vmatpush3.msra.mxu1 %v415_v37  ;;  %v439_v36 = vld [vmem:[%s3621_s1 + $0xc20] sm:$0xff]  ;;  %v438_v37 = vld [vmem:[%s3621_s1 + $0xc18] sm:$0xff] }
  0xb6   :  { %1924 = vmatprep.subr.mxu0 %v397_v38  ;;  %1957 = vmatprep.subr.mxu1 %v430_v39  ;;  %v437_v38 = vld [vmem:[%s3621_s1 + $0xc10] sm:$0xff]  ;;  %v436_v39 = vld [vmem:[%s3621_s1 + $0xc08] sm:$0xff] }
  0xb7   :  { %1925 = vmatpush3.msra.mxu0 %v381_v40  ;;  %1958 = vmatpush3.msra.mxu1 %v414_v41  ;;  %v435_v40 = vld [vmem:[%s3621_s1 + $0xc00] sm:$0xff] }
  0xb8   :  { %1926 = vmatprep.subr.mxu0 %v396_v42  ;;  %1959 = vmatprep.subr.mxu1 %v429_v43  ;;  %v50_v41 = vld [vmem:[%s3622_s0 + $0xc0] sm:$0xff]  ;;  %v1384_v42 = vld [vmem:[%s3623_s3 + $0x78] sm:$0xff]  ;;  %v1383_v43 = vld [vmem:[%s3623_s3 + $0x70] sm:$0xff] }
  0xb9   :  { %1927 = vmatpush3.msra.mxu0 %v380_v44  ;;  %1960 = vmatpush3.msra.mxu1 %v413_v45  ;;  %v1382_v44 = vld [vmem:[%s3623_s3 + $0x68] sm:$0xff]  ;;  %v1381_v45 = vld [vmem:[%s3623_s3 + $0x60] sm:$0xff] }
  0xba   :  { %1928 = vmatprep.subr.mxu0 %v395_v46  ;;  %1961 = vmatprep.subr.mxu1 %v428_v47  ;;  %v1380_v46 = vld [vmem:[%s3623_s3 + $0x58] sm:$0xff]  ;;  %v1379_v47 = vld [vmem:[%s3623_s3 + $0x50] sm:$0xff] }
  0xbb   :  { %1929 = vmatpush3.msra.mxu0 %v379_v48  ;;  %1962 = vmatpush3.msra.mxu1 %v412_v49  ;;  %v1378_v48 = vld [vmem:[%s3623_s3 + $0x48] sm:$0xff]  ;;  %v1377_v49 = vld [vmem:[%s3623_s3 + $0x40] sm:$0xff] }
  0xbc   :  { %1930 = vmatprep.subr.mxu0 %v394_v50  ;;  %1963 = vmatprep.subr.mxu1 %v427_v51  ;;  %v1376_v50 = vld [vmem:[%s3623_s3 + $0x38] sm:$0xff]  ;;  %v1375_v51 = vld [vmem:[%s3623_s3 + $0x30] sm:$0xff] }
  0xbd   :  { %1931 = vmatpush3.msra.mxu0 %v378_v52  ;;  %1964 = vmatpush3.msra.mxu1 %v411_v53  ;;  %v1374_v52 = vld [vmem:[%s3623_s3 + $0x28] sm:$0xff]  ;;  %v1373_v53 = vld [vmem:[%s3623_s3 + $0x20] sm:$0xff] }
  0xbe   :  { %1932 = vmatprep.subr.mxu0 %v393_v54  ;;  %1965 = vmatprep.subr.mxu1 %v426_v55  ;;  %v1372_v54 = vld [vmem:[%s3623_s3 + $0x18] sm:$0xff]  ;;  %v1371_v55 = vld [vmem:[%s3623_s3 + $0x10] sm:$0xff] }
  0xbf   :  { %1933 = vmatpush3.msra.mxu0 %v377_v56  ;;  %1966 = vmatpush3.msra.mxu1 %v410_v57  ;;  %v1370_v56 = vld [vmem:[%s3623_s3 + $0x8] sm:$0xff]  ;;  %v1369_v57 = vld [vmem:[%s3623_s3] sm:$0xff] }
  0xc0   :  { %1934 = vmatprep.subr.mxu0 %v392_v58  ;;  %1967 = vmatprep.subr.mxu1 %v425_v59  ;;  %v1478_v58 = vld [vmem:[%s3624_s5 + $0x78] sm:$0xff]  ;;  %v1477_v59 = vld [vmem:[%s3624_s5 + $0x70] sm:$0xff] }
  0xc1   :  { %1935 = vmatpush3.msra.mxu0 %v376_v60  ;;  %1968 = vmatpush3.msra.mxu1 %v409_v61  ;;  %v1476_v60 = vld [vmem:[%s3624_s5 + $0x68] sm:$0xff]  ;;  %v1475_v61 = vld [vmem:[%s3624_s5 + $0x60] sm:$0xff] }
  0xc2   :  { %1936 = vmatprep.subr.mxu0 %v391_v62  ;;  %1969 = vmatprep.subr.mxu1 %v424_v63  ;;  %v1474_v62 = vld [vmem:[%s3624_s5 + $0x58] sm:$0xff]  ;;  %v1473_v63 = vld [vmem:[%s3624_s5 + $0x50] sm:$0xff] }
  0xc3   :  { %1937 = vmatpush3.msra.mxu0 %v375_v0  ;;  %1970 = vmatpush3.msra.mxu1 %v408_v1  ;;  %v1472_v0 = vld [vmem:[%s3624_s5 + $0x48] sm:$0xff]  ;;  %v1471_v1 = vld [vmem:[%s3624_s5 + $0x40] sm:$0xff] }
  0xc4   :  { %1938 = vmatprep.subr.mxu0 %v390_v2  ;;  %1971 = vmatprep.subr.mxu1 %v423_v3  ;;  %v1470_v2 = vld [vmem:[%s3624_s5 + $0x38] sm:$0xff]  ;;  %v1469_v3 = vld [vmem:[%s3624_s5 + $0x30] sm:$0xff] }
  0xc5   :  { %1939 = vmatpush3.msra.mxu0 %v374_v4  ;;  %1972 = vmatpush3.msra.mxu1 %v407_v5  ;;  %v1468_v4 = vld [vmem:[%s3624_s5 + $0x28] sm:$0xff]  ;;  %v1467_v5 = vld [vmem:[%s3624_s5 + $0x20] sm:$0xff] }
  0xc6   :  { %1940 = vmatprep.subr.mxu0 %v389_v6  ;;  %1973 = vmatprep.subr.mxu1 %v422_v7  ;;  %v1466_v6 = vld [vmem:[%s3624_s5 + $0x18] sm:$0xff] }
  0xc7   :  { %1941 = vmatpush3.msra.mxu0 %v373_v8  ;;  %1974 = vmatpush3.msra.mxu1 %v406_v9 }
  0xc8   :  { %1942 = vmatprep.subr.mxu0 %v388_v10  ;;  %1975 = vmatprep.subr.mxu1 %v421_v11 }
  0xc9   :  { %1943 = vmatpush3.msra.mxu0 %v372_v12  ;;  %1976 = vmatpush3.msra.mxu1 %v405_v13  ;;  %v1561_v12 = vld [vmem:[%s3625_s2] ss:$0 sm:$0xff] }
  0xca   :  { %1944 = vmatprep.subr.mxu0 %v387_v14  ;;  %1977 = vmatprep.subr.mxu1 %v420_v15 }
  0xcb   :  { %1945 = vmatpush3.msra.mxu0 %v371_v16  ;;  %1222 = vmatprep.mubr.f32.mxu0 %v47_v17 }
  0xcc   :  { %1978 = vmatpush3.msra.mxu1 %v404_v18  ;;  %1223 = vmatmul.mubr.f32.vlgmr.msra.gmra.mxu0 %v46_v19 }
  0xcd   :  { %1979 = vmatprep.subr.mxu1 %v419_v20  ;;  %2035 = vmatprep.subr.mxu0 %v2142_v25 }
  0xce   :  { %1980 = vmatpush3.msra.mxu1 %v403_v21  ;;  %1292 = vmatprep.mubr.f32.mxu1 %v49_v22 }
  0xcf   :  { %2036 = vmatpush3.msra.mxu0 %v450_v23  ;;  %1293 = vmatmul.mubr.f32.vlgmr.msra.gmra.mxu1 %v48_v24 }
  0xd0   :  { %2037 = vmatprep.subr.mxu0 %v2142_v25  ;;  %2067 = vmatprep.mubr.msk.f32.mxu0 %vm2143_vm0, %v2142_v25 }
  0xd1   :  { %2038 = vmatpush3.msra.mxu0 %v449_v26  ;;  %2070 = vmatprep.subr.mxu1 %v2142_v25 }
  0xd2   :  { %2039 = vmatprep.subr.mxu0 %v2142_v25  ;;  %2102 = vmatprep.mubr.msk.f32.mxu1 %vm2143_vm0, %v2142_v25 }
  0xd3   :  { %2040 = vmatpush3.msra.mxu0 %v448_v27  ;;  %2071 = vmatpush3.msra.mxu1 %v1384_v42 }
  0xd4   :  { %2041 = vmatprep.subr.mxu0 %v2142_v25  ;;  %2072 = vmatprep.subr.mxu1 %v2142_v25 }
  0xd5   :  { %2042 = vmatpush3.msra.mxu0 %v447_v28  ;;  %2073 = vmatpush3.msra.mxu1 %v1383_v43 }
  0xd6   :  { %2043 = vmatprep.subr.mxu0 %v2142_v25  ;;  %2074 = vmatprep.subr.mxu1 %v2142_v25 }
  0xd7   :  { %2044 = vmatpush3.msra.mxu0 %v446_v29  ;;  %2075 = vmatpush3.msra.mxu1 %v1382_v44 }
  0xd8   :  { %2045 = vmatprep.subr.mxu0 %v2142_v25  ;;  %2076 = vmatprep.subr.mxu1 %v2142_v25 }
  0xd9   :  { %2046 = vmatpush3.msra.mxu0 %v445_v30  ;;  %2077 = vmatpush3.msra.mxu1 %v1381_v45 }
  0xda   :  { %2047 = vmatprep.subr.mxu0 %v2142_v25  ;;  %2078 = vmatprep.subr.mxu1 %v2142_v25 }
  0xdb   :  { %2048 = vmatpush3.msra.mxu0 %v444_v31  ;;  %2079 = vmatpush3.msra.mxu1 %v1380_v46 }
  0xdc   :  { %2049 = vmatprep.subr.mxu0 %v2142_v25  ;;  %2080 = vmatprep.subr.mxu1 %v2142_v25 }
  0xdd   :  { %2050 = vmatpush3.msra.mxu0 %v443_v32  ;;  %2081 = vmatpush3.msra.mxu1 %v1379_v47 }
  0xde   :  { %2051 = vmatprep.subr.mxu0 %v2142_v25  ;;  %2082 = vmatprep.subr.mxu1 %v2142_v25 }
  0xdf   :  { %2052 = vmatpush3.msra.mxu0 %v442_v33  ;;  %2083 = vmatpush3.msra.mxu1 %v1378_v48 }
  0xe0   :  { %2053 = vmatprep.subr.mxu0 %v2142_v25  ;;  %2084 = vmatprep.subr.mxu1 %v2142_v25 }
  0xe1   :  { %2054 = vmatpush3.msra.mxu0 %v441_v34  ;;  %2085 = vmatpush3.msra.mxu1 %v1377_v49 }
  0xe2   :  { %2055 = vmatprep.subr.mxu0 %v2142_v25  ;;  %2086 = vmatprep.subr.mxu1 %v2142_v25  ;;  %v1596_v7 = vpop.f32.mrf.mxu0 }
  0xe3   :  { %2056 = vmatpush3.msra.mxu0 %v440_v35  ;;  %2087 = vmatpush3.msra.mxu1 %v1376_v50 }
  0xe4   :  { %2057 = vmatprep.subr.mxu0 %v2142_v25  ;;  %2088 = vmatprep.subr.mxu1 %v2142_v25  ;;  %v1597_v8 = vpop.f32.mrf.mxu0 }
  0xe5   :  { %2058 = vmatpush3.msra.mxu0 %v439_v36  ;;  %2089 = vmatpush3.msra.mxu1 %v1375_v51  ;;  %v1631_v9 = vpop.f32.mrf.mxu1  ;;  %v1598_v11 = vadd.f32 %v1597_v8, %v1596_v7 }
  0xe6   :  { %2059 = vmatprep.subr.mxu0 %v2142_v25  ;;  %2090 = vmatprep.subr.mxu1 %v2142_v25 }
  0xe7   :  { %2060 = vmatpush3.msra.mxu0 %v438_v37  ;;  %2091 = vmatpush3.msra.mxu1 %v1374_v52  ;;  %v1632_v13 = vpop.f32.mrf.mxu1  ;;  %v525_v16 = vadd.f32 %v1598_v11, %v1561_v12 }
  0xe8   :  { %2061 = vmatprep.subr.mxu0 %v2142_v25  ;;  %2092 = vmatprep.subr.mxu1 %v2142_v25  ;;  %v1633_v17 = vadd.f32 %v1632_v13, %v1631_v9 }
  0xe9   :  { %2062 = vmatpush3.msra.mxu0 %v437_v38  ;;  %2093 = vmatpush3.msra.mxu1 %v1373_v53 }
  0xea   :  { %2063 = vmatprep.subr.mxu0 %v2142_v25  ;;  %2094 = vmatprep.subr.mxu1 %v2142_v25  ;;  %v595_v21 = vadd.f32 %v1633_v17, %v525_v16 }
  0xeb   :  { %2064 = vmatpush3.msra.mxu0 %v436_v39  ;;  %2095 = vmatpush3.msra.mxu1 %v1372_v54 }
  0xec   :  { %2065 = vmatprep.subr.mxu0 %v2142_v25  ;;  %2096 = vmatprep.subr.mxu1 %v2142_v25 }
  0xed   :  { %2066 = vmatpush3.msra.mxu0 %v435_v40  ;;  %2097 = vmatpush3.msra.mxu1 %v1371_v55 }
  0xee   :  { %2068 = vmatmul.mubr.f32.vlgmr.msra.gmra.mxu0 %v50_v41  ;;  %2105 = vmatprep.subr.mxu0 %v2142_v25 }
  0xef   :  { %2137 = vmatprep.mubr.msk.f32.mxu0 %vm2143_vm0, %v2142_v25  ;;  %2098 = vmatprep.subr.mxu1 %v2142_v25 }
  0xf0   :  { %2099 = vmatpush3.msra.mxu1 %v1370_v56  ;;  %2106 = vmatpush3.msra.mxu0 %v1478_v58 }
  0xf1   :  { %2100 = vmatprep.subr.mxu1 %v2142_v25  ;;  %2107 = vmatprep.subr.mxu0 %v2142_v25 }
  0xf2   :  { %2101 = vmatpush3.msra.mxu1 %v1369_v57  ;;  %2108 = vmatpush3.msra.mxu0 %v1477_v59 }
  0xf3   :  { %2109 = vmatprep.subr.mxu0 %v2142_v25 }
  0xf4   :  { %2110 = vmatpush3.msra.mxu0 %v1476_v60 }
  0xf5   :  { %2111 = vmatprep.subr.mxu0 %v2142_v25 }
  0xf6   :  { %2112 = vmatpush3.msra.mxu0 %v1475_v61  ;;  %v1465_v61 = vld [vmem:[%s3624_s5 + $0x10] sm:$0xff] }
  0xf7   :  { %2113 = vmatprep.subr.mxu0 %v2142_v25 }
  0xf8   :  { %2114 = vmatpush3.msra.mxu0 %v1474_v62  ;;  %v1464_v62 = vld [vmem:[%s3624_s5 + $0x8] sm:$0xff] }
  0xf9   :  { %2115 = vmatprep.subr.mxu0 %v2142_v25 }
  0xfa   :  { %2116 = vmatpush3.msra.mxu0 %v1473_v63  ;;  %v1463_v63 = vld [vmem:[%s3624_s5] sm:$0xff] }
  0xfb   :  { %2117 = vmatprep.subr.mxu0 %v2142_v25 }
  0xfc   :  { %2118 = vmatpush3.msra.mxu0 %v1472_v0  ;;  %v1562_v0 = vld [vmem:[%s3626_s4] ss:$0 sm:$0xff] }
  0xfd   :  { %2119 = vmatprep.subr.mxu0 %v2142_v25 }
  0xfe   :  { %2120 = vmatpush3.msra.mxu0 %v1471_v1 }
  0xff   :  { %2121 = vmatprep.subr.mxu0 %v2142_v25 }
 0x100   :  { %2122 = vmatpush3.msra.mxu0 %v1470_v2 }
 0x101   :  { %2123 = vmatprep.subr.mxu0 %v2142_v25 }
 0x102   :  { %2124 = vmatpush3.msra.mxu0 %v1469_v3 }
 0x103   :  { %2125 = vmatprep.subr.mxu0 %v2142_v25 }
 0x104   :  { %2126 = vmatpush3.msra.mxu0 %v1468_v4  ;;  %v1666_v10 = vpop.f32.mrf.mxu0 }
 0x105   :  { %2127 = vmatprep.subr.mxu0 %v2142_v25 }
 0x106   :  { %2128 = vmatpush3.msra.mxu0 %v1467_v5  ;;  %v1667_v14 = vpop.f32.mrf.mxu0  ;;  %v1563_v5 = vld [vmem:[%s3627_s6] ss:$0 sm:$0xff] }
 0x107   :  { %2129 = vmatprep.subr.mxu0 %v2142_v25  ;;  %v1701_v15 = vpop.f32.mrf.mxu1  ;;  %v1668_v19 = vadd.f32 %v1667_v14, %v1666_v10 }
 0x108   :  { %2130 = vmatpush3.msra.mxu0 %v1466_v6 }
 0x109   :  { %2131 = vmatprep.subr.mxu0 %v2142_v25  ;;  %v1702_v20 = vpop.f32.mrf.mxu1  ;;  %v665_v24 = vadd.f32 %v1668_v19, %v595_v21 }
 0x10a   :  { %v1703_v26 = vadd.f32 %v1702_v20, %v1701_v15  ;;  %2132 = vmatpush3.msra.mxu0 %v1465_v61 }
 0x10b   :  { %2133 = vmatprep.subr.mxu0 %v2142_v25 }
 0x10c   :  { %v735_v30 = vadd.f32 %v1703_v26, %v665_v24  ;;  %2134 = vmatpush3.msra.mxu0 %v1464_v62 }
 0x10d   :  { %2135 = vmatprep.subr.mxu0 %v2142_v25 }
 0x10e   :  { %2136 = vmatpush3.msra.mxu0 %v1463_v63 }
 0x126   :  { %v1736_v18 = vpop.f32.mrf.mxu0 }
 0x128   :  { %v1737_v22 = vpop.f32.mrf.mxu0 }
 0x129   :  { %v1771_v23 = vpop.f32.mrf.mxu1  ;;  %v1738_v28 = vadd.f32 %v1737_v22, %v1736_v18 }
 0x12b   :  { %v1772_v29 = vpop.f32.mrf.mxu1  ;;  %v805_v33 = vadd.f32 %v1738_v28, %v735_v30 }
 0x12c   :  { %v1773_v34 = vadd.f32 %v1772_v29, %v1771_v23 }
 0x12e   :  { %v875_v38 = vadd.f32 %v1773_v34, %v805_v33 }
 0x148   :  { %v1806_v27 = vpop.f32.mrf.mxu0 }
 0x14a   :  { %v1807_v31 = vpop.f32.mrf.mxu0 }
 0x14b   :  { %v1841_v32 = vpop.f32.mrf.mxu1  ;;  %v1808_v36 = vadd.f32 %v1807_v31, %v1806_v27 }
 0x14d   :  { %v1842_v37 = vpop.f32.mrf.mxu1  ;;  %v945_v41 = vadd.f32 %v1808_v36, %v875_v38 }
 0x14e   :  { %v1843_v42 = vadd.f32 %v1842_v37, %v1841_v32 }
 0x150   :  { %v1015_v46 = vadd.f32 %v1843_v42, %v945_v41 }
 0x16a   :  { %v1876_v35 = vpop.f32.mrf.mxu0 }
 0x16c   :  { %v1877_v39 = vpop.f32.mrf.mxu0 }
 0x16d   :  { %v1911_v40 = vpop.f32.mrf.mxu1  ;;  %v1878_v44 = vadd.f32 %v1877_v39, %v1876_v35 }
 0x16f   :  { %v1912_v45 = vpop.f32.mrf.mxu1  ;;  %v1085_v49 = vadd.f32 %v1878_v44, %v1015_v46 }
 0x170   :  { %v1913_v50 = vadd.f32 %v1912_v45, %v1911_v40 }
 0x172   :  { %v1155_v53 = vadd.f32 %v1913_v50, %v1085_v49 }
 0x18c   :  { %v1946_v43 = vpop.f32.mrf.mxu0 }
 0x18e   :  { %v1947_v47 = vpop.f32.mrf.mxu0 }
 0x18f   :  { %v1981_v48 = vpop.f32.mrf.mxu1  ;;  %v1948_v51 = vadd.f32 %v1947_v47, %v1946_v43 }
 0x191   :  { %v1982_v52 = vpop.f32.mrf.mxu1  ;;  %v1225_v54 = vadd.f32 %v1948_v51, %v1155_v53 }
 0x192   :  { %v1983_v55 = vadd.f32 %v1982_v52, %v1981_v48 }
 0x194   :  { %v1295_v56 = vadd.f32 %v1983_v55, %v1225_v54 }
 0x1ae   :  { %v1364_v57 = vpop.f32.mrf.mxu0 }
 0x1af   :  { %v1365_v58 = vadd.f32 %v1364_v57, %v1295_v56 }
 0x1b0   :  { %v2069_v59 = vpop.f32.mrf.mxu0 }
 0x1b1   :  { %v1368_v60 = vmax.f32 %v1365_v58, 0.0 }
 0x1b3   :  { %2103 = vmatmul.mubr.f32.vlgmr.msra.gmra.mxu1 %v1368_v60 }
 0x273   :  { %v1458_v1 = vpop.f32.mrf.mxu1 }
 0x274   :  { %v1459_v2 = vadd.f32 %v1562_v0, %v1458_v1 }
 0x275   :  { %v2104_v3 = vpop.f32.mrf.mxu1 }
 0x276   :  { %v1462_v4 = vmax.f32 %v1459_v2, 0.0 }
 0x278   :  { %2138 = vmatmul.mubr.f32.vlgmr.msra.gmra.mxu0 %v1462_v4 }
 0x338   :  { %v1552_v6 = vpop.f32.mrf.mxu0 }
 0x339   :  { %v1553_v25 = vadd.f32 %v1563_v5, %v1552_v6 }
 0x33a   :  { %v2139_v7 = vpop.f32.mrf.mxu0 }
 0x33b   :  { %1556 = vst [vmem:[%s3628_s7] sm:$0xff] %v1553_v25 }

</bundles_post_ra>
